<compile_context>
chip_gen: v6e
topology: v6e:2x2x1
jax: 0.10.0
libtpu: 0.0.40
codegen_flags: <defaults>
</compile_context>

<pallas_src>
import functools
import math

import jax
import jax.numpy as jnp
from jax import lax
from jax.experimental import pallas as pl
from jax.experimental.pallas import tpu as pltpu

_LANE = 128
_SUBLANE = 8


def _round_up(x, m):
    return -(-x // m) * m


def _roll(x, shift, axis):
    """pltpu.roll (jnp.roll semantics) with a statically normalised shift."""
    axis = axis % x.ndim
    n = x.shape[axis]
    shift = shift % n
    if shift == 0:
        return x
    return pltpu.roll(x, shift=shift, axis=axis)


def _make_tap_fns(H, W, plane, packed):
    """Shift helpers for one image-plane layout.

    plane is (R, 128) when packed (row-major flattened image) else (H, W).
      shift_rows(p, oy): value[h, w] = p[h + oy, w]  (zero outside the image)
      shift_cols(p, ox): value[h, w] = p[h, w + ox]  (zero outside the image)
    All masks are built once from 2-D broadcasted_iota and reused per channel/tap.
    """
    if packed:
        R, L = plane
        # Packed path requires W | 128, hence W is a power of two -> pure bit math.
        lgw = W.bit_length() - 1
        l_idx = lax.broadcasted_iota(jnp.int32, (R, L), 1)
        gidx = lax.broadcasted_iota(jnp.int32, (R, L), 0) * L + l_idx
        hh = gidx >> lgw                      # image row   (gidx // W)
        ww = l_idx & (W - 1)                  # image col   (gidx %  W, since W | L)
        row_ok = {-1: hh >= 1, 1: hh <= H - 2}
        col_ok = {-1: ww >= 1, 1: ww <= W - 2}
        use_a_hi = l_idx < (L - W)            # oy=+1: lanes not needing the carry row
        use_a_lo = l_idx >= W                 # oy=-1

        def shift_rows(p, oy):
            if oy == 0:
                return p
            s = oy * W                        # flat (row-major) shift
            a = _roll(p, -s, axis=-1)         # lane component of the flat shift
            if s > 0:
                b = _roll(a, -1, axis=-2)     # carry from the next packed row
                v = jnp.where(use_a_hi, a, b)
            else:
                b = _roll(a, 1, axis=-2)      # carry from the previous packed row
                v = jnp.where(use_a_lo, a, b)
            return jnp.where(row_ok[oy], v, 0.0)

        def shift_cols(p, ox):
            if ox == 0:
                return p
            # +-1 lane roll; its wrap only lands on w==0 / w==W-1 lanes (W | 128),
            # which the column mask zeroes anyway -> no sublane carry needed.
            return jnp.where(col_ok[ox], _roll(p, -ox, axis=-1), 0.0)

    else:
        h_idx = lax.broadcasted_iota(jnp.int32, plane, 0)
        w_idx = lax.broadcasted_iota(jnp.int32, plane, 1)
        row_ok = {-1: h_idx >= 1, 1: h_idx <= H - 2}
        col_ok = {-1: w_idx >= 1, 1: w_idx <= W - 2}

        def shift_rows(p, oy):
            if oy == 0:
                return p
            return jnp.where(row_ok[oy], _roll(p, -oy, axis=-2), 0.0)

        def shift_cols(p, ox):
            if ox == 0:
                return p
            return jnp.where(col_ok[ox], _roll(p, -ox, axis=-1), 0.0)

    return shift_rows, shift_cols


def _conv3x3_1out_kernel(x_ref, w_ref, b_ref, o_ref, *,
                         img_hw, packed, use_sigmoid, chunk):
    """3x3 / padding=1 / out_channels=1 conv (+ optional sigmoid).

    x_ref : (Bn, C) + plane   VMEM input block  (plane = (R,128) packed or (H,W))
    w_ref : (C*9,)            SMEM conv weight, (c, ky, kx) order
    b_ref : (1,)              SMEM conv bias
    o_ref : (Bn,) + plane     VMEM output block (lane-dense when packed)
    """
    H, W = img_hw
    Bn, C = x_ref.shape[0], x_ref.shape[1]
    plane = x_ref.shape[2:]
    shift_rows, shift_cols = _make_tap_fns(H, W, plane, packed)

    squeeze = (chunk == 1)                   # demo path: pure 2-D (R,128) compute
    acc_shape = plane if squeeze else (chunk,) + plane

    def accum_channel(acc, xc, wget):
        # Hoist the dy (row) shifts; reuse each dy-plane for the three dx taps so
        # only one shifted plane is live at a time (keeps vreg pressure flat).
        for oy in (-1, 0, 1):
            p = shift_rows(xc, oy)
            for ox in (-1, 0, 1):
                acc = acc + shift_cols(p, ox) * wget((oy + 1) * 3 + (ox + 1))
        return acc

    def do_strip(b0):
        acc = jnp.full(acc_shape, b_ref[0], jnp.float32)   # bias init, f32 accum

        def load(c):                                        # c: static or traced
            v = x_ref[pl.ds(b0, chunk), pl.ds(c, 1)].astype(jnp.float32)
            v = v[:, 0]                                     # (chunk,) + plane
            return v[0] if squeeze else v

        if C <= 32:
            for c in range(C):                              # unrolled channel loop
                acc = accum_channel(acc, load(c), lambda t, c=c: w_ref[c * 9 + t])
        else:
            # Large in_channels: bound traced code size / live ranges.
            def c_body(c, a):
                return accum_channel(a, load(c), lambda t: w_ref[c * 9 + t])
            acc = lax.fori_loop(0, C, c_body, acc)

        if use_sigmoid:
            acc = jax.nn.sigmoid(acc)
        out = acc[None] if squeeze else acc
        o_ref[pl.ds(b0, chunk)] = out.astype(o_ref.dtype)

    if Bn == chunk:
        do_strip(0)
    else:
        # Register-strip loop over the batch block: keeps the accumulator and
        # shifted planes small even when the block is sized for DMA efficiency.
        def strip(i, carry):
            do_strip(pl.multiple_of(i * chunk, chunk))
            return carry
        lax.fori_loop(0, Bn // chunk, strip, 0)


def _vmem_capacity_bytes():
    try:
        return int(pltpu.get_tpu_info().vmem_capacity_bytes)
    except Exception:
        return 64 << 20            # conservative (v7x-sized) fallback


def _padded_plane_bytes(plane, itemsize):
    # Physical VMEM footprint of one (sublane, lane) plane after (8,128) tiling.
    return _round_up(plane[0], _SUBLANE) * _round_up(plane[1], _LANE) * itemsize


def _plane_vregs(plane):
    return (_round_up(plane[0], _SUBLANE) // _SUBLANE) * (_round_up(plane[1], _LANE) // _LANE)


def _pick_batch_block(N, C, plane, itemsize, chunk, vmem_cap):
    """Largest batch block (a divisor of N) whose tile-padded footprint fits a
    chip-aware budget, keeping >=2 grid steps when N >= 2 (both v7x TensorCores)
    and keeping the in-kernel register strips even."""
    budget = max(vmem_cap // 6, 4 << 20)     # ~10 MiB on v7x, ~21 MiB on v5e/v6e
    per_img = (3 * C * _padded_plane_bytes(plane, itemsize)   # input (<=3 buffers)
               + 2 * _padded_plane_bytes(plane, itemsize))    # output (2 buffers)
    best = 1
    for bn in range(1, N + 1):
        if N % bn:
            continue
        if bn * per_img > budget:
            break
        if N >= 2 and N // bn < 2:
            continue
        if bn > chunk and bn % chunk:
            continue
        best = bn
    return best, per_img


def label_prob_estimator(x_nchw, weight, bias, *, use_sigmoid: bool = False):
    """Forward pass of _LabelProbEstimator (spatial=True: 3x3 conv, 1 output channel).

    x_nchw : (N, C, H, W) float32
    weight : (1, C, 3, 3) (PyTorch Conv2d(C, 1, 3) weight, OIHW)
    bias   : scalar / (1,)
    returns: (N, 1, H, W)
    """
    # TODO(synk): spatial=False (1x1 pointwise conv) constructor branch not implemented;
    # this kernel covers the module's default spatial=True path.
    N, C, H, W = x_nchw.shape
    w_flat = jnp.asarray(weight, jnp.float32).reshape(-1)    # (C*9,), (c, ky, kx)
    assert w_flat.shape[0] == C * 9, "expected a (1, C, 3, 3) conv weight"
    b_flat = jnp.asarray(bias, jnp.float32).reshape(1)

    # Lane-dense packing of each image plane into (R, 128) when possible.  The
    # reshape is of a contiguous NCHW array -> free metadata change, no HBM copy.
    packed = (W < _LANE) and (_LANE % W == 0) and ((H * W) % _LANE == 0)
    if packed:
        plane = ((H * W) // _LANE, _LANE)
        x_in = x_nchw.reshape(N, C, *plane)
    else:
        plane = (H, W)
        x_in = x_nchw

    itemsize = x_nchw.dtype.itemsize
    vmem_cap = _vmem_capacity_bytes()
    # Images per in-kernel register strip: keep the f32 accumulator (plus one
    # shifted plane and temporaries) at a handful of vregs.
    chunk = max(1, 4 // _plane_vregs(plane))
    Bn, per_img = _pick_batch_block(N, C, plane, itemsize, chunk, vmem_cap)
    chunk = min(chunk, Bn)
    if Bn % chunk:
        chunk = math.gcd(Bn, chunk)
    steps = N // Bn

    x_block = (Bn, C) + plane
    if steps >= 4:
        # Purely HBM-bound once compute is this small: deepen input pipelining.
        x_spec = pl.BlockSpec(x_block, lambda n: (n, 0, 0, 0),
                              pipeline_mode=pl.Buffered(3))
    else:
        x_spec = pl.BlockSpec(x_block, lambda n: (n, 0, 0, 0))

    kernel = functools.partial(
        _conv3x3_1out_kernel, img_hw=(H, W), packed=packed,
        use_sigmoid=use_sigmoid, chunk=chunk)

    vmem_limit = int(min(max(2 * Bn * per_img, 32 << 20), int(0.9 * vmem_cap)))

    out = pl.pallas_call(
        kernel,
        out_shape=jax.ShapeDtypeStruct((N,) + plane, x_nchw.dtype),
        grid_spec=pltpu.PrefetchScalarGridSpec(
            num_scalar_prefetch=0,
            grid=(steps,),
            in_specs=[
                x_spec,
                # Small conv params stay on the scalar path.
                pl.BlockSpec(memory_space=pltpu.MemorySpace.SMEM),
                pl.BlockSpec(memory_space=pltpu.MemorySpace.SMEM),
            ],
            out_specs=pl.BlockSpec((Bn,) + plane, lambda n: (n, 0, 0)),
        ),
        compiler_params=pltpu.CompilerParams(
            dimension_semantics=("parallel",),
            vmem_limit_bytes=vmem_limit),
    )(x_in, w_flat, b_flat)

    # TODO(synk): add a second "parallel" grid axis over row blocks (1-row halo) so a
    # single large image (N == 1) still uses both v7x TensorCores, and strip the row
    # accumulation through a VMEM scratch for very large H*W planes.
    return out.reshape(N, 1, H, W)


if __name__ == "__main__":
    # Module defaults: in_channels=16, spatial=True.  Small deterministic inputs.
    N, C, H, W = 2, 16, 16, 16

    key = jax.random.PRNGKey(0)
    kx, kw, kb = jax.random.split(key, 3)

    x = jax.random.normal(kx, (N, C, H, W), dtype=jnp.float32)
    weight = jax.random.normal(kw, (1, C, 3, 3), dtype=jnp.float32) * 0.1   # OIHW
    bias = jax.random.normal(kb, (1,), dtype=jnp.float32) * 0.1

    for use_sigmoid in (False, True):
        out = label_prob_estimator(x, weight, bias, use_sigmoid=use_sigmoid)
        out = jax.block_until_ready(out)

        ref = lax.conv_general_dilated(
            x, weight, window_strides=(1, 1), padding=((1, 1), (1, 1)),
            dimension_numbers=("NCHW", "OIHW", "NCHW")) + bias[0]
        if use_sigmoid:
            ref = jax.nn.sigmoid(ref)

        assert out.shape == (N, 1, H, W)
        assert jnp.allclose(out, ref, atol=1e-5, rtol=1e-5), \
            float(jnp.max(jnp.abs(out - ref)))

    print("KERNEL_OK")
</pallas_src>

<mosaic_0001>
module attributes {stable_mosaic.version = 11 : i64} {
  func.func @_conv3x3_1out_kernel(%arg0: i32, %arg1: memref<1x16x2x128xf32, #tpu.memory_space<vmem>>, %arg2: memref<144xf32, #tpu.memory_space<smem>>, %arg3: memref<1xf32, #tpu.memory_space<smem>>, %arg4: memref<1x2x128xf32, #tpu.memory_space<vmem>>) attributes {dimension_semantics = [#tpu.dimension_semantics<parallel>], iteration_bounds = array<i64: 2>, scalar_prefetch = 0 : i64, scratch_operands = 0 : i64, tpu.core_type = #tpu.core_type<tc>, window_params = [{transform_indices = @transform_0, window_bounds = array<i64: 1, 16, 2, 128>}, {transform_indices = @transform_1, window_bounds = array<i64: 144>}, {transform_indices = @transform_2, window_bounds = array<i64: 1>}, {transform_indices = @transform_3, window_bounds = array<i64: 1, 2, 128>}]} {
    %0 = tpu.iota {dimensions = array<i32: 1>} : vector<2x128xi32>
    %1 = tpu.iota {dimensions = array<i32: 0>} : vector<2x128xi32>
    %c128_i32 = arith.constant 128 : i32
    %2 = vector.broadcast %c128_i32 : i32 to vector<2x128xi32>
    %3 = arith.muli %1, %2 : vector<2x128xi32>
    %4 = arith.addi %3, %0 : vector<2x128xi32>
    %c4_i32 = arith.constant 4 : i32
    %5 = vector.broadcast %c4_i32 : i32 to vector<2x128xi32>
    %6 = arith.shrsi %4, %5 : vector<2x128xi32>
    %c15_i32 = arith.constant 15 : i32
    %7 = vector.broadcast %c15_i32 : i32 to vector<2x128xi32>
    %8 = arith.andi %0, %7 : vector<2x128xi32>
    %c1_i32 = arith.constant 1 : i32
    %9 = vector.broadcast %c1_i32 : i32 to vector<2x128xi32>
    %10 = arith.cmpi sge, %6, %9 : vector<2x128xi32>
    %c14_i32 = arith.constant 14 : i32
    %11 = vector.broadcast %c14_i32 : i32 to vector<2x128xi32>
    %12 = arith.cmpi sle, %6, %11 : vector<2x128xi32>
    %c1_i32_0 = arith.constant 1 : i32
    %13 = vector.broadcast %c1_i32_0 : i32 to vector<2x128xi32>
    %14 = arith.cmpi sge, %8, %13 : vector<2x128xi32>
    %c14_i32_1 = arith.constant 14 : i32
    %15 = vector.broadcast %c14_i32_1 : i32 to vector<2x128xi32>
    %16 = arith.cmpi sle, %8, %15 : vector<2x128xi32>
    %c112_i32 = arith.constant 112 : i32
    %17 = vector.broadcast %c112_i32 : i32 to vector<2x128xi32>
    %18 = arith.cmpi slt, %0, %17 : vector<2x128xi32>
    %c16_i32 = arith.constant 16 : i32
    %19 = vector.broadcast %c16_i32 : i32 to vector<2x128xi32>
    %20 = arith.cmpi sge, %0, %19 : vector<2x128xi32>
    %c0 = arith.constant 0 : index
    %21 = memref.load %arg3[%c0] : memref<1xf32, #tpu.memory_space<smem>>
    %22 = vector.broadcast %21 : f32 to vector<2x128xf32>
    %c0_2 = arith.constant 0 : index
    %c0_3 = arith.constant 0 : index
    %c0_4 = arith.constant 0 : index
    %c0_5 = arith.constant 0 : index
    %23 = vector.load %arg1[%c0_2, %c0_3, %c0_4, %c0_5] : memref<1x16x2x128xf32, #tpu.memory_space<vmem>>, vector<1x1x2x128xf32>
    %24 = vector.shape_cast %23 : vector<1x1x2x128xf32> to vector<1x2x128xf32>
    %25 = vector.shape_cast %24 : vector<1x2x128xf32> to vector<2x128xf32>
    %c16_i32_6 = arith.constant 16 : i32
    %26 = tpu.dynamic_rotate %25 by %c16_i32_6 dim 1 : vector<2x128xf32>, i32 -> vector<2x128xf32>
    %c1_i32_7 = arith.constant 1 : i32
    %27 = tpu.dynamic_rotate %26 by %c1_i32_7 dim 0 : vector<2x128xf32>, i32 -> vector<2x128xf32>
    %28 = arith.select %20, %26, %27 : vector<2x128xi1>, vector<2x128xf32>
    %cst = arith.constant 0.000000e+00 : f32
    %29 = vector.broadcast %cst : f32 to vector<2x128xf32>
    %30 = arith.select %10, %28, %29 : vector<2x128xi1>, vector<2x128xf32>
    %c1_i32_8 = arith.constant 1 : i32
    %31 = tpu.dynamic_rotate %30 by %c1_i32_8 dim 1 : vector<2x128xf32>, i32 -> vector<2x128xf32>
    %cst_9 = arith.constant 0.000000e+00 : f32
    %32 = vector.broadcast %cst_9 : f32 to vector<2x128xf32>
    %33 = arith.select %14, %31, %32 : vector<2x128xi1>, vector<2x128xf32>
    %c0_10 = arith.constant 0 : index
    %34 = memref.load %arg2[%c0_10] : memref<144xf32, #tpu.memory_space<smem>>
    %35 = vector.broadcast %34 : f32 to vector<2x128xf32>
    %36 = arith.mulf %33, %35 : vector<2x128xf32>
    %37 = arith.addf %22, %36 : vector<2x128xf32>
    %c1 = arith.constant 1 : index
    %38 = memref.load %arg2[%c1] : memref<144xf32, #tpu.memory_space<smem>>
    %39 = vector.broadcast %38 : f32 to vector<2x128xf32>
    %40 = arith.mulf %30, %39 : vector<2x128xf32>
    %41 = arith.addf %37, %40 : vector<2x128xf32>
    %c127_i32 = arith.constant 127 : i32
    %42 = tpu.dynamic_rotate %30 by %c127_i32 dim 1 : vector<2x128xf32>, i32 -> vector<2x128xf32>
    %cst_11 = arith.constant 0.000000e+00 : f32
    %43 = vector.broadcast %cst_11 : f32 to vector<2x128xf32>
    %44 = arith.select %16, %42, %43 : vector<2x128xi1>, vector<2x128xf32>
    %c2 = arith.constant 2 : index
    %45 = memref.load %arg2[%c2] : memref<144xf32, #tpu.memory_space<smem>>
    %46 = vector.broadcast %45 : f32 to vector<2x128xf32>
    %47 = arith.mulf %44, %46 : vector<2x128xf32>
    %48 = arith.addf %41, %47 : vector<2x128xf32>
    %c1_i32_12 = arith.constant 1 : i32
    %49 = tpu.dynamic_rotate %25 by %c1_i32_12 dim 1 : vector<2x128xf32>, i32 -> vector<2x128xf32>
    %cst_13 = arith.constant 0.000000e+00 : f32
    %50 = vector.broadcast %cst_13 : f32 to vector<2x128xf32>
    %51 = arith.select %14, %49, %50 : vector<2x128xi1>, vector<2x128xf32>
    %c3 = arith.constant 3 : index
    %52 = memref.load %arg2[%c3] : memref<144xf32, #tpu.memory_space<smem>>
    %53 = vector.broadcast %52 : f32 to vector<2x128xf32>
    %54 = arith.mulf %51, %53 : vector<2x128xf32>
    %55 = arith.addf %48, %54 : vector<2x128xf32>
    %c4 = arith.constant 4 : index
    %56 = memref.load %arg2[%c4] : memref<144xf32, #tpu.memory_space<smem>>
    %57 = vector.broadcast %56 : f32 to vector<2x128xf32>
    %58 = arith.mulf %25, %57 : vector<2x128xf32>
    %59 = arith.addf %55, %58 : vector<2x128xf32>
    %c127_i32_14 = arith.constant 127 : i32
    %60 = tpu.dynamic_rotate %25 by %c127_i32_14 dim 1 : vector<2x128xf32>, i32 -> vector<2x128xf32>
    %cst_15 = arith.constant 0.000000e+00 : f32
    %61 = vector.broadcast %cst_15 : f32 to vector<2x128xf32>
    %62 = arith.select %16, %60, %61 : vector<2x128xi1>, vector<2x128xf32>
    %c5 = arith.constant 5 : index
    %63 = memref.load %arg2[%c5] : memref<144xf32, #tpu.memory_space<smem>>
    %64 = vector.broadcast %63 : f32 to vector<2x128xf32>
    %65 = arith.mulf %62, %64 : vector<2x128xf32>
    %66 = arith.addf %59, %65 : vector<2x128xf32>
    %c112_i32_16 = arith.constant 112 : i32
    %67 = tpu.dynamic_rotate %25 by %c112_i32_16 dim 1 : vector<2x128xf32>, i32 -> vector<2x128xf32>
    %c1_i32_17 = arith.constant 1 : i32
    %68 = tpu.dynamic_rotate %67 by %c1_i32_17 dim 0 : vector<2x128xf32>, i32 -> vector<2x128xf32>
    %69 = arith.select %18, %67, %68 : vector<2x128xi1>, vector<2x128xf32>
    %cst_18 = arith.constant 0.000000e+00 : f32
    %70 = vector.broadcast %cst_18 : f32 to vector<2x128xf32>
    %71 = arith.select %12, %69, %70 : vector<2x128xi1>, vector<2x128xf32>
    %c1_i32_19 = arith.constant 1 : i32
    %72 = tpu.dynamic_rotate %71 by %c1_i32_19 dim 1 : vector<2x128xf32>, i32 -> vector<2x128xf32>
    %cst_20 = arith.constant 0.000000e+00 : f32
    %73 = vector.broadcast %cst_20 : f32 to vector<2x128xf32>
    %74 = arith.select %14, %72, %73 : vector<2x128xi1>, vector<2x128xf32>
    %c6 = arith.constant 6 : index
    %75 = memref.load %arg2[%c6] : memref<144xf32, #tpu.memory_space<smem>>
    %76 = vector.broadcast %75 : f32 to vector<2x128xf32>
    %77 = arith.mulf %74, %76 : vector<2x128xf32>
    %78 = arith.addf %66, %77 : vector<2x128xf32>
    %c7 = arith.constant 7 : index
    %79 = memref.load %arg2[%c7] : memref<144xf32, #tpu.memory_space<smem>>
    %80 = vector.broadcast %79 : f32 to vector<2x128xf32>
    %81 = arith.mulf %71, %80 : vector<2x128xf32>
    %82 = arith.addf %78, %81 : vector<2x128xf32>
    %c127_i32_21 = arith.constant 127 : i32
    %83 = tpu.dynamic_rotate %71 by %c127_i32_21 dim 1 : vector<2x128xf32>, i32 -> vector<2x128xf32>
    %cst_22 = arith.constant 0.000000e+00 : f32
    %84 = vector.broadcast %cst_22 : f32 to vector<2x128xf32>
    %85 = arith.select %16, %83, %84 : vector<2x128xi1>, vector<2x128xf32>
    %c8 = arith.constant 8 : index
    %86 = memref.load %arg2[%c8] : memref<144xf32, #tpu.memory_space<smem>>
    %87 = vector.broadcast %86 : f32 to vector<2x128xf32>
    %88 = arith.mulf %85, %87 : vector<2x128xf32>
    %89 = arith.addf %82, %88 : vector<2x128xf32>
    %c0_23 = arith.constant 0 : index
    %c1_24 = arith.constant 1 : index
    %c0_25 = arith.constant 0 : index
    %c0_26 = arith.constant 0 : index
    %90 = vector.load %arg1[%c0_23, %c1_24, %c0_25, %c0_26] : memref<1x16x2x128xf32, #tpu.memory_space<vmem>>, vector<1x1x2x128xf32>
    %91 = vector.shape_cast %90 : vector<1x1x2x128xf32> to vector<1x2x128xf32>
    %92 = vector.shape_cast %91 : vector<1x2x128xf32> to vector<2x128xf32>
    %c16_i32_27 = arith.constant 16 : i32
    %93 = tpu.dynamic_rotate %92 by %c16_i32_27 dim 1 : vector<2x128xf32>, i32 -> vector<2x128xf32>
    %c1_i32_28 = arith.constant 1 : i32
    %94 = tpu.dynamic_rotate %93 by %c1_i32_28 dim 0 : vector<2x128xf32>, i32 -> vector<2x128xf32>
    %95 = arith.select %20, %93, %94 : vector<2x128xi1>, vector<2x128xf32>
    %cst_29 = arith.constant 0.000000e+00 : f32
    %96 = vector.broadcast %cst_29 : f32 to vector<2x128xf32>
    %97 = arith.select %10, %95, %96 : vector<2x128xi1>, vector<2x128xf32>
    %c1_i32_30 = arith.constant 1 : i32
    %98 = tpu.dynamic_rotate %97 by %c1_i32_30 dim 1 : vector<2x128xf32>, i32 -> vector<2x128xf32>
    %cst_31 = arith.constant 0.000000e+00 : f32
    %99 = vector.broadcast %cst_31 : f32 to vector<2x128xf32>
    %100 = arith.select %14, %98, %99 : vector<2x128xi1>, vector<2x128xf32>
    %c9 = arith.constant 9 : index
    %101 = memref.load %arg2[%c9] : memref<144xf32, #tpu.memory_space<smem>>
    %102 = vector.broadcast %101 : f32 to vector<2x128xf32>
    %103 = arith.mulf %100, %102 : vector<2x128xf32>
    %104 = arith.addf %89, %103 : vector<2x128xf32>
    %c10 = arith.constant 10 : index
    %105 = memref.load %arg2[%c10] : memref<144xf32, #tpu.memory_space<smem>>
    %106 = vector.broadcast %105 : f32 to vector<2x128xf32>
    %107 = arith.mulf %97, %106 : vector<2x128xf32>
    %108 = arith.addf %104, %107 : vector<2x128xf32>
    %c127_i32_32 = arith.constant 127 : i32
    %109 = tpu.dynamic_rotate %97 by %c127_i32_32 dim 1 : vector<2x128xf32>, i32 -> vector<2x128xf32>
    %cst_33 = arith.constant 0.000000e+00 : f32
    %110 = vector.broadcast %cst_33 : f32 to vector<2x128xf32>
    %111 = arith.select %16, %109, %110 : vector<2x128xi1>, vector<2x128xf32>
    %c11 = arith.constant 11 : index
    %112 = memref.load %arg2[%c11] : memref<144xf32, #tpu.memory_space<smem>>
    %113 = vector.broadcast %112 : f32 to vector<2x128xf32>
    %114 = arith.mulf %111, %113 : vector<2x128xf32>
    %115 = arith.addf %108, %114 : vector<2x128xf32>
    %c1_i32_34 = arith.constant 1 : i32
    %116 = tpu.dynamic_rotate %92 by %c1_i32_34 dim 1 : vector<2x128xf32>, i32 -> vector<2x128xf32>
    %cst_35 = arith.constant 0.000000e+00 : f32
    %117 = vector.broadcast %cst_35 : f32 to vector<2x128xf32>
    %118 = arith.select %14, %116, %117 : vector<2x128xi1>, vector<2x128xf32>
    %c12 = arith.constant 12 : index
    %119 = memref.load %arg2[%c12] : memref<144xf32, #tpu.memory_space<smem>>
    %120 = vector.broadcast %119 : f32 to vector<2x128xf32>
    %121 = arith.mulf %118, %120 : vector<2x128xf32>
    %122 = arith.addf %115, %121 : vector<2x128xf32>
    %c13 = arith.constant 13 : index
    %123 = memref.load %arg2[%c13] : memref<144xf32, #tpu.memory_space<smem>>
    %124 = vector.broadcast %123 : f32 to vector<2x128xf32>
    %125 = arith.mulf %92, %124 : vector<2x128xf32>
    %126 = arith.addf %122, %125 : vector<2x128xf32>
    %c127_i32_36 = arith.constant 127 : i32
    %127 = tpu.dynamic_rotate %92 by %c127_i32_36 dim 1 : vector<2x128xf32>, i32 -> vector<2x128xf32>
    %cst_37 = arith.constant 0.000000e+00 : f32
    %128 = vector.broadcast %cst_37 : f32 to vector<2x128xf32>
    %129 = arith.select %16, %127, %128 : vector<2x128xi1>, vector<2x128xf32>
    %c14 = arith.constant 14 : index
    %130 = memref.load %arg2[%c14] : memref<144xf32, #tpu.memory_space<smem>>
    %131 = vector.broadcast %130 : f32 to vector<2x128xf32>
    %132 = arith.mulf %129, %131 : vector<2x128xf32>
    %133 = arith.addf %126, %132 : vector<2x128xf32>
    %c112_i32_38 = arith.constant 112 : i32
    %134 = tpu.dynamic_rotate %92 by %c112_i32_38 dim 1 : vector<2x128xf32>, i32 -> vector<2x128xf32>
    %c1_i32_39 = arith.constant 1 : i32
    %135 = tpu.dynamic_rotate %134 by %c1_i32_39 dim 0 : vector<2x128xf32>, i32 -> vector<2x128xf32>
    %136 = arith.select %18, %134, %135 : vector<2x128xi1>, vector<2x128xf32>
    %cst_40 = arith.constant 0.000000e+00 : f32
    %137 = vector.broadcast %cst_40 : f32 to vector<2x128xf32>
    %138 = arith.select %12, %136, %137 : vector<2x128xi1>, vector<2x128xf32>
    %c1_i32_41 = arith.constant 1 : i32
    %139 = tpu.dynamic_rotate %138 by %c1_i32_41 dim 1 : vector<2x128xf32>, i32 -> vector<2x128xf32>
    %cst_42 = arith.constant 0.000000e+00 : f32
    %140 = vector.broadcast %cst_42 : f32 to vector<2x128xf32>
    %141 = arith.select %14, %139, %140 : vector<2x128xi1>, vector<2x128xf32>
    %c15 = arith.constant 15 : index
    %142 = memref.load %arg2[%c15] : memref<144xf32, #tpu.memory_space<smem>>
    %143 = vector.broadcast %142 : f32 to vector<2x128xf32>
    %144 = arith.mulf %141, %143 : vector<2x128xf32>
    %145 = arith.addf %133, %144 : vector<2x128xf32>
    %c16 = arith.constant 16 : index
    %146 = memref.load %arg2[%c16] : memref<144xf32, #tpu.memory_space<smem>>
    %147 = vector.broadcast %146 : f32 to vector<2x128xf32>
    %148 = arith.mulf %138, %147 : vector<2x128xf32>
    %149 = arith.addf %145, %148 : vector<2x128xf32>
    %c127_i32_43 = arith.constant 127 : i32
    %150 = tpu.dynamic_rotate %138 by %c127_i32_43 dim 1 : vector<2x128xf32>, i32 -> vector<2x128xf32>
    %cst_44 = arith.constant 0.000000e+00 : f32
    %151 = vector.broadcast %cst_44 : f32 to vector<2x128xf32>
    %152 = arith.select %16, %150, %151 : vector<2x128xi1>, vector<2x128xf32>
    %c17 = arith.constant 17 : index
    %153 = memref.load %arg2[%c17] : memref<144xf32, #tpu.memory_space<smem>>
    %154 = vector.broadcast %153 : f32 to vector<2x128xf32>
    %155 = arith.mulf %152, %154 : vector<2x128xf32>
    %156 = arith.addf %149, %155 : vector<2x128xf32>
    %c0_45 = arith.constant 0 : index
    %c2_46 = arith.constant 2 : index
    %c0_47 = arith.constant 0 : index
    %c0_48 = arith.constant 0 : index
    %157 = vector.load %arg1[%c0_45, %c2_46, %c0_47, %c0_48] : memref<1x16x2x128xf32, #tpu.memory_space<vmem>>, vector<1x1x2x128xf32>
    %158 = vector.shape_cast %157 : vector<1x1x2x128xf32> to vector<1x2x128xf32>
    %159 = vector.shape_cast %158 : vector<1x2x128xf32> to vector<2x128xf32>
    %c16_i32_49 = arith.constant 16 : i32
    %160 = tpu.dynamic_rotate %159 by %c16_i32_49 dim 1 : vector<2x128xf32>, i32 -> vector<2x128xf32>
    %c1_i32_50 = arith.constant 1 : i32
    %161 = tpu.dynamic_rotate %160 by %c1_i32_50 dim 0 : vector<2x128xf32>, i32 -> vector<2x128xf32>
    %162 = arith.select %20, %160, %161 : vector<2x128xi1>, vector<2x128xf32>
    %cst_51 = arith.constant 0.000000e+00 : f32
    %163 = vector.broadcast %cst_51 : f32 to vector<2x128xf32>
    %164 = arith.select %10, %162, %163 : vector<2x128xi1>, vector<2x128xf32>
    %c1_i32_52 = arith.constant 1 : i32
    %165 = tpu.dynamic_rotate %164 by %c1_i32_52 dim 1 : vector<2x128xf32>, i32 -> vector<2x128xf32>
    %cst_53 = arith.constant 0.000000e+00 : f32
    %166 = vector.broadcast %cst_53 : f32 to vector<2x128xf32>
    %167 = arith.select %14, %165, %166 : vector<2x128xi1>, vector<2x128xf32>
    %c18 = arith.constant 18 : index
    %168 = memref.load %arg2[%c18] : memref<144xf32, #tpu.memory_space<smem>>
    %169 = vector.broadcast %168 : f32 to vector<2x128xf32>
    %170 = arith.mulf %167, %169 : vector<2x128xf32>
    %171 = arith.addf %156, %170 : vector<2x128xf32>
    %c19 = arith.constant 19 : index
    %172 = memref.load %arg2[%c19] : memref<144xf32, #tpu.memory_space<smem>>
    %173 = vector.broadcast %172 : f32 to vector<2x128xf32>
    %174 = arith.mulf %164, %173 : vector<2x128xf32>
    %175 = arith.addf %171, %174 : vector<2x128xf32>
    %c127_i32_54 = arith.constant 127 : i32
    %176 = tpu.dynamic_rotate %164 by %c127_i32_54 dim 1 : vector<2x128xf32>, i32 -> vector<2x128xf32>
    %cst_55 = arith.constant 0.000000e+00 : f32
    %177 = vector.broadcast %cst_55 : f32 to vector<2x128xf32>
    %178 = arith.select %16, %176, %177 : vector<2x128xi1>, vector<2x128xf32>
    %c20 = arith.constant 20 : index
    %179 = memref.load %arg2[%c20] : memref<144xf32, #tpu.memory_space<smem>>
    %180 = vector.broadcast %179 : f32 to vector<2x128xf32>
    %181 = arith.mulf %178, %180 : vector<2x128xf32>
    %182 = arith.addf %175, %181 : vector<2x128xf32>
    %c1_i32_56 = arith.constant 1 : i32
    %183 = tpu.dynamic_rotate %159 by %c1_i32_56 dim 1 : vector<2x128xf32>, i32 -> vector<2x128xf32>
    %cst_57 = arith.constant 0.000000e+00 : f32
    %184 = vector.broadcast %cst_57 : f32 to vector<2x128xf32>
    %185 = arith.select %14, %183, %184 : vector<2x128xi1>, vector<2x128xf32>
    %c21 = arith.constant 21 : index
    %186 = memref.load %arg2[%c21] : memref<144xf32, #tpu.memory_space<smem>>
    %187 = vector.broadcast %186 : f32 to vector<2x128xf32>
    %188 = arith.mulf %185, %187 : vector<2x128xf32>
    %189 = arith.addf %182, %188 : vector<2x128xf32>
    %c22 = arith.constant 22 : index
    %190 = memref.load %arg2[%c22] : memref<144xf32, #tpu.memory_space<smem>>
    %191 = vector.broadcast %190 : f32 to vector<2x128xf32>
    %192 = arith.mulf %159, %191 : vector<2x128xf32>
    %193 = arith.addf %189, %192 : vector<2x128xf32>
    %c127_i32_58 = arith.constant 127 : i32
    %194 = tpu.dynamic_rotate %159 by %c127_i32_58 dim 1 : vector<2x128xf32>, i32 -> vector<2x128xf32>
    %cst_59 = arith.constant 0.000000e+00 : f32
    %195 = vector.broadcast %cst_59 : f32 to vector<2x128xf32>
    %196 = arith.select %16, %194, %195 : vector<2x128xi1>, vector<2x128xf32>
    %c23 = arith.constant 23 : index
    %197 = memref.load %arg2[%c23] : memref<144xf32, #tpu.memory_space<smem>>
    %198 = vector.broadcast %197 : f32 to vector<2x128xf32>
    %199 = arith.mulf %196, %198 : vector<2x128xf32>
    %200 = arith.addf %193, %199 : vector<2x128xf32>
    %c112_i32_60 = arith.constant 112 : i32
    %201 = tpu.dynamic_rotate %159 by %c112_i32_60 dim 1 : vector<2x128xf32>, i32 -> vector<2x128xf32>
    %c1_i32_61 = arith.constant 1 : i32
    %202 = tpu.dynamic_rotate %201 by %c1_i32_61 dim 0 : vector<2x128xf32>, i32 -> vector<2x128xf32>
    %203 = arith.select %18, %201, %202 : vector<2x128xi1>, vector<2x128xf32>
    %cst_62 = arith.constant 0.000000e+00 : f32
    %204 = vector.broadcast %cst_62 : f32 to vector<2x128xf32>
    %205 = arith.select %12, %203, %204 : vector<2x128xi1>, vector<2x128xf32>
    %c1_i32_63 = arith.constant 1 : i32
    %206 = tpu.dynamic_rotate %205 by %c1_i32_63 dim 1 : vector<2x128xf32>, i32 -> vector<2x128xf32>
    %cst_64 = arith.constant 0.000000e+00 : f32
    %207 = vector.broadcast %cst_64 : f32 to vector<2x128xf32>
    %208 = arith.select %14, %206, %207 : vector<2x128xi1>, vector<2x128xf32>
    %c24 = arith.constant 24 : index
    %209 = memref.load %arg2[%c24] : memref<144xf32, #tpu.memory_space<smem>>
    %210 = vector.broadcast %209 : f32 to vector<2x128xf32>
    %211 = arith.mulf %208, %210 : vector<2x128xf32>
    %212 = arith.addf %200, %211 : vector<2x128xf32>
    %c25 = arith.constant 25 : index
    %213 = memref.load %arg2[%c25] : memref<144xf32, #tpu.memory_space<smem>>
    %214 = vector.broadcast %213 : f32 to vector<2x128xf32>
    %215 = arith.mulf %205, %214 : vector<2x128xf32>
    %216 = arith.addf %212, %215 : vector<2x128xf32>
    %c127_i32_65 = arith.constant 127 : i32
    %217 = tpu.dynamic_rotate %205 by %c127_i32_65 dim 1 : vector<2x128xf32>, i32 -> vector<2x128xf32>
    %cst_66 = arith.constant 0.000000e+00 : f32
    %218 = vector.broadcast %cst_66 : f32 to vector<2x128xf32>
    %219 = arith.select %16, %217, %218 : vector<2x128xi1>, vector<2x128xf32>
    %c26 = arith.constant 26 : index
    %220 = memref.load %arg2[%c26] : memref<144xf32, #tpu.memory_space<smem>>
    %221 = vector.broadcast %220 : f32 to vector<2x128xf32>
    %222 = arith.mulf %219, %221 : vector<2x128xf32>
    %223 = arith.addf %216, %222 : vector<2x128xf32>
    %c0_67 = arith.constant 0 : index
    %c3_68 = arith.constant 3 : index
    %c0_69 = arith.constant 0 : index
    %c0_70 = arith.constant 0 : index
    %224 = vector.load %arg1[%c0_67, %c3_68, %c0_69, %c0_70] : memref<1x16x2x128xf32, #tpu.memory_space<vmem>>, vector<1x1x2x128xf32>
    %225 = vector.shape_cast %224 : vector<1x1x2x128xf32> to vector<1x2x128xf32>
    %226 = vector.shape_cast %225 : vector<1x2x128xf32> to vector<2x128xf32>
    %c16_i32_71 = arith.constant 16 : i32
    %227 = tpu.dynamic_rotate %226 by %c16_i32_71 dim 1 : vector<2x128xf32>, i32 -> vector<2x128xf32>
    %c1_i32_72 = arith.constant 1 : i32
    %228 = tpu.dynamic_rotate %227 by %c1_i32_72 dim 0 : vector<2x128xf32>, i32 -> vector<2x128xf32>
    %229 = arith.select %20, %227, %228 : vector<2x128xi1>, vector<2x128xf32>
    %cst_73 = arith.constant 0.000000e+00 : f32
    %230 = vector.broadcast %cst_73 : f32 to vector<2x128xf32>
    %231 = arith.select %10, %229, %230 : vector<2x128xi1>, vector<2x128xf32>
    %c1_i32_74 = arith.constant 1 : i32
    %232 = tpu.dynamic_rotate %231 by %c1_i32_74 dim 1 : vector<2x128xf32>, i32 -> vector<2x128xf32>
    %cst_75 = arith.constant 0.000000e+00 : f32
    %233 = vector.broadcast %cst_75 : f32 to vector<2x128xf32>
    %234 = arith.select %14, %232, %233 : vector<2x128xi1>, vector<2x128xf32>
    %c27 = arith.constant 27 : index
    %235 = memref.load %arg2[%c27] : memref<144xf32, #tpu.memory_space<smem>>
    %236 = vector.broadcast %235 : f32 to vector<2x128xf32>
    %237 = arith.mulf %234, %236 : vector<2x128xf32>
    %238 = arith.addf %223, %237 : vector<2x128xf32>
    %c28 = arith.constant 28 : index
    %239 = memref.load %arg2[%c28] : memref<144xf32, #tpu.memory_space<smem>>
    %240 = vector.broadcast %239 : f32 to vector<2x128xf32>
    %241 = arith.mulf %231, %240 : vector<2x128xf32>
    %242 = arith.addf %238, %241 : vector<2x128xf32>
    %c127_i32_76 = arith.constant 127 : i32
    %243 = tpu.dynamic_rotate %231 by %c127_i32_76 dim 1 : vector<2x128xf32>, i32 -> vector<2x128xf32>
    %cst_77 = arith.constant 0.000000e+00 : f32
    %244 = vector.broadcast %cst_77 : f32 to vector<2x128xf32>
    %245 = arith.select %16, %243, %244 : vector<2x128xi1>, vector<2x128xf32>
    %c29 = arith.constant 29 : index
    %246 = memref.load %arg2[%c29] : memref<144xf32, #tpu.memory_space<smem>>
    %247 = vector.broadcast %246 : f32 to vector<2x128xf32>
    %248 = arith.mulf %245, %247 : vector<2x128xf32>
    %249 = arith.addf %242, %248 : vector<2x128xf32>
    %c1_i32_78 = arith.constant 1 : i32
    %250 = tpu.dynamic_rotate %226 by %c1_i32_78 dim 1 : vector<2x128xf32>, i32 -> vector<2x128xf32>
    %cst_79 = arith.constant 0.000000e+00 : f32
    %251 = vector.broadcast %cst_79 : f32 to vector<2x128xf32>
    %252 = arith.select %14, %250, %251 : vector<2x128xi1>, vector<2x128xf32>
    %c30 = arith.constant 30 : index
    %253 = memref.load %arg2[%c30] : memref<144xf32, #tpu.memory_space<smem>>
    %254 = vector.broadcast %253 : f32 to vector<2x128xf32>
    %255 = arith.mulf %252, %254 : vector<2x128xf32>
    %256 = arith.addf %249, %255 : vector<2x128xf32>
    %c31 = arith.constant 31 : index
    %257 = memref.load %arg2[%c31] : memref<144xf32, #tpu.memory_space<smem>>
    %258 = vector.broadcast %257 : f32 to vector<2x128xf32>
    %259 = arith.mulf %226, %258 : vector<2x128xf32>
    %260 = arith.addf %256, %259 : vector<2x128xf32>
    %c127_i32_80 = arith.constant 127 : i32
    %261 = tpu.dynamic_rotate %226 by %c127_i32_80 dim 1 : vector<2x128xf32>, i32 -> vector<2x128xf32>
    %cst_81 = arith.constant 0.000000e+00 : f32
    %262 = vector.broadcast %cst_81 : f32 to vector<2x128xf32>
    %263 = arith.select %16, %261, %262 : vector<2x128xi1>, vector<2x128xf32>
    %c32 = arith.constant 32 : index
    %264 = memref.load %arg2[%c32] : memref<144xf32, #tpu.memory_space<smem>>
    %265 = vector.broadcast %264 : f32 to vector<2x128xf32>
    %266 = arith.mulf %263, %265 : vector<2x128xf32>
    %267 = arith.addf %260, %266 : vector<2x128xf32>
    %c112_i32_82 = arith.constant 112 : i32
    %268 = tpu.dynamic_rotate %226 by %c112_i32_82 dim 1 : vector<2x128xf32>, i32 -> vector<2x128xf32>
    %c1_i32_83 = arith.constant 1 : i32
    %269 = tpu.dynamic_rotate %268 by %c1_i32_83 dim 0 : vector<2x128xf32>, i32 -> vector<2x128xf32>
    %270 = arith.select %18, %268, %269 : vector<2x128xi1>, vector<2x128xf32>
    %cst_84 = arith.constant 0.000000e+00 : f32
    %271 = vector.broadcast %cst_84 : f32 to vector<2x128xf32>
    %272 = arith.select %12, %270, %271 : vector<2x128xi1>, vector<2x128xf32>
    %c1_i32_85 = arith.constant 1 : i32
    %273 = tpu.dynamic_rotate %272 by %c1_i32_85 dim 1 : vector<2x128xf32>, i32 -> vector<2x128xf32>
    %cst_86 = arith.constant 0.000000e+00 : f32
    %274 = vector.broadcast %cst_86 : f32 to vector<2x128xf32>
    %275 = arith.select %14, %273, %274 : vector<2x128xi1>, vector<2x128xf32>
    %c33 = arith.constant 33 : index
    %276 = memref.load %arg2[%c33] : memref<144xf32, #tpu.memory_space<smem>>
    %277 = vector.broadcast %276 : f32 to vector<2x128xf32>
    %278 = arith.mulf %275, %277 : vector<2x128xf32>
    %279 = arith.addf %267, %278 : vector<2x128xf32>
    %c34 = arith.constant 34 : index
    %280 = memref.load %arg2[%c34] : memref<144xf32, #tpu.memory_space<smem>>
    %281 = vector.broadcast %280 : f32 to vector<2x128xf32>
    %282 = arith.mulf %272, %281 : vector<2x128xf32>
    %283 = arith.addf %279, %282 : vector<2x128xf32>
    %c127_i32_87 = arith.constant 127 : i32
    %284 = tpu.dynamic_rotate %272 by %c127_i32_87 dim 1 : vector<2x128xf32>, i32 -> vector<2x128xf32>
    %cst_88 = arith.constant 0.000000e+00 : f32
    %285 = vector.broadcast %cst_88 : f32 to vector<2x128xf32>
    %286 = arith.select %16, %284, %285 : vector<2x128xi1>, vector<2x128xf32>
    %c35 = arith.constant 35 : index
    %287 = memref.load %arg2[%c35] : memref<144xf32, #tpu.memory_space<smem>>
    %288 = vector.broadcast %287 : f32 to vector<2x128xf32>
    %289 = arith.mulf %286, %288 : vector<2x128xf32>
    %290 = arith.addf %283, %289 : vector<2x128xf32>
    %c0_89 = arith.constant 0 : index
    %c4_90 = arith.constant 4 : index
    %c0_91 = arith.constant 0 : index
    %c0_92 = arith.constant 0 : index
    %291 = vector.load %arg1[%c0_89, %c4_90, %c0_91, %c0_92] : memref<1x16x2x128xf32, #tpu.memory_space<vmem>>, vector<1x1x2x128xf32>
    %292 = vector.shape_cast %291 : vector<1x1x2x128xf32> to vector<1x2x128xf32>
    %293 = vector.shape_cast %292 : vector<1x2x128xf32> to vector<2x128xf32>
    %c16_i32_93 = arith.constant 16 : i32
    %294 = tpu.dynamic_rotate %293 by %c16_i32_93 dim 1 : vector<2x128xf32>, i32 -> vector<2x128xf32>
    %c1_i32_94 = arith.constant 1 : i32
    %295 = tpu.dynamic_rotate %294 by %c1_i32_94 dim 0 : vector<2x128xf32>, i32 -> vector<2x128xf32>
    %296 = arith.select %20, %294, %295 : vector<2x128xi1>, vector<2x128xf32>
    %cst_95 = arith.constant 0.000000e+00 : f32
    %297 = vector.broadcast %cst_95 : f32 to vector<2x128xf32>
    %298 = arith.select %10, %296, %297 : vector<2x128xi1>, vector<2x128xf32>
    %c1_i32_96 = arith.constant 1 : i32
    %299 = tpu.dynamic_rotate %298 by %c1_i32_96 dim 1 : vector<2x128xf32>, i32 -> vector<2x128xf32>
    %cst_97 = arith.constant 0.000000e+00 : f32
    %300 = vector.broadcast %cst_97 : f32 to vector<2x128xf32>
    %301 = arith.select %14, %299, %300 : vector<2x128xi1>, vector<2x128xf32>
    %c36 = arith.constant 36 : index
    %302 = memref.load %arg2[%c36] : memref<144xf32, #tpu.memory_space<smem>>
    %303 = vector.broadcast %302 : f32 to vector<2x128xf32>
    %304 = arith.mulf %301, %303 : vector<2x128xf32>
    %305 = arith.addf %290, %304 : vector<2x128xf32>
    %c37 = arith.constant 37 : index
    %306 = memref.load %arg2[%c37] : memref<144xf32, #tpu.memory_space<smem>>
    %307 = vector.broadcast %306 : f32 to vector<2x128xf32>
    %308 = arith.mulf %298, %307 : vector<2x128xf32>
    %309 = arith.addf %305, %308 : vector<2x128xf32>
    %c127_i32_98 = arith.constant 127 : i32
    %310 = tpu.dynamic_rotate %298 by %c127_i32_98 dim 1 : vector<2x128xf32>, i32 -> vector<2x128xf32>
    %cst_99 = arith.constant 0.000000e+00 : f32
    %311 = vector.broadcast %cst_99 : f32 to vector<2x128xf32>
    %312 = arith.select %16, %310, %311 : vector<2x128xi1>, vector<2x128xf32>
    %c38 = arith.constant 38 : index
    %313 = memref.load %arg2[%c38] : memref<144xf32, #tpu.memory_space<smem>>
    %314 = vector.broadcast %313 : f32 to vector<2x128xf32>
    %315 = arith.mulf %312, %314 : vector<2x128xf32>
    %316 = arith.addf %309, %315 : vector<2x128xf32>
    %c1_i32_100 = arith.constant 1 : i32
    %317 = tpu.dynamic_rotate %293 by %c1_i32_100 dim 1 : vector<2x128xf32>, i32 -> vector<2x128xf32>
    %cst_101 = arith.constant 0.000000e+00 : f32
    %318 = vector.broadcast %cst_101 : f32 to vector<2x128xf32>
    %319 = arith.select %14, %317, %318 : vector<2x128xi1>, vector<2x128xf32>
    %c39 = arith.constant 39 : index
    %320 = memref.load %arg2[%c39] : memref<144xf32, #tpu.memory_space<smem>>
    %321 = vector.broadcast %320 : f32 to vector<2x128xf32>
    %322 = arith.mulf %319, %321 : vector<2x128xf32>
    %323 = arith.addf %316, %322 : vector<2x128xf32>
    %c40 = arith.constant 40 : index
    %324 = memref.load %arg2[%c40] : memref<144xf32, #tpu.memory_space<smem>>
    %325 = vector.broadcast %324 : f32 to vector<2x128xf32>
    %326 = arith.mulf %293, %325 : vector<2x128xf32>
    %327 = arith.addf %323, %326 : vector<2x128xf32>
    %c127_i32_102 = arith.constant 127 : i32
    %328 = tpu.dynamic_rotate %293 by %c127_i32_102 dim 1 : vector<2x128xf32>, i32 -> vector<2x128xf32>
    %cst_103 = arith.constant 0.000000e+00 : f32
    %329 = vector.broadcast %cst_103 : f32 to vector<2x128xf32>
    %330 = arith.select %16, %328, %329 : vector<2x128xi1>, vector<2x128xf32>
    %c41 = arith.constant 41 : index
    %331 = memref.load %arg2[%c41] : memref<144xf32, #tpu.memory_space<smem>>
    %332 = vector.broadcast %331 : f32 to vector<2x128xf32>
    %333 = arith.mulf %330, %332 : vector<2x128xf32>
    %334 = arith.addf %327, %333 : vector<2x128xf32>
    %c112_i32_104 = arith.constant 112 : i32
    %335 = tpu.dynamic_rotate %293 by %c112_i32_104 dim 1 : vector<2x128xf32>, i32 -> vector<2x128xf32>
    %c1_i32_105 = arith.constant 1 : i32
    %336 = tpu.dynamic_rotate %335 by %c1_i32_105 dim 0 : vector<2x128xf32>, i32 -> vector<2x128xf32>
    %337 = arith.select %18, %335, %336 : vector<2x128xi1>, vector<2x128xf32>
    %cst_106 = arith.constant 0.000000e+00 : f32
    %338 = vector.broadcast %cst_106 : f32 to vector<2x128xf32>
    %339 = arith.select %12, %337, %338 : vector<2x128xi1>, vector<2x128xf32>
    %c1_i32_107 = arith.constant 1 : i32
    %340 = tpu.dynamic_rotate %339 by %c1_i32_107 dim 1 : vector<2x128xf32>, i32 -> vector<2x128xf32>
    %cst_108 = arith.constant 0.000000e+00 : f32
    %341 = vector.broadcast %cst_108 : f32 to vector<2x128xf32>
    %342 = arith.select %14, %340, %341 : vector<2x128xi1>, vector<2x128xf32>
    %c42 = arith.constant 42 : index
    %343 = memref.load %arg2[%c42] : memref<144xf32, #tpu.memory_space<smem>>
    %344 = vector.broadcast %343 : f32 to vector<2x128xf32>
    %345 = arith.mulf %342, %344 : vector<2x128xf32>
    %346 = arith.addf %334, %345 : vector<2x128xf32>
    %c43 = arith.constant 43 : index
    %347 = memref.load %arg2[%c43] : memref<144xf32, #tpu.memory_space<smem>>
    %348 = vector.broadcast %347 : f32 to vector<2x128xf32>
    %349 = arith.mulf %339, %348 : vector<2x128xf32>
    %350 = arith.addf %346, %349 : vector<2x128xf32>
    %c127_i32_109 = arith.constant 127 : i32
    %351 = tpu.dynamic_rotate %339 by %c127_i32_109 dim 1 : vector<2x128xf32>, i32 -> vector<2x128xf32>
    %cst_110 = arith.constant 0.000000e+00 : f32
    %352 = vector.broadcast %cst_110 : f32 to vector<2x128xf32>
    %353 = arith.select %16, %351, %352 : vector<2x128xi1>, vector<2x128xf32>
    %c44 = arith.constant 44 : index
    %354 = memref.load %arg2[%c44] : memref<144xf32, #tpu.memory_space<smem>>
    %355 = vector.broadcast %354 : f32 to vector<2x128xf32>
    %356 = arith.mulf %353, %355 : vector<2x128xf32>
    %357 = arith.addf %350, %356 : vector<2x128xf32>
    %c0_111 = arith.constant 0 : index
    %c5_112 = arith.constant 5 : index
    %c0_113 = arith.constant 0 : index
    %c0_114 = arith.constant 0 : index
    %358 = vector.load %arg1[%c0_111, %c5_112, %c0_113, %c0_114] : memref<1x16x2x128xf32, #tpu.memory_space<vmem>>, vector<1x1x2x128xf32>
    %359 = vector.shape_cast %358 : vector<1x1x2x128xf32> to vector<1x2x128xf32>
    %360 = vector.shape_cast %359 : vector<1x2x128xf32> to vector<2x128xf32>
    %c16_i32_115 = arith.constant 16 : i32
    %361 = tpu.dynamic_rotate %360 by %c16_i32_115 dim 1 : vector<2x128xf32>, i32 -> vector<2x128xf32>
    %c1_i32_116 = arith.constant 1 : i32
    %362 = tpu.dynamic_rotate %361 by %c1_i32_116 dim 0 : vector<2x128xf32>, i32 -> vector<2x128xf32>
    %363 = arith.select %20, %361, %362 : vector<2x128xi1>, vector<2x128xf32>
    %cst_117 = arith.constant 0.000000e+00 : f32
    %364 = vector.broadcast %cst_117 : f32 to vector<2x128xf32>
    %365 = arith.select %10, %363, %364 : vector<2x128xi1>, vector<2x128xf32>
    %c1_i32_118 = arith.constant 1 : i32
    %366 = tpu.dynamic_rotate %365 by %c1_i32_118 dim 1 : vector<2x128xf32>, i32 -> vector<2x128xf32>
    %cst_119 = arith.constant 0.000000e+00 : f32
    %367 = vector.broadcast %cst_119 : f32 to vector<2x128xf32>
    %368 = arith.select %14, %366, %367 : vector<2x128xi1>, vector<2x128xf32>
    %c45 = arith.constant 45 : index
    %369 = memref.load %arg2[%c45] : memref<144xf32, #tpu.memory_space<smem>>
    %370 = vector.broadcast %369 : f32 to vector<2x128xf32>
    %371 = arith.mulf %368, %370 : vector<2x128xf32>
    %372 = arith.addf %357, %371 : vector<2x128xf32>
    %c46 = arith.constant 46 : index
    %373 = memref.load %arg2[%c46] : memref<144xf32, #tpu.memory_space<smem>>
    %374 = vector.broadcast %373 : f32 to vector<2x128xf32>
    %375 = arith.mulf %365, %374 : vector<2x128xf32>
    %376 = arith.addf %372, %375 : vector<2x128xf32>
    %c127_i32_120 = arith.constant 127 : i32
    %377 = tpu.dynamic_rotate %365 by %c127_i32_120 dim 1 : vector<2x128xf32>, i32 -> vector<2x128xf32>
    %cst_121 = arith.constant 0.000000e+00 : f32
    %378 = vector.broadcast %cst_121 : f32 to vector<2x128xf32>
    %379 = arith.select %16, %377, %378 : vector<2x128xi1>, vector<2x128xf32>
    %c47 = arith.constant 47 : index
    %380 = memref.load %arg2[%c47] : memref<144xf32, #tpu.memory_space<smem>>
    %381 = vector.broadcast %380 : f32 to vector<2x128xf32>
    %382 = arith.mulf %379, %381 : vector<2x128xf32>
    %383 = arith.addf %376, %382 : vector<2x128xf32>
    %c1_i32_122 = arith.constant 1 : i32
    %384 = tpu.dynamic_rotate %360 by %c1_i32_122 dim 1 : vector<2x128xf32>, i32 -> vector<2x128xf32>
    %cst_123 = arith.constant 0.000000e+00 : f32
    %385 = vector.broadcast %cst_123 : f32 to vector<2x128xf32>
    %386 = arith.select %14, %384, %385 : vector<2x128xi1>, vector<2x128xf32>
    %c48 = arith.constant 48 : index
    %387 = memref.load %arg2[%c48] : memref<144xf32, #tpu.memory_space<smem>>
    %388 = vector.broadcast %387 : f32 to vector<2x128xf32>
    %389 = arith.mulf %386, %388 : vector<2x128xf32>
    %390 = arith.addf %383, %389 : vector<2x128xf32>
    %c49 = arith.constant 49 : index
    %391 = memref.load %arg2[%c49] : memref<144xf32, #tpu.memory_space<smem>>
    %392 = vector.broadcast %391 : f32 to vector<2x128xf32>
    %393 = arith.mulf %360, %392 : vector<2x128xf32>
    %394 = arith.addf %390, %393 : vector<2x128xf32>
    %c127_i32_124 = arith.constant 127 : i32
    %395 = tpu.dynamic_rotate %360 by %c127_i32_124 dim 1 : vector<2x128xf32>, i32 -> vector<2x128xf32>
    %cst_125 = arith.constant 0.000000e+00 : f32
    %396 = vector.broadcast %cst_125 : f32 to vector<2x128xf32>
    %397 = arith.select %16, %395, %396 : vector<2x128xi1>, vector<2x128xf32>
    %c50 = arith.constant 50 : index
    %398 = memref.load %arg2[%c50] : memref<144xf32, #tpu.memory_space<smem>>
    %399 = vector.broadcast %398 : f32 to vector<2x128xf32>
    %400 = arith.mulf %397, %399 : vector<2x128xf32>
    %401 = arith.addf %394, %400 : vector<2x128xf32>
    %c112_i32_126 = arith.constant 112 : i32
    %402 = tpu.dynamic_rotate %360 by %c112_i32_126 dim 1 : vector<2x128xf32>, i32 -> vector<2x128xf32>
    %c1_i32_127 = arith.constant 1 : i32
    %403 = tpu.dynamic_rotate %402 by %c1_i32_127 dim 0 : vector<2x128xf32>, i32 -> vector<2x128xf32>
    %404 = arith.select %18, %402, %403 : vector<2x128xi1>, vector<2x128xf32>
    %cst_128 = arith.constant 0.000000e+00 : f32
    %405 = vector.broadcast %cst_128 : f32 to vector<2x128xf32>
    %406 = arith.select %12, %404, %405 : vector<2x128xi1>, vector<2x128xf32>
    %c1_i32_129 = arith.constant 1 : i32
    %407 = tpu.dynamic_rotate %406 by %c1_i32_129 dim 1 : vector<2x128xf32>, i32 -> vector<2x128xf32>
    %cst_130 = arith.constant 0.000000e+00 : f32
    %408 = vector.broadcast %cst_130 : f32 to vector<2x128xf32>
    %409 = arith.select %14, %407, %408 : vector<2x128xi1>, vector<2x128xf32>
    %c51 = arith.constant 51 : index
    %410 = memref.load %arg2[%c51] : memref<144xf32, #tpu.memory_space<smem>>
    %411 = vector.broadcast %410 : f32 to vector<2x128xf32>
    %412 = arith.mulf %409, %411 : vector<2x128xf32>
    %413 = arith.addf %401, %412 : vector<2x128xf32>
    %c52 = arith.constant 52 : index
    %414 = memref.load %arg2[%c52] : memref<144xf32, #tpu.memory_space<smem>>
    %415 = vector.broadcast %414 : f32 to vector<2x128xf32>
    %416 = arith.mulf %406, %415 : vector<2x128xf32>
    %417 = arith.addf %413, %416 : vector<2x128xf32>
    %c127_i32_131 = arith.constant 127 : i32
    %418 = tpu.dynamic_rotate %406 by %c127_i32_131 dim 1 : vector<2x128xf32>, i32 -> vector<2x128xf32>
    %cst_132 = arith.constant 0.000000e+00 : f32
    %419 = vector.broadcast %cst_132 : f32 to vector<2x128xf32>
    %420 = arith.select %16, %418, %419 : vector<2x128xi1>, vector<2x128xf32>
    %c53 = arith.constant 53 : index
    %421 = memref.load %arg2[%c53] : memref<144xf32, #tpu.memory_space<smem>>
    %422 = vector.broadcast %421 : f32 to vector<2x128xf32>
    %423 = arith.mulf %420, %422 : vector<2x128xf32>
    %424 = arith.addf %417, %423 : vector<2x128xf32>
    %c0_133 = arith.constant 0 : index
    %c6_134 = arith.constant 6 : index
    %c0_135 = arith.constant 0 : index
    %c0_136 = arith.constant 0 : index
    %425 = vector.load %arg1[%c0_133, %c6_134, %c0_135, %c0_136] : memref<1x16x2x128xf32, #tpu.memory_space<vmem>>, vector<1x1x2x128xf32>
    %426 = vector.shape_cast %425 : vector<1x1x2x128xf32> to vector<1x2x128xf32>
    %427 = vector.shape_cast %426 : vector<1x2x128xf32> to vector<2x128xf32>
    %c16_i32_137 = arith.constant 16 : i32
    %428 = tpu.dynamic_rotate %427 by %c16_i32_137 dim 1 : vector<2x128xf32>, i32 -> vector<2x128xf32>
    %c1_i32_138 = arith.constant 1 : i32
    %429 = tpu.dynamic_rotate %428 by %c1_i32_138 dim 0 : vector<2x128xf32>, i32 -> vector<2x128xf32>
    %430 = arith.select %20, %428, %429 : vector<2x128xi1>, vector<2x128xf32>
    %cst_139 = arith.constant 0.000000e+00 : f32
    %431 = vector.broadcast %cst_139 : f32 to vector<2x128xf32>
    %432 = arith.select %10, %430, %431 : vector<2x128xi1>, vector<2x128xf32>
    %c1_i32_140 = arith.constant 1 : i32
    %433 = tpu.dynamic_rotate %432 by %c1_i32_140 dim 1 : vector<2x128xf32>, i32 -> vector<2x128xf32>
    %cst_141 = arith.constant 0.000000e+00 : f32
    %434 = vector.broadcast %cst_141 : f32 to vector<2x128xf32>
    %435 = arith.select %14, %433, %434 : vector<2x128xi1>, vector<2x128xf32>
    %c54 = arith.constant 54 : index
    %436 = memref.load %arg2[%c54] : memref<144xf32, #tpu.memory_space<smem>>
    %437 = vector.broadcast %436 : f32 to vector<2x128xf32>
    %438 = arith.mulf %435, %437 : vector<2x128xf32>
    %439 = arith.addf %424, %438 : vector<2x128xf32>
    %c55 = arith.constant 55 : index
    %440 = memref.load %arg2[%c55] : memref<144xf32, #tpu.memory_space<smem>>
    %441 = vector.broadcast %440 : f32 to vector<2x128xf32>
    %442 = arith.mulf %432, %441 : vector<2x128xf32>
    %443 = arith.addf %439, %442 : vector<2x128xf32>
    %c127_i32_142 = arith.constant 127 : i32
    %444 = tpu.dynamic_rotate %432 by %c127_i32_142 dim 1 : vector<2x128xf32>, i32 -> vector<2x128xf32>
    %cst_143 = arith.constant 0.000000e+00 : f32
    %445 = vector.broadcast %cst_143 : f32 to vector<2x128xf32>
    %446 = arith.select %16, %444, %445 : vector<2x128xi1>, vector<2x128xf32>
    %c56 = arith.constant 56 : index
    %447 = memref.load %arg2[%c56] : memref<144xf32, #tpu.memory_space<smem>>
    %448 = vector.broadcast %447 : f32 to vector<2x128xf32>
    %449 = arith.mulf %446, %448 : vector<2x128xf32>
    %450 = arith.addf %443, %449 : vector<2x128xf32>
    %c1_i32_144 = arith.constant 1 : i32
    %451 = tpu.dynamic_rotate %427 by %c1_i32_144 dim 1 : vector<2x128xf32>, i32 -> vector<2x128xf32>
    %cst_145 = arith.constant 0.000000e+00 : f32
    %452 = vector.broadcast %cst_145 : f32 to vector<2x128xf32>
    %453 = arith.select %14, %451, %452 : vector<2x128xi1>, vector<2x128xf32>
    %c57 = arith.constant 57 : index
    %454 = memref.load %arg2[%c57] : memref<144xf32, #tpu.memory_space<smem>>
    %455 = vector.broadcast %454 : f32 to vector<2x128xf32>
    %456 = arith.mulf %453, %455 : vector<2x128xf32>
    %457 = arith.addf %450, %456 : vector<2x128xf32>
    %c58 = arith.constant 58 : index
    %458 = memref.load %arg2[%c58] : memref<144xf32, #tpu.memory_space<smem>>
    %459 = vector.broadcast %458 : f32 to vector<2x128xf32>
    %460 = arith.mulf %427, %459 : vector<2x128xf32>
    %461 = arith.addf %457, %460 : vector<2x128xf32>
    %c127_i32_146 = arith.constant 127 : i32
    %462 = tpu.dynamic_rotate %427 by %c127_i32_146 dim 1 : vector<2x128xf32>, i32 -> vector<2x128xf32>
    %cst_147 = arith.constant 0.000000e+00 : f32
    %463 = vector.broadcast %cst_147 : f32 to vector<2x128xf32>
    %464 = arith.select %16, %462, %463 : vector<2x128xi1>, vector<2x128xf32>
    %c59 = arith.constant 59 : index
    %465 = memref.load %arg2[%c59] : memref<144xf32, #tpu.memory_space<smem>>
    %466 = vector.broadcast %465 : f32 to vector<2x128xf32>
    %467 = arith.mulf %464, %466 : vector<2x128xf32>
    %468 = arith.addf %461, %467 : vector<2x128xf32>
    %c112_i32_148 = arith.constant 112 : i32
    %469 = tpu.dynamic_rotate %427 by %c112_i32_148 dim 1 : vector<2x128xf32>, i32 -> vector<2x128xf32>
    %c1_i32_149 = arith.constant 1 : i32
    %470 = tpu.dynamic_rotate %469 by %c1_i32_149 dim 0 : vector<2x128xf32>, i32 -> vector<2x128xf32>
    %471 = arith.select %18, %469, %470 : vector<2x128xi1>, vector<2x128xf32>
    %cst_150 = arith.constant 0.000000e+00 : f32
    %472 = vector.broadcast %cst_150 : f32 to vector<2x128xf32>
    %473 = arith.select %12, %471, %472 : vector<2x128xi1>, vector<2x128xf32>
    %c1_i32_151 = arith.constant 1 : i32
    %474 = tpu.dynamic_rotate %473 by %c1_i32_151 dim 1 : vector<2x128xf32>, i32 -> vector<2x128xf32>
    %cst_152 = arith.constant 0.000000e+00 : f32
    %475 = vector.broadcast %cst_152 : f32 to vector<2x128xf32>
    %476 = arith.select %14, %474, %475 : vector<2x128xi1>, vector<2x128xf32>
    %c60 = arith.constant 60 : index
    %477 = memref.load %arg2[%c60] : memref<144xf32, #tpu.memory_space<smem>>
    %478 = vector.broadcast %477 : f32 to vector<2x128xf32>
    %479 = arith.mulf %476, %478 : vector<2x128xf32>
    %480 = arith.addf %468, %479 : vector<2x128xf32>
    %c61 = arith.constant 61 : index
    %481 = memref.load %arg2[%c61] : memref<144xf32, #tpu.memory_space<smem>>
    %482 = vector.broadcast %481 : f32 to vector<2x128xf32>
    %483 = arith.mulf %473, %482 : vector<2x128xf32>
    %484 = arith.addf %480, %483 : vector<2x128xf32>
    %c127_i32_153 = arith.constant 127 : i32
    %485 = tpu.dynamic_rotate %473 by %c127_i32_153 dim 1 : vector<2x128xf32>, i32 -> vector<2x128xf32>
    %cst_154 = arith.constant 0.000000e+00 : f32
    %486 = vector.broadcast %cst_154 : f32 to vector<2x128xf32>
    %487 = arith.select %16, %485, %486 : vector<2x128xi1>, vector<2x128xf32>
    %c62 = arith.constant 62 : index
    %488 = memref.load %arg2[%c62] : memref<144xf32, #tpu.memory_space<smem>>
    %489 = vector.broadcast %488 : f32 to vector<2x128xf32>
    %490 = arith.mulf %487, %489 : vector<2x128xf32>
    %491 = arith.addf %484, %490 : vector<2x128xf32>
    %c0_155 = arith.constant 0 : index
    %c7_156 = arith.constant 7 : index
    %c0_157 = arith.constant 0 : index
    %c0_158 = arith.constant 0 : index
    %492 = vector.load %arg1[%c0_155, %c7_156, %c0_157, %c0_158] : memref<1x16x2x128xf32, #tpu.memory_space<vmem>>, vector<1x1x2x128xf32>
    %493 = vector.shape_cast %492 : vector<1x1x2x128xf32> to vector<1x2x128xf32>
    %494 = vector.shape_cast %493 : vector<1x2x128xf32> to vector<2x128xf32>
    %c16_i32_159 = arith.constant 16 : i32
    %495 = tpu.dynamic_rotate %494 by %c16_i32_159 dim 1 : vector<2x128xf32>, i32 -> vector<2x128xf32>
    %c1_i32_160 = arith.constant 1 : i32
    %496 = tpu.dynamic_rotate %495 by %c1_i32_160 dim 0 : vector<2x128xf32>, i32 -> vector<2x128xf32>
    %497 = arith.select %20, %495, %496 : vector<2x128xi1>, vector<2x128xf32>
    %cst_161 = arith.constant 0.000000e+00 : f32
    %498 = vector.broadcast %cst_161 : f32 to vector<2x128xf32>
    %499 = arith.select %10, %497, %498 : vector<2x128xi1>, vector<2x128xf32>
    %c1_i32_162 = arith.constant 1 : i32
    %500 = tpu.dynamic_rotate %499 by %c1_i32_162 dim 1 : vector<2x128xf32>, i32 -> vector<2x128xf32>
    %cst_163 = arith.constant 0.000000e+00 : f32
    %501 = vector.broadcast %cst_163 : f32 to vector<2x128xf32>
    %502 = arith.select %14, %500, %501 : vector<2x128xi1>, vector<2x128xf32>
    %c63 = arith.constant 63 : index
    %503 = memref.load %arg2[%c63] : memref<144xf32, #tpu.memory_space<smem>>
    %504 = vector.broadcast %503 : f32 to vector<2x128xf32>
    %505 = arith.mulf %502, %504 : vector<2x128xf32>
    %506 = arith.addf %491, %505 : vector<2x128xf32>
    %c64 = arith.constant 64 : index
    %507 = memref.load %arg2[%c64] : memref<144xf32, #tpu.memory_space<smem>>
    %508 = vector.broadcast %507 : f32 to vector<2x128xf32>
    %509 = arith.mulf %499, %508 : vector<2x128xf32>
    %510 = arith.addf %506, %509 : vector<2x128xf32>
    %c127_i32_164 = arith.constant 127 : i32
    %511 = tpu.dynamic_rotate %499 by %c127_i32_164 dim 1 : vector<2x128xf32>, i32 -> vector<2x128xf32>
    %cst_165 = arith.constant 0.000000e+00 : f32
    %512 = vector.broadcast %cst_165 : f32 to vector<2x128xf32>
    %513 = arith.select %16, %511, %512 : vector<2x128xi1>, vector<2x128xf32>
    %c65 = arith.constant 65 : index
    %514 = memref.load %arg2[%c65] : memref<144xf32, #tpu.memory_space<smem>>
    %515 = vector.broadcast %514 : f32 to vector<2x128xf32>
    %516 = arith.mulf %513, %515 : vector<2x128xf32>
    %517 = arith.addf %510, %516 : vector<2x128xf32>
    %c1_i32_166 = arith.constant 1 : i32
    %518 = tpu.dynamic_rotate %494 by %c1_i32_166 dim 1 : vector<2x128xf32>, i32 -> vector<2x128xf32>
    %cst_167 = arith.constant 0.000000e+00 : f32
    %519 = vector.broadcast %cst_167 : f32 to vector<2x128xf32>
    %520 = arith.select %14, %518, %519 : vector<2x128xi1>, vector<2x128xf32>
    %c66 = arith.constant 66 : index
    %521 = memref.load %arg2[%c66] : memref<144xf32, #tpu.memory_space<smem>>
    %522 = vector.broadcast %521 : f32 to vector<2x128xf32>
    %523 = arith.mulf %520, %522 : vector<2x128xf32>
    %524 = arith.addf %517, %523 : vector<2x128xf32>
    %c67 = arith.constant 67 : index
    %525 = memref.load %arg2[%c67] : memref<144xf32, #tpu.memory_space<smem>>
    %526 = vector.broadcast %525 : f32 to vector<2x128xf32>
    %527 = arith.mulf %494, %526 : vector<2x128xf32>
    %528 = arith.addf %524, %527 : vector<2x128xf32>
    %c127_i32_168 = arith.constant 127 : i32
    %529 = tpu.dynamic_rotate %494 by %c127_i32_168 dim 1 : vector<2x128xf32>, i32 -> vector<2x128xf32>
    %cst_169 = arith.constant 0.000000e+00 : f32
    %530 = vector.broadcast %cst_169 : f32 to vector<2x128xf32>
    %531 = arith.select %16, %529, %530 : vector<2x128xi1>, vector<2x128xf32>
    %c68 = arith.constant 68 : index
    %532 = memref.load %arg2[%c68] : memref<144xf32, #tpu.memory_space<smem>>
    %533 = vector.broadcast %532 : f32 to vector<2x128xf32>
    %534 = arith.mulf %531, %533 : vector<2x128xf32>
    %535 = arith.addf %528, %534 : vector<2x128xf32>
    %c112_i32_170 = arith.constant 112 : i32
    %536 = tpu.dynamic_rotate %494 by %c112_i32_170 dim 1 : vector<2x128xf32>, i32 -> vector<2x128xf32>
    %c1_i32_171 = arith.constant 1 : i32
    %537 = tpu.dynamic_rotate %536 by %c1_i32_171 dim 0 : vector<2x128xf32>, i32 -> vector<2x128xf32>
    %538 = arith.select %18, %536, %537 : vector<2x128xi1>, vector<2x128xf32>
    %cst_172 = arith.constant 0.000000e+00 : f32
    %539 = vector.broadcast %cst_172 : f32 to vector<2x128xf32>
    %540 = arith.select %12, %538, %539 : vector<2x128xi1>, vector<2x128xf32>
    %c1_i32_173 = arith.constant 1 : i32
    %541 = tpu.dynamic_rotate %540 by %c1_i32_173 dim 1 : vector<2x128xf32>, i32 -> vector<2x128xf32>
    %cst_174 = arith.constant 0.000000e+00 : f32
    %542 = vector.broadcast %cst_174 : f32 to vector<2x128xf32>
    %543 = arith.select %14, %541, %542 : vector<2x128xi1>, vector<2x128xf32>
    %c69 = arith.constant 69 : index
    %544 = memref.load %arg2[%c69] : memref<144xf32, #tpu.memory_space<smem>>
    %545 = vector.broadcast %544 : f32 to vector<2x128xf32>
    %546 = arith.mulf %543, %545 : vector<2x128xf32>
    %547 = arith.addf %535, %546 : vector<2x128xf32>
    %c70 = arith.constant 70 : index
    %548 = memref.load %arg2[%c70] : memref<144xf32, #tpu.memory_space<smem>>
    %549 = vector.broadcast %548 : f32 to vector<2x128xf32>
    %550 = arith.mulf %540, %549 : vector<2x128xf32>
    %551 = arith.addf %547, %550 : vector<2x128xf32>
    %c127_i32_175 = arith.constant 127 : i32
    %552 = tpu.dynamic_rotate %540 by %c127_i32_175 dim 1 : vector<2x128xf32>, i32 -> vector<2x128xf32>
    %cst_176 = arith.constant 0.000000e+00 : f32
    %553 = vector.broadcast %cst_176 : f32 to vector<2x128xf32>
    %554 = arith.select %16, %552, %553 : vector<2x128xi1>, vector<2x128xf32>
    %c71 = arith.constant 71 : index
    %555 = memref.load %arg2[%c71] : memref<144xf32, #tpu.memory_space<smem>>
    %556 = vector.broadcast %555 : f32 to vector<2x128xf32>
    %557 = arith.mulf %554, %556 : vector<2x128xf32>
    %558 = arith.addf %551, %557 : vector<2x128xf32>
    %c0_177 = arith.constant 0 : index
    %c8_178 = arith.constant 8 : index
    %c0_179 = arith.constant 0 : index
    %c0_180 = arith.constant 0 : index
    %559 = vector.load %arg1[%c0_177, %c8_178, %c0_179, %c0_180] : memref<1x16x2x128xf32, #tpu.memory_space<vmem>>, vector<1x1x2x128xf32>
    %560 = vector.shape_cast %559 : vector<1x1x2x128xf32> to vector<1x2x128xf32>
    %561 = vector.shape_cast %560 : vector<1x2x128xf32> to vector<2x128xf32>
    %c16_i32_181 = arith.constant 16 : i32
    %562 = tpu.dynamic_rotate %561 by %c16_i32_181 dim 1 : vector<2x128xf32>, i32 -> vector<2x128xf32>
    %c1_i32_182 = arith.constant 1 : i32
    %563 = tpu.dynamic_rotate %562 by %c1_i32_182 dim 0 : vector<2x128xf32>, i32 -> vector<2x128xf32>
    %564 = arith.select %20, %562, %563 : vector<2x128xi1>, vector<2x128xf32>
    %cst_183 = arith.constant 0.000000e+00 : f32
    %565 = vector.broadcast %cst_183 : f32 to vector<2x128xf32>
    %566 = arith.select %10, %564, %565 : vector<2x128xi1>, vector<2x128xf32>
    %c1_i32_184 = arith.constant 1 : i32
    %567 = tpu.dynamic_rotate %566 by %c1_i32_184 dim 1 : vector<2x128xf32>, i32 -> vector<2x128xf32>
    %cst_185 = arith.constant 0.000000e+00 : f32
    %568 = vector.broadcast %cst_185 : f32 to vector<2x128xf32>
    %569 = arith.select %14, %567, %568 : vector<2x128xi1>, vector<2x128xf32>
    %c72 = arith.constant 72 : index
    %570 = memref.load %arg2[%c72] : memref<144xf32, #tpu.memory_space<smem>>
    %571 = vector.broadcast %570 : f32 to vector<2x128xf32>
    %572 = arith.mulf %569, %571 : vector<2x128xf32>
    %573 = arith.addf %558, %572 : vector<2x128xf32>
    %c73 = arith.constant 73 : index
    %574 = memref.load %arg2[%c73] : memref<144xf32, #tpu.memory_space<smem>>
    %575 = vector.broadcast %574 : f32 to vector<2x128xf32>
    %576 = arith.mulf %566, %575 : vector<2x128xf32>
    %577 = arith.addf %573, %576 : vector<2x128xf32>
    %c127_i32_186 = arith.constant 127 : i32
    %578 = tpu.dynamic_rotate %566 by %c127_i32_186 dim 1 : vector<2x128xf32>, i32 -> vector<2x128xf32>
    %cst_187 = arith.constant 0.000000e+00 : f32
    %579 = vector.broadcast %cst_187 : f32 to vector<2x128xf32>
    %580 = arith.select %16, %578, %579 : vector<2x128xi1>, vector<2x128xf32>
    %c74 = arith.constant 74 : index
    %581 = memref.load %arg2[%c74] : memref<144xf32, #tpu.memory_space<smem>>
    %582 = vector.broadcast %581 : f32 to vector<2x128xf32>
    %583 = arith.mulf %580, %582 : vector<2x128xf32>
    %584 = arith.addf %577, %583 : vector<2x128xf32>
    %c1_i32_188 = arith.constant 1 : i32
    %585 = tpu.dynamic_rotate %561 by %c1_i32_188 dim 1 : vector<2x128xf32>, i32 -> vector<2x128xf32>
    %cst_189 = arith.constant 0.000000e+00 : f32
    %586 = vector.broadcast %cst_189 : f32 to vector<2x128xf32>
    %587 = arith.select %14, %585, %586 : vector<2x128xi1>, vector<2x128xf32>
    %c75 = arith.constant 75 : index
    %588 = memref.load %arg2[%c75] : memref<144xf32, #tpu.memory_space<smem>>
    %589 = vector.broadcast %588 : f32 to vector<2x128xf32>
    %590 = arith.mulf %587, %589 : vector<2x128xf32>
    %591 = arith.addf %584, %590 : vector<2x128xf32>
    %c76 = arith.constant 76 : index
    %592 = memref.load %arg2[%c76] : memref<144xf32, #tpu.memory_space<smem>>
    %593 = vector.broadcast %592 : f32 to vector<2x128xf32>
    %594 = arith.mulf %561, %593 : vector<2x128xf32>
    %595 = arith.addf %591, %594 : vector<2x128xf32>
    %c127_i32_190 = arith.constant 127 : i32
    %596 = tpu.dynamic_rotate %561 by %c127_i32_190 dim 1 : vector<2x128xf32>, i32 -> vector<2x128xf32>
    %cst_191 = arith.constant 0.000000e+00 : f32
    %597 = vector.broadcast %cst_191 : f32 to vector<2x128xf32>
    %598 = arith.select %16, %596, %597 : vector<2x128xi1>, vector<2x128xf32>
    %c77 = arith.constant 77 : index
    %599 = memref.load %arg2[%c77] : memref<144xf32, #tpu.memory_space<smem>>
    %600 = vector.broadcast %599 : f32 to vector<2x128xf32>
    %601 = arith.mulf %598, %600 : vector<2x128xf32>
    %602 = arith.addf %595, %601 : vector<2x128xf32>
    %c112_i32_192 = arith.constant 112 : i32
    %603 = tpu.dynamic_rotate %561 by %c112_i32_192 dim 1 : vector<2x128xf32>, i32 -> vector<2x128xf32>
    %c1_i32_193 = arith.constant 1 : i32
    %604 = tpu.dynamic_rotate %603 by %c1_i32_193 dim 0 : vector<2x128xf32>, i32 -> vector<2x128xf32>
    %605 = arith.select %18, %603, %604 : vector<2x128xi1>, vector<2x128xf32>
    %cst_194 = arith.constant 0.000000e+00 : f32
    %606 = vector.broadcast %cst_194 : f32 to vector<2x128xf32>
    %607 = arith.select %12, %605, %606 : vector<2x128xi1>, vector<2x128xf32>
    %c1_i32_195 = arith.constant 1 : i32
    %608 = tpu.dynamic_rotate %607 by %c1_i32_195 dim 1 : vector<2x128xf32>, i32 -> vector<2x128xf32>
    %cst_196 = arith.constant 0.000000e+00 : f32
    %609 = vector.broadcast %cst_196 : f32 to vector<2x128xf32>
    %610 = arith.select %14, %608, %609 : vector<2x128xi1>, vector<2x128xf32>
    %c78 = arith.constant 78 : index
    %611 = memref.load %arg2[%c78] : memref<144xf32, #tpu.memory_space<smem>>
    %612 = vector.broadcast %611 : f32 to vector<2x128xf32>
    %613 = arith.mulf %610, %612 : vector<2x128xf32>
    %614 = arith.addf %602, %613 : vector<2x128xf32>
    %c79 = arith.constant 79 : index
    %615 = memref.load %arg2[%c79] : memref<144xf32, #tpu.memory_space<smem>>
    %616 = vector.broadcast %615 : f32 to vector<2x128xf32>
    %617 = arith.mulf %607, %616 : vector<2x128xf32>
    %618 = arith.addf %614, %617 : vector<2x128xf32>
    %c127_i32_197 = arith.constant 127 : i32
    %619 = tpu.dynamic_rotate %607 by %c127_i32_197 dim 1 : vector<2x128xf32>, i32 -> vector<2x128xf32>
    %cst_198 = arith.constant 0.000000e+00 : f32
    %620 = vector.broadcast %cst_198 : f32 to vector<2x128xf32>
    %621 = arith.select %16, %619, %620 : vector<2x128xi1>, vector<2x128xf32>
    %c80 = arith.constant 80 : index
    %622 = memref.load %arg2[%c80] : memref<144xf32, #tpu.memory_space<smem>>
    %623 = vector.broadcast %622 : f32 to vector<2x128xf32>
    %624 = arith.mulf %621, %623 : vector<2x128xf32>
    %625 = arith.addf %618, %624 : vector<2x128xf32>
    %c0_199 = arith.constant 0 : index
    %c9_200 = arith.constant 9 : index
    %c0_201 = arith.constant 0 : index
    %c0_202 = arith.constant 0 : index
    %626 = vector.load %arg1[%c0_199, %c9_200, %c0_201, %c0_202] : memref<1x16x2x128xf32, #tpu.memory_space<vmem>>, vector<1x1x2x128xf32>
    %627 = vector.shape_cast %626 : vector<1x1x2x128xf32> to vector<1x2x128xf32>
    %628 = vector.shape_cast %627 : vector<1x2x128xf32> to vector<2x128xf32>
    %c16_i32_203 = arith.constant 16 : i32
    %629 = tpu.dynamic_rotate %628 by %c16_i32_203 dim 1 : vector<2x128xf32>, i32 -> vector<2x128xf32>
    %c1_i32_204 = arith.constant 1 : i32
    %630 = tpu.dynamic_rotate %629 by %c1_i32_204 dim 0 : vector<2x128xf32>, i32 -> vector<2x128xf32>
    %631 = arith.select %20, %629, %630 : vector<2x128xi1>, vector<2x128xf32>
    %cst_205 = arith.constant 0.000000e+00 : f32
    %632 = vector.broadcast %cst_205 : f32 to vector<2x128xf32>
    %633 = arith.select %10, %631, %632 : vector<2x128xi1>, vector<2x128xf32>
    %c1_i32_206 = arith.constant 1 : i32
    %634 = tpu.dynamic_rotate %633 by %c1_i32_206 dim 1 : vector<2x128xf32>, i32 -> vector<2x128xf32>
    %cst_207 = arith.constant 0.000000e+00 : f32
    %635 = vector.broadcast %cst_207 : f32 to vector<2x128xf32>
    %636 = arith.select %14, %634, %635 : vector<2x128xi1>, vector<2x128xf32>
    %c81 = arith.constant 81 : index
    %637 = memref.load %arg2[%c81] : memref<144xf32, #tpu.memory_space<smem>>
    %638 = vector.broadcast %637 : f32 to vector<2x128xf32>
    %639 = arith.mulf %636, %638 : vector<2x128xf32>
    %640 = arith.addf %625, %639 : vector<2x128xf32>
    %c82 = arith.constant 82 : index
    %641 = memref.load %arg2[%c82] : memref<144xf32, #tpu.memory_space<smem>>
    %642 = vector.broadcast %641 : f32 to vector<2x128xf32>
    %643 = arith.mulf %633, %642 : vector<2x128xf32>
    %644 = arith.addf %640, %643 : vector<2x128xf32>
    %c127_i32_208 = arith.constant 127 : i32
    %645 = tpu.dynamic_rotate %633 by %c127_i32_208 dim 1 : vector<2x128xf32>, i32 -> vector<2x128xf32>
    %cst_209 = arith.constant 0.000000e+00 : f32
    %646 = vector.broadcast %cst_209 : f32 to vector<2x128xf32>
    %647 = arith.select %16, %645, %646 : vector<2x128xi1>, vector<2x128xf32>
    %c83 = arith.constant 83 : index
    %648 = memref.load %arg2[%c83] : memref<144xf32, #tpu.memory_space<smem>>
    %649 = vector.broadcast %648 : f32 to vector<2x128xf32>
    %650 = arith.mulf %647, %649 : vector<2x128xf32>
    %651 = arith.addf %644, %650 : vector<2x128xf32>
    %c1_i32_210 = arith.constant 1 : i32
    %652 = tpu.dynamic_rotate %628 by %c1_i32_210 dim 1 : vector<2x128xf32>, i32 -> vector<2x128xf32>
    %cst_211 = arith.constant 0.000000e+00 : f32
    %653 = vector.broadcast %cst_211 : f32 to vector<2x128xf32>
    %654 = arith.select %14, %652, %653 : vector<2x128xi1>, vector<2x128xf32>
    %c84 = arith.constant 84 : index
    %655 = memref.load %arg2[%c84] : memref<144xf32, #tpu.memory_space<smem>>
    %656 = vector.broadcast %655 : f32 to vector<2x128xf32>
    %657 = arith.mulf %654, %656 : vector<2x128xf32>
    %658 = arith.addf %651, %657 : vector<2x128xf32>
    %c85 = arith.constant 85 : index
    %659 = memref.load %arg2[%c85] : memref<144xf32, #tpu.memory_space<smem>>
    %660 = vector.broadcast %659 : f32 to vector<2x128xf32>
    %661 = arith.mulf %628, %660 : vector<2x128xf32>
    %662 = arith.addf %658, %661 : vector<2x128xf32>
    %c127_i32_212 = arith.constant 127 : i32
    %663 = tpu.dynamic_rotate %628 by %c127_i32_212 dim 1 : vector<2x128xf32>, i32 -> vector<2x128xf32>
    %cst_213 = arith.constant 0.000000e+00 : f32
    %664 = vector.broadcast %cst_213 : f32 to vector<2x128xf32>
    %665 = arith.select %16, %663, %664 : vector<2x128xi1>, vector<2x128xf32>
    %c86 = arith.constant 86 : index
    %666 = memref.load %arg2[%c86] : memref<144xf32, #tpu.memory_space<smem>>
    %667 = vector.broadcast %666 : f32 to vector<2x128xf32>
    %668 = arith.mulf %665, %667 : vector<2x128xf32>
    %669 = arith.addf %662, %668 : vector<2x128xf32>
    %c112_i32_214 = arith.constant 112 : i32
    %670 = tpu.dynamic_rotate %628 by %c112_i32_214 dim 1 : vector<2x128xf32>, i32 -> vector<2x128xf32>
    %c1_i32_215 = arith.constant 1 : i32
    %671 = tpu.dynamic_rotate %670 by %c1_i32_215 dim 0 : vector<2x128xf32>, i32 -> vector<2x128xf32>
    %672 = arith.select %18, %670, %671 : vector<2x128xi1>, vector<2x128xf32>
    %cst_216 = arith.constant 0.000000e+00 : f32
    %673 = vector.broadcast %cst_216 : f32 to vector<2x128xf32>
    %674 = arith.select %12, %672, %673 : vector<2x128xi1>, vector<2x128xf32>
    %c1_i32_217 = arith.constant 1 : i32
    %675 = tpu.dynamic_rotate %674 by %c1_i32_217 dim 1 : vector<2x128xf32>, i32 -> vector<2x128xf32>
    %cst_218 = arith.constant 0.000000e+00 : f32
    %676 = vector.broadcast %cst_218 : f32 to vector<2x128xf32>
    %677 = arith.select %14, %675, %676 : vector<2x128xi1>, vector<2x128xf32>
    %c87 = arith.constant 87 : index
    %678 = memref.load %arg2[%c87] : memref<144xf32, #tpu.memory_space<smem>>
    %679 = vector.broadcast %678 : f32 to vector<2x128xf32>
    %680 = arith.mulf %677, %679 : vector<2x128xf32>
    %681 = arith.addf %669, %680 : vector<2x128xf32>
    %c88 = arith.constant 88 : index
    %682 = memref.load %arg2[%c88] : memref<144xf32, #tpu.memory_space<smem>>
    %683 = vector.broadcast %682 : f32 to vector<2x128xf32>
    %684 = arith.mulf %674, %683 : vector<2x128xf32>
    %685 = arith.addf %681, %684 : vector<2x128xf32>
    %c127_i32_219 = arith.constant 127 : i32
    %686 = tpu.dynamic_rotate %674 by %c127_i32_219 dim 1 : vector<2x128xf32>, i32 -> vector<2x128xf32>
    %cst_220 = arith.constant 0.000000e+00 : f32
    %687 = vector.broadcast %cst_220 : f32 to vector<2x128xf32>
    %688 = arith.select %16, %686, %687 : vector<2x128xi1>, vector<2x128xf32>
    %c89 = arith.constant 89 : index
    %689 = memref.load %arg2[%c89] : memref<144xf32, #tpu.memory_space<smem>>
    %690 = vector.broadcast %689 : f32 to vector<2x128xf32>
    %691 = arith.mulf %688, %690 : vector<2x128xf32>
    %692 = arith.addf %685, %691 : vector<2x128xf32>
    %c0_221 = arith.constant 0 : index
    %c10_222 = arith.constant 10 : index
    %c0_223 = arith.constant 0 : index
    %c0_224 = arith.constant 0 : index
    %693 = vector.load %arg1[%c0_221, %c10_222, %c0_223, %c0_224] : memref<1x16x2x128xf32, #tpu.memory_space<vmem>>, vector<1x1x2x128xf32>
    %694 = vector.shape_cast %693 : vector<1x1x2x128xf32> to vector<1x2x128xf32>
    %695 = vector.shape_cast %694 : vector<1x2x128xf32> to vector<2x128xf32>
    %c16_i32_225 = arith.constant 16 : i32
    %696 = tpu.dynamic_rotate %695 by %c16_i32_225 dim 1 : vector<2x128xf32>, i32 -> vector<2x128xf32>
    %c1_i32_226 = arith.constant 1 : i32
    %697 = tpu.dynamic_rotate %696 by %c1_i32_226 dim 0 : vector<2x128xf32>, i32 -> vector<2x128xf32>
    %698 = arith.select %20, %696, %697 : vector<2x128xi1>, vector<2x128xf32>
    %cst_227 = arith.constant 0.000000e+00 : f32
    %699 = vector.broadcast %cst_227 : f32 to vector<2x128xf32>
    %700 = arith.select %10, %698, %699 : vector<2x128xi1>, vector<2x128xf32>
    %c1_i32_228 = arith.constant 1 : i32
    %701 = tpu.dynamic_rotate %700 by %c1_i32_228 dim 1 : vector<2x128xf32>, i32 -> vector<2x128xf32>
    %cst_229 = arith.constant 0.000000e+00 : f32
    %702 = vector.broadcast %cst_229 : f32 to vector<2x128xf32>
    %703 = arith.select %14, %701, %702 : vector<2x128xi1>, vector<2x128xf32>
    %c90 = arith.constant 90 : index
    %704 = memref.load %arg2[%c90] : memref<144xf32, #tpu.memory_space<smem>>
    %705 = vector.broadcast %704 : f32 to vector<2x128xf32>
    %706 = arith.mulf %703, %705 : vector<2x128xf32>
    %707 = arith.addf %692, %706 : vector<2x128xf32>
    %c91 = arith.constant 91 : index
    %708 = memref.load %arg2[%c91] : memref<144xf32, #tpu.memory_space<smem>>
    %709 = vector.broadcast %708 : f32 to vector<2x128xf32>
    %710 = arith.mulf %700, %709 : vector<2x128xf32>
    %711 = arith.addf %707, %710 : vector<2x128xf32>
    %c127_i32_230 = arith.constant 127 : i32
    %712 = tpu.dynamic_rotate %700 by %c127_i32_230 dim 1 : vector<2x128xf32>, i32 -> vector<2x128xf32>
    %cst_231 = arith.constant 0.000000e+00 : f32
    %713 = vector.broadcast %cst_231 : f32 to vector<2x128xf32>
    %714 = arith.select %16, %712, %713 : vector<2x128xi1>, vector<2x128xf32>
    %c92 = arith.constant 92 : index
    %715 = memref.load %arg2[%c92] : memref<144xf32, #tpu.memory_space<smem>>
    %716 = vector.broadcast %715 : f32 to vector<2x128xf32>
    %717 = arith.mulf %714, %716 : vector<2x128xf32>
    %718 = arith.addf %711, %717 : vector<2x128xf32>
    %c1_i32_232 = arith.constant 1 : i32
    %719 = tpu.dynamic_rotate %695 by %c1_i32_232 dim 1 : vector<2x128xf32>, i32 -> vector<2x128xf32>
    %cst_233 = arith.constant 0.000000e+00 : f32
    %720 = vector.broadcast %cst_233 : f32 to vector<2x128xf32>
    %721 = arith.select %14, %719, %720 : vector<2x128xi1>, vector<2x128xf32>
    %c93 = arith.constant 93 : index
    %722 = memref.load %arg2[%c93] : memref<144xf32, #tpu.memory_space<smem>>
    %723 = vector.broadcast %722 : f32 to vector<2x128xf32>
    %724 = arith.mulf %721, %723 : vector<2x128xf32>
    %725 = arith.addf %718, %724 : vector<2x128xf32>
    %c94 = arith.constant 94 : index
    %726 = memref.load %arg2[%c94] : memref<144xf32, #tpu.memory_space<smem>>
    %727 = vector.broadcast %726 : f32 to vector<2x128xf32>
    %728 = arith.mulf %695, %727 : vector<2x128xf32>
    %729 = arith.addf %725, %728 : vector<2x128xf32>
    %c127_i32_234 = arith.constant 127 : i32
    %730 = tpu.dynamic_rotate %695 by %c127_i32_234 dim 1 : vector<2x128xf32>, i32 -> vector<2x128xf32>
    %cst_235 = arith.constant 0.000000e+00 : f32
    %731 = vector.broadcast %cst_235 : f32 to vector<2x128xf32>
    %732 = arith.select %16, %730, %731 : vector<2x128xi1>, vector<2x128xf32>
    %c95 = arith.constant 95 : index
    %733 = memref.load %arg2[%c95] : memref<144xf32, #tpu.memory_space<smem>>
    %734 = vector.broadcast %733 : f32 to vector<2x128xf32>
    %735 = arith.mulf %732, %734 : vector<2x128xf32>
    %736 = arith.addf %729, %735 : vector<2x128xf32>
    %c112_i32_236 = arith.constant 112 : i32
    %737 = tpu.dynamic_rotate %695 by %c112_i32_236 dim 1 : vector<2x128xf32>, i32 -> vector<2x128xf32>
    %c1_i32_237 = arith.constant 1 : i32
    %738 = tpu.dynamic_rotate %737 by %c1_i32_237 dim 0 : vector<2x128xf32>, i32 -> vector<2x128xf32>
    %739 = arith.select %18, %737, %738 : vector<2x128xi1>, vector<2x128xf32>
    %cst_238 = arith.constant 0.000000e+00 : f32
    %740 = vector.broadcast %cst_238 : f32 to vector<2x128xf32>
    %741 = arith.select %12, %739, %740 : vector<2x128xi1>, vector<2x128xf32>
    %c1_i32_239 = arith.constant 1 : i32
    %742 = tpu.dynamic_rotate %741 by %c1_i32_239 dim 1 : vector<2x128xf32>, i32 -> vector<2x128xf32>
    %cst_240 = arith.constant 0.000000e+00 : f32
    %743 = vector.broadcast %cst_240 : f32 to vector<2x128xf32>
    %744 = arith.select %14, %742, %743 : vector<2x128xi1>, vector<2x128xf32>
    %c96 = arith.constant 96 : index
    %745 = memref.load %arg2[%c96] : memref<144xf32, #tpu.memory_space<smem>>
    %746 = vector.broadcast %745 : f32 to vector<2x128xf32>
    %747 = arith.mulf %744, %746 : vector<2x128xf32>
    %748 = arith.addf %736, %747 : vector<2x128xf32>
    %c97 = arith.constant 97 : index
    %749 = memref.load %arg2[%c97] : memref<144xf32, #tpu.memory_space<smem>>
    %750 = vector.broadcast %749 : f32 to vector<2x128xf32>
    %751 = arith.mulf %741, %750 : vector<2x128xf32>
    %752 = arith.addf %748, %751 : vector<2x128xf32>
    %c127_i32_241 = arith.constant 127 : i32
    %753 = tpu.dynamic_rotate %741 by %c127_i32_241 dim 1 : vector<2x128xf32>, i32 -> vector<2x128xf32>
    %cst_242 = arith.constant 0.000000e+00 : f32
    %754 = vector.broadcast %cst_242 : f32 to vector<2x128xf32>
    %755 = arith.select %16, %753, %754 : vector<2x128xi1>, vector<2x128xf32>
    %c98 = arith.constant 98 : index
    %756 = memref.load %arg2[%c98] : memref<144xf32, #tpu.memory_space<smem>>
    %757 = vector.broadcast %756 : f32 to vector<2x128xf32>
    %758 = arith.mulf %755, %757 : vector<2x128xf32>
    %759 = arith.addf %752, %758 : vector<2x128xf32>
    %c0_243 = arith.constant 0 : index
    %c11_244 = arith.constant 11 : index
    %c0_245 = arith.constant 0 : index
    %c0_246 = arith.constant 0 : index
    %760 = vector.load %arg1[%c0_243, %c11_244, %c0_245, %c0_246] : memref<1x16x2x128xf32, #tpu.memory_space<vmem>>, vector<1x1x2x128xf32>
    %761 = vector.shape_cast %760 : vector<1x1x2x128xf32> to vector<1x2x128xf32>
    %762 = vector.shape_cast %761 : vector<1x2x128xf32> to vector<2x128xf32>
    %c16_i32_247 = arith.constant 16 : i32
    %763 = tpu.dynamic_rotate %762 by %c16_i32_247 dim 1 : vector<2x128xf32>, i32 -> vector<2x128xf32>
    %c1_i32_248 = arith.constant 1 : i32
    %764 = tpu.dynamic_rotate %763 by %c1_i32_248 dim 0 : vector<2x128xf32>, i32 -> vector<2x128xf32>
    %765 = arith.select %20, %763, %764 : vector<2x128xi1>, vector<2x128xf32>
    %cst_249 = arith.constant 0.000000e+00 : f32
    %766 = vector.broadcast %cst_249 : f32 to vector<2x128xf32>
    %767 = arith.select %10, %765, %766 : vector<2x128xi1>, vector<2x128xf32>
    %c1_i32_250 = arith.constant 1 : i32
    %768 = tpu.dynamic_rotate %767 by %c1_i32_250 dim 1 : vector<2x128xf32>, i32 -> vector<2x128xf32>
    %cst_251 = arith.constant 0.000000e+00 : f32
    %769 = vector.broadcast %cst_251 : f32 to vector<2x128xf32>
    %770 = arith.select %14, %768, %769 : vector<2x128xi1>, vector<2x128xf32>
    %c99 = arith.constant 99 : index
    %771 = memref.load %arg2[%c99] : memref<144xf32, #tpu.memory_space<smem>>
    %772 = vector.broadcast %771 : f32 to vector<2x128xf32>
    %773 = arith.mulf %770, %772 : vector<2x128xf32>
    %774 = arith.addf %759, %773 : vector<2x128xf32>
    %c100 = arith.constant 100 : index
    %775 = memref.load %arg2[%c100] : memref<144xf32, #tpu.memory_space<smem>>
    %776 = vector.broadcast %775 : f32 to vector<2x128xf32>
    %777 = arith.mulf %767, %776 : vector<2x128xf32>
    %778 = arith.addf %774, %777 : vector<2x128xf32>
    %c127_i32_252 = arith.constant 127 : i32
    %779 = tpu.dynamic_rotate %767 by %c127_i32_252 dim 1 : vector<2x128xf32>, i32 -> vector<2x128xf32>
    %cst_253 = arith.constant 0.000000e+00 : f32
    %780 = vector.broadcast %cst_253 : f32 to vector<2x128xf32>
    %781 = arith.select %16, %779, %780 : vector<2x128xi1>, vector<2x128xf32>
    %c101 = arith.constant 101 : index
    %782 = memref.load %arg2[%c101] : memref<144xf32, #tpu.memory_space<smem>>
    %783 = vector.broadcast %782 : f32 to vector<2x128xf32>
    %784 = arith.mulf %781, %783 : vector<2x128xf32>
    %785 = arith.addf %778, %784 : vector<2x128xf32>
    %c1_i32_254 = arith.constant 1 : i32
    %786 = tpu.dynamic_rotate %762 by %c1_i32_254 dim 1 : vector<2x128xf32>, i32 -> vector<2x128xf32>
    %cst_255 = arith.constant 0.000000e+00 : f32
    %787 = vector.broadcast %cst_255 : f32 to vector<2x128xf32>
    %788 = arith.select %14, %786, %787 : vector<2x128xi1>, vector<2x128xf32>
    %c102 = arith.constant 102 : index
    %789 = memref.load %arg2[%c102] : memref<144xf32, #tpu.memory_space<smem>>
    %790 = vector.broadcast %789 : f32 to vector<2x128xf32>
    %791 = arith.mulf %788, %790 : vector<2x128xf32>
    %792 = arith.addf %785, %791 : vector<2x128xf32>
    %c103 = arith.constant 103 : index
    %793 = memref.load %arg2[%c103] : memref<144xf32, #tpu.memory_space<smem>>
    %794 = vector.broadcast %793 : f32 to vector<2x128xf32>
    %795 = arith.mulf %762, %794 : vector<2x128xf32>
    %796 = arith.addf %792, %795 : vector<2x128xf32>
    %c127_i32_256 = arith.constant 127 : i32
    %797 = tpu.dynamic_rotate %762 by %c127_i32_256 dim 1 : vector<2x128xf32>, i32 -> vector<2x128xf32>
    %cst_257 = arith.constant 0.000000e+00 : f32
    %798 = vector.broadcast %cst_257 : f32 to vector<2x128xf32>
    %799 = arith.select %16, %797, %798 : vector<2x128xi1>, vector<2x128xf32>
    %c104 = arith.constant 104 : index
    %800 = memref.load %arg2[%c104] : memref<144xf32, #tpu.memory_space<smem>>
    %801 = vector.broadcast %800 : f32 to vector<2x128xf32>
    %802 = arith.mulf %799, %801 : vector<2x128xf32>
    %803 = arith.addf %796, %802 : vector<2x128xf32>
    %c112_i32_258 = arith.constant 112 : i32
    %804 = tpu.dynamic_rotate %762 by %c112_i32_258 dim 1 : vector<2x128xf32>, i32 -> vector<2x128xf32>
    %c1_i32_259 = arith.constant 1 : i32
    %805 = tpu.dynamic_rotate %804 by %c1_i32_259 dim 0 : vector<2x128xf32>, i32 -> vector<2x128xf32>
    %806 = arith.select %18, %804, %805 : vector<2x128xi1>, vector<2x128xf32>
    %cst_260 = arith.constant 0.000000e+00 : f32
    %807 = vector.broadcast %cst_260 : f32 to vector<2x128xf32>
    %808 = arith.select %12, %806, %807 : vector<2x128xi1>, vector<2x128xf32>
    %c1_i32_261 = arith.constant 1 : i32
    %809 = tpu.dynamic_rotate %808 by %c1_i32_261 dim 1 : vector<2x128xf32>, i32 -> vector<2x128xf32>
    %cst_262 = arith.constant 0.000000e+00 : f32
    %810 = vector.broadcast %cst_262 : f32 to vector<2x128xf32>
    %811 = arith.select %14, %809, %810 : vector<2x128xi1>, vector<2x128xf32>
    %c105 = arith.constant 105 : index
    %812 = memref.load %arg2[%c105] : memref<144xf32, #tpu.memory_space<smem>>
    %813 = vector.broadcast %812 : f32 to vector<2x128xf32>
    %814 = arith.mulf %811, %813 : vector<2x128xf32>
    %815 = arith.addf %803, %814 : vector<2x128xf32>
    %c106 = arith.constant 106 : index
    %816 = memref.load %arg2[%c106] : memref<144xf32, #tpu.memory_space<smem>>
    %817 = vector.broadcast %816 : f32 to vector<2x128xf32>
    %818 = arith.mulf %808, %817 : vector<2x128xf32>
    %819 = arith.addf %815, %818 : vector<2x128xf32>
    %c127_i32_263 = arith.constant 127 : i32
    %820 = tpu.dynamic_rotate %808 by %c127_i32_263 dim 1 : vector<2x128xf32>, i32 -> vector<2x128xf32>
    %cst_264 = arith.constant 0.000000e+00 : f32
    %821 = vector.broadcast %cst_264 : f32 to vector<2x128xf32>
    %822 = arith.select %16, %820, %821 : vector<2x128xi1>, vector<2x128xf32>
    %c107 = arith.constant 107 : index
    %823 = memref.load %arg2[%c107] : memref<144xf32, #tpu.memory_space<smem>>
    %824 = vector.broadcast %823 : f32 to vector<2x128xf32>
    %825 = arith.mulf %822, %824 : vector<2x128xf32>
    %826 = arith.addf %819, %825 : vector<2x128xf32>
    %c0_265 = arith.constant 0 : index
    %c12_266 = arith.constant 12 : index
    %c0_267 = arith.constant 0 : index
    %c0_268 = arith.constant 0 : index
    %827 = vector.load %arg1[%c0_265, %c12_266, %c0_267, %c0_268] : memref<1x16x2x128xf32, #tpu.memory_space<vmem>>, vector<1x1x2x128xf32>
    %828 = vector.shape_cast %827 : vector<1x1x2x128xf32> to vector<1x2x128xf32>
    %829 = vector.shape_cast %828 : vector<1x2x128xf32> to vector<2x128xf32>
    %c16_i32_269 = arith.constant 16 : i32
    %830 = tpu.dynamic_rotate %829 by %c16_i32_269 dim 1 : vector<2x128xf32>, i32 -> vector<2x128xf32>
    %c1_i32_270 = arith.constant 1 : i32
    %831 = tpu.dynamic_rotate %830 by %c1_i32_270 dim 0 : vector<2x128xf32>, i32 -> vector<2x128xf32>
    %832 = arith.select %20, %830, %831 : vector<2x128xi1>, vector<2x128xf32>
    %cst_271 = arith.constant 0.000000e+00 : f32
    %833 = vector.broadcast %cst_271 : f32 to vector<2x128xf32>
    %834 = arith.select %10, %832, %833 : vector<2x128xi1>, vector<2x128xf32>
    %c1_i32_272 = arith.constant 1 : i32
    %835 = tpu.dynamic_rotate %834 by %c1_i32_272 dim 1 : vector<2x128xf32>, i32 -> vector<2x128xf32>
    %cst_273 = arith.constant 0.000000e+00 : f32
    %836 = vector.broadcast %cst_273 : f32 to vector<2x128xf32>
    %837 = arith.select %14, %835, %836 : vector<2x128xi1>, vector<2x128xf32>
    %c108 = arith.constant 108 : index
    %838 = memref.load %arg2[%c108] : memref<144xf32, #tpu.memory_space<smem>>
    %839 = vector.broadcast %838 : f32 to vector<2x128xf32>
    %840 = arith.mulf %837, %839 : vector<2x128xf32>
    %841 = arith.addf %826, %840 : vector<2x128xf32>
    %c109 = arith.constant 109 : index
    %842 = memref.load %arg2[%c109] : memref<144xf32, #tpu.memory_space<smem>>
    %843 = vector.broadcast %842 : f32 to vector<2x128xf32>
    %844 = arith.mulf %834, %843 : vector<2x128xf32>
    %845 = arith.addf %841, %844 : vector<2x128xf32>
    %c127_i32_274 = arith.constant 127 : i32
    %846 = tpu.dynamic_rotate %834 by %c127_i32_274 dim 1 : vector<2x128xf32>, i32 -> vector<2x128xf32>
    %cst_275 = arith.constant 0.000000e+00 : f32
    %847 = vector.broadcast %cst_275 : f32 to vector<2x128xf32>
    %848 = arith.select %16, %846, %847 : vector<2x128xi1>, vector<2x128xf32>
    %c110 = arith.constant 110 : index
    %849 = memref.load %arg2[%c110] : memref<144xf32, #tpu.memory_space<smem>>
    %850 = vector.broadcast %849 : f32 to vector<2x128xf32>
    %851 = arith.mulf %848, %850 : vector<2x128xf32>
    %852 = arith.addf %845, %851 : vector<2x128xf32>
    %c1_i32_276 = arith.constant 1 : i32
    %853 = tpu.dynamic_rotate %829 by %c1_i32_276 dim 1 : vector<2x128xf32>, i32 -> vector<2x128xf32>
    %cst_277 = arith.constant 0.000000e+00 : f32
    %854 = vector.broadcast %cst_277 : f32 to vector<2x128xf32>
    %855 = arith.select %14, %853, %854 : vector<2x128xi1>, vector<2x128xf32>
    %c111 = arith.constant 111 : index
    %856 = memref.load %arg2[%c111] : memref<144xf32, #tpu.memory_space<smem>>
    %857 = vector.broadcast %856 : f32 to vector<2x128xf32>
    %858 = arith.mulf %855, %857 : vector<2x128xf32>
    %859 = arith.addf %852, %858 : vector<2x128xf32>
    %c112 = arith.constant 112 : index
    %860 = memref.load %arg2[%c112] : memref<144xf32, #tpu.memory_space<smem>>
    %861 = vector.broadcast %860 : f32 to vector<2x128xf32>
    %862 = arith.mulf %829, %861 : vector<2x128xf32>
    %863 = arith.addf %859, %862 : vector<2x128xf32>
    %c127_i32_278 = arith.constant 127 : i32
    %864 = tpu.dynamic_rotate %829 by %c127_i32_278 dim 1 : vector<2x128xf32>, i32 -> vector<2x128xf32>
    %cst_279 = arith.constant 0.000000e+00 : f32
    %865 = vector.broadcast %cst_279 : f32 to vector<2x128xf32>
    %866 = arith.select %16, %864, %865 : vector<2x128xi1>, vector<2x128xf32>
    %c113 = arith.constant 113 : index
    %867 = memref.load %arg2[%c113] : memref<144xf32, #tpu.memory_space<smem>>
    %868 = vector.broadcast %867 : f32 to vector<2x128xf32>
    %869 = arith.mulf %866, %868 : vector<2x128xf32>
    %870 = arith.addf %863, %869 : vector<2x128xf32>
    %c112_i32_280 = arith.constant 112 : i32
    %871 = tpu.dynamic_rotate %829 by %c112_i32_280 dim 1 : vector<2x128xf32>, i32 -> vector<2x128xf32>
    %c1_i32_281 = arith.constant 1 : i32
    %872 = tpu.dynamic_rotate %871 by %c1_i32_281 dim 0 : vector<2x128xf32>, i32 -> vector<2x128xf32>
    %873 = arith.select %18, %871, %872 : vector<2x128xi1>, vector<2x128xf32>
    %cst_282 = arith.constant 0.000000e+00 : f32
    %874 = vector.broadcast %cst_282 : f32 to vector<2x128xf32>
    %875 = arith.select %12, %873, %874 : vector<2x128xi1>, vector<2x128xf32>
    %c1_i32_283 = arith.constant 1 : i32
    %876 = tpu.dynamic_rotate %875 by %c1_i32_283 dim 1 : vector<2x128xf32>, i32 -> vector<2x128xf32>
    %cst_284 = arith.constant 0.000000e+00 : f32
    %877 = vector.broadcast %cst_284 : f32 to vector<2x128xf32>
    %878 = arith.select %14, %876, %877 : vector<2x128xi1>, vector<2x128xf32>
    %c114 = arith.constant 114 : index
    %879 = memref.load %arg2[%c114] : memref<144xf32, #tpu.memory_space<smem>>
    %880 = vector.broadcast %879 : f32 to vector<2x128xf32>
    %881 = arith.mulf %878, %880 : vector<2x128xf32>
    %882 = arith.addf %870, %881 : vector<2x128xf32>
    %c115 = arith.constant 115 : index
    %883 = memref.load %arg2[%c115] : memref<144xf32, #tpu.memory_space<smem>>
    %884 = vector.broadcast %883 : f32 to vector<2x128xf32>
    %885 = arith.mulf %875, %884 : vector<2x128xf32>
    %886 = arith.addf %882, %885 : vector<2x128xf32>
    %c127_i32_285 = arith.constant 127 : i32
    %887 = tpu.dynamic_rotate %875 by %c127_i32_285 dim 1 : vector<2x128xf32>, i32 -> vector<2x128xf32>
    %cst_286 = arith.constant 0.000000e+00 : f32
    %888 = vector.broadcast %cst_286 : f32 to vector<2x128xf32>
    %889 = arith.select %16, %887, %888 : vector<2x128xi1>, vector<2x128xf32>
    %c116 = arith.constant 116 : index
    %890 = memref.load %arg2[%c116] : memref<144xf32, #tpu.memory_space<smem>>
    %891 = vector.broadcast %890 : f32 to vector<2x128xf32>
    %892 = arith.mulf %889, %891 : vector<2x128xf32>
    %893 = arith.addf %886, %892 : vector<2x128xf32>
    %c0_287 = arith.constant 0 : index
    %c13_288 = arith.constant 13 : index
    %c0_289 = arith.constant 0 : index
    %c0_290 = arith.constant 0 : index
    %894 = vector.load %arg1[%c0_287, %c13_288, %c0_289, %c0_290] : memref<1x16x2x128xf32, #tpu.memory_space<vmem>>, vector<1x1x2x128xf32>
    %895 = vector.shape_cast %894 : vector<1x1x2x128xf32> to vector<1x2x128xf32>
    %896 = vector.shape_cast %895 : vector<1x2x128xf32> to vector<2x128xf32>
    %c16_i32_291 = arith.constant 16 : i32
    %897 = tpu.dynamic_rotate %896 by %c16_i32_291 dim 1 : vector<2x128xf32>, i32 -> vector<2x128xf32>
    %c1_i32_292 = arith.constant 1 : i32
    %898 = tpu.dynamic_rotate %897 by %c1_i32_292 dim 0 : vector<2x128xf32>, i32 -> vector<2x128xf32>
    %899 = arith.select %20, %897, %898 : vector<2x128xi1>, vector<2x128xf32>
    %cst_293 = arith.constant 0.000000e+00 : f32
    %900 = vector.broadcast %cst_293 : f32 to vector<2x128xf32>
    %901 = arith.select %10, %899, %900 : vector<2x128xi1>, vector<2x128xf32>
    %c1_i32_294 = arith.constant 1 : i32
    %902 = tpu.dynamic_rotate %901 by %c1_i32_294 dim 1 : vector<2x128xf32>, i32 -> vector<2x128xf32>
    %cst_295 = arith.constant 0.000000e+00 : f32
    %903 = vector.broadcast %cst_295 : f32 to vector<2x128xf32>
    %904 = arith.select %14, %902, %903 : vector<2x128xi1>, vector<2x128xf32>
    %c117 = arith.constant 117 : index
    %905 = memref.load %arg2[%c117] : memref<144xf32, #tpu.memory_space<smem>>
    %906 = vector.broadcast %905 : f32 to vector<2x128xf32>
    %907 = arith.mulf %904, %906 : vector<2x128xf32>
    %908 = arith.addf %893, %907 : vector<2x128xf32>
    %c118 = arith.constant 118 : index
    %909 = memref.load %arg2[%c118] : memref<144xf32, #tpu.memory_space<smem>>
    %910 = vector.broadcast %909 : f32 to vector<2x128xf32>
    %911 = arith.mulf %901, %910 : vector<2x128xf32>
    %912 = arith.addf %908, %911 : vector<2x128xf32>
    %c127_i32_296 = arith.constant 127 : i32
    %913 = tpu.dynamic_rotate %901 by %c127_i32_296 dim 1 : vector<2x128xf32>, i32 -> vector<2x128xf32>
    %cst_297 = arith.constant 0.000000e+00 : f32
    %914 = vector.broadcast %cst_297 : f32 to vector<2x128xf32>
    %915 = arith.select %16, %913, %914 : vector<2x128xi1>, vector<2x128xf32>
    %c119 = arith.constant 119 : index
    %916 = memref.load %arg2[%c119] : memref<144xf32, #tpu.memory_space<smem>>
    %917 = vector.broadcast %916 : f32 to vector<2x128xf32>
    %918 = arith.mulf %915, %917 : vector<2x128xf32>
    %919 = arith.addf %912, %918 : vector<2x128xf32>
    %c1_i32_298 = arith.constant 1 : i32
    %920 = tpu.dynamic_rotate %896 by %c1_i32_298 dim 1 : vector<2x128xf32>, i32 -> vector<2x128xf32>
    %cst_299 = arith.constant 0.000000e+00 : f32
    %921 = vector.broadcast %cst_299 : f32 to vector<2x128xf32>
    %922 = arith.select %14, %920, %921 : vector<2x128xi1>, vector<2x128xf32>
    %c120 = arith.constant 120 : index
    %923 = memref.load %arg2[%c120] : memref<144xf32, #tpu.memory_space<smem>>
    %924 = vector.broadcast %923 : f32 to vector<2x128xf32>
    %925 = arith.mulf %922, %924 : vector<2x128xf32>
    %926 = arith.addf %919, %925 : vector<2x128xf32>
    %c121 = arith.constant 121 : index
    %927 = memref.load %arg2[%c121] : memref<144xf32, #tpu.memory_space<smem>>
    %928 = vector.broadcast %927 : f32 to vector<2x128xf32>
    %929 = arith.mulf %896, %928 : vector<2x128xf32>
    %930 = arith.addf %926, %929 : vector<2x128xf32>
    %c127_i32_300 = arith.constant 127 : i32
    %931 = tpu.dynamic_rotate %896 by %c127_i32_300 dim 1 : vector<2x128xf32>, i32 -> vector<2x128xf32>
    %cst_301 = arith.constant 0.000000e+00 : f32
    %932 = vector.broadcast %cst_301 : f32 to vector<2x128xf32>
    %933 = arith.select %16, %931, %932 : vector<2x128xi1>, vector<2x128xf32>
    %c122 = arith.constant 122 : index
    %934 = memref.load %arg2[%c122] : memref<144xf32, #tpu.memory_space<smem>>
    %935 = vector.broadcast %934 : f32 to vector<2x128xf32>
    %936 = arith.mulf %933, %935 : vector<2x128xf32>
    %937 = arith.addf %930, %936 : vector<2x128xf32>
    %c112_i32_302 = arith.constant 112 : i32
    %938 = tpu.dynamic_rotate %896 by %c112_i32_302 dim 1 : vector<2x128xf32>, i32 -> vector<2x128xf32>
    %c1_i32_303 = arith.constant 1 : i32
    %939 = tpu.dynamic_rotate %938 by %c1_i32_303 dim 0 : vector<2x128xf32>, i32 -> vector<2x128xf32>
    %940 = arith.select %18, %938, %939 : vector<2x128xi1>, vector<2x128xf32>
    %cst_304 = arith.constant 0.000000e+00 : f32
    %941 = vector.broadcast %cst_304 : f32 to vector<2x128xf32>
    %942 = arith.select %12, %940, %941 : vector<2x128xi1>, vector<2x128xf32>
    %c1_i32_305 = arith.constant 1 : i32
    %943 = tpu.dynamic_rotate %942 by %c1_i32_305 dim 1 : vector<2x128xf32>, i32 -> vector<2x128xf32>
    %cst_306 = arith.constant 0.000000e+00 : f32
    %944 = vector.broadcast %cst_306 : f32 to vector<2x128xf32>
    %945 = arith.select %14, %943, %944 : vector<2x128xi1>, vector<2x128xf32>
    %c123 = arith.constant 123 : index
    %946 = memref.load %arg2[%c123] : memref<144xf32, #tpu.memory_space<smem>>
    %947 = vector.broadcast %946 : f32 to vector<2x128xf32>
    %948 = arith.mulf %945, %947 : vector<2x128xf32>
    %949 = arith.addf %937, %948 : vector<2x128xf32>
    %c124 = arith.constant 124 : index
    %950 = memref.load %arg2[%c124] : memref<144xf32, #tpu.memory_space<smem>>
    %951 = vector.broadcast %950 : f32 to vector<2x128xf32>
    %952 = arith.mulf %942, %951 : vector<2x128xf32>
    %953 = arith.addf %949, %952 : vector<2x128xf32>
    %c127_i32_307 = arith.constant 127 : i32
    %954 = tpu.dynamic_rotate %942 by %c127_i32_307 dim 1 : vector<2x128xf32>, i32 -> vector<2x128xf32>
    %cst_308 = arith.constant 0.000000e+00 : f32
    %955 = vector.broadcast %cst_308 : f32 to vector<2x128xf32>
    %956 = arith.select %16, %954, %955 : vector<2x128xi1>, vector<2x128xf32>
    %c125 = arith.constant 125 : index
    %957 = memref.load %arg2[%c125] : memref<144xf32, #tpu.memory_space<smem>>
    %958 = vector.broadcast %957 : f32 to vector<2x128xf32>
    %959 = arith.mulf %956, %958 : vector<2x128xf32>
    %960 = arith.addf %953, %959 : vector<2x128xf32>
    %c0_309 = arith.constant 0 : index
    %c14_310 = arith.constant 14 : index
    %c0_311 = arith.constant 0 : index
    %c0_312 = arith.constant 0 : index
    %961 = vector.load %arg1[%c0_309, %c14_310, %c0_311, %c0_312] : memref<1x16x2x128xf32, #tpu.memory_space<vmem>>, vector<1x1x2x128xf32>
    %962 = vector.shape_cast %961 : vector<1x1x2x128xf32> to vector<1x2x128xf32>
    %963 = vector.shape_cast %962 : vector<1x2x128xf32> to vector<2x128xf32>
    %c16_i32_313 = arith.constant 16 : i32
    %964 = tpu.dynamic_rotate %963 by %c16_i32_313 dim 1 : vector<2x128xf32>, i32 -> vector<2x128xf32>
    %c1_i32_314 = arith.constant 1 : i32
    %965 = tpu.dynamic_rotate %964 by %c1_i32_314 dim 0 : vector<2x128xf32>, i32 -> vector<2x128xf32>
    %966 = arith.select %20, %964, %965 : vector<2x128xi1>, vector<2x128xf32>
    %cst_315 = arith.constant 0.000000e+00 : f32
    %967 = vector.broadcast %cst_315 : f32 to vector<2x128xf32>
    %968 = arith.select %10, %966, %967 : vector<2x128xi1>, vector<2x128xf32>
    %c1_i32_316 = arith.constant 1 : i32
    %969 = tpu.dynamic_rotate %968 by %c1_i32_316 dim 1 : vector<2x128xf32>, i32 -> vector<2x128xf32>
    %cst_317 = arith.constant 0.000000e+00 : f32
    %970 = vector.broadcast %cst_317 : f32 to vector<2x128xf32>
    %971 = arith.select %14, %969, %970 : vector<2x128xi1>, vector<2x128xf32>
    %c126 = arith.constant 126 : index
    %972 = memref.load %arg2[%c126] : memref<144xf32, #tpu.memory_space<smem>>
    %973 = vector.broadcast %972 : f32 to vector<2x128xf32>
    %974 = arith.mulf %971, %973 : vector<2x128xf32>
    %975 = arith.addf %960, %974 : vector<2x128xf32>
    %c127 = arith.constant 127 : index
    %976 = memref.load %arg2[%c127] : memref<144xf32, #tpu.memory_space<smem>>
    %977 = vector.broadcast %976 : f32 to vector<2x128xf32>
    %978 = arith.mulf %968, %977 : vector<2x128xf32>
    %979 = arith.addf %975, %978 : vector<2x128xf32>
    %c127_i32_318 = arith.constant 127 : i32
    %980 = tpu.dynamic_rotate %968 by %c127_i32_318 dim 1 : vector<2x128xf32>, i32 -> vector<2x128xf32>
    %cst_319 = arith.constant 0.000000e+00 : f32
    %981 = vector.broadcast %cst_319 : f32 to vector<2x128xf32>
    %982 = arith.select %16, %980, %981 : vector<2x128xi1>, vector<2x128xf32>
    %c128 = arith.constant 128 : index
    %983 = memref.load %arg2[%c128] : memref<144xf32, #tpu.memory_space<smem>>
    %984 = vector.broadcast %983 : f32 to vector<2x128xf32>
    %985 = arith.mulf %982, %984 : vector<2x128xf32>
    %986 = arith.addf %979, %985 : vector<2x128xf32>
    %c1_i32_320 = arith.constant 1 : i32
    %987 = tpu.dynamic_rotate %963 by %c1_i32_320 dim 1 : vector<2x128xf32>, i32 -> vector<2x128xf32>
    %cst_321 = arith.constant 0.000000e+00 : f32
    %988 = vector.broadcast %cst_321 : f32 to vector<2x128xf32>
    %989 = arith.select %14, %987, %988 : vector<2x128xi1>, vector<2x128xf32>
    %c129 = arith.constant 129 : index
    %990 = memref.load %arg2[%c129] : memref<144xf32, #tpu.memory_space<smem>>
    %991 = vector.broadcast %990 : f32 to vector<2x128xf32>
    %992 = arith.mulf %989, %991 : vector<2x128xf32>
    %993 = arith.addf %986, %992 : vector<2x128xf32>
    %c130 = arith.constant 130 : index
    %994 = memref.load %arg2[%c130] : memref<144xf32, #tpu.memory_space<smem>>
    %995 = vector.broadcast %994 : f32 to vector<2x128xf32>
    %996 = arith.mulf %963, %995 : vector<2x128xf32>
    %997 = arith.addf %993, %996 : vector<2x128xf32>
    %c127_i32_322 = arith.constant 127 : i32
    %998 = tpu.dynamic_rotate %963 by %c127_i32_322 dim 1 : vector<2x128xf32>, i32 -> vector<2x128xf32>
    %cst_323 = arith.constant 0.000000e+00 : f32
    %999 = vector.broadcast %cst_323 : f32 to vector<2x128xf32>
    %1000 = arith.select %16, %998, %999 : vector<2x128xi1>, vector<2x128xf32>
    %c131 = arith.constant 131 : index
    %1001 = memref.load %arg2[%c131] : memref<144xf32, #tpu.memory_space<smem>>
    %1002 = vector.broadcast %1001 : f32 to vector<2x128xf32>
    %1003 = arith.mulf %1000, %1002 : vector<2x128xf32>
    %1004 = arith.addf %997, %1003 : vector<2x128xf32>
    %c112_i32_324 = arith.constant 112 : i32
    %1005 = tpu.dynamic_rotate %963 by %c112_i32_324 dim 1 : vector<2x128xf32>, i32 -> vector<2x128xf32>
    %c1_i32_325 = arith.constant 1 : i32
    %1006 = tpu.dynamic_rotate %1005 by %c1_i32_325 dim 0 : vector<2x128xf32>, i32 -> vector<2x128xf32>
    %1007 = arith.select %18, %1005, %1006 : vector<2x128xi1>, vector<2x128xf32>
    %cst_326 = arith.constant 0.000000e+00 : f32
    %1008 = vector.broadcast %cst_326 : f32 to vector<2x128xf32>
    %1009 = arith.select %12, %1007, %1008 : vector<2x128xi1>, vector<2x128xf32>
    %c1_i32_327 = arith.constant 1 : i32
    %1010 = tpu.dynamic_rotate %1009 by %c1_i32_327 dim 1 : vector<2x128xf32>, i32 -> vector<2x128xf32>
    %cst_328 = arith.constant 0.000000e+00 : f32
    %1011 = vector.broadcast %cst_328 : f32 to vector<2x128xf32>
    %1012 = arith.select %14, %1010, %1011 : vector<2x128xi1>, vector<2x128xf32>
    %c132 = arith.constant 132 : index
    %1013 = memref.load %arg2[%c132] : memref<144xf32, #tpu.memory_space<smem>>
    %1014 = vector.broadcast %1013 : f32 to vector<2x128xf32>
    %1015 = arith.mulf %1012, %1014 : vector<2x128xf32>
    %1016 = arith.addf %1004, %1015 : vector<2x128xf32>
    %c133 = arith.constant 133 : index
    %1017 = memref.load %arg2[%c133] : memref<144xf32, #tpu.memory_space<smem>>
    %1018 = vector.broadcast %1017 : f32 to vector<2x128xf32>
    %1019 = arith.mulf %1009, %1018 : vector<2x128xf32>
    %1020 = arith.addf %1016, %1019 : vector<2x128xf32>
    %c127_i32_329 = arith.constant 127 : i32
    %1021 = tpu.dynamic_rotate %1009 by %c127_i32_329 dim 1 : vector<2x128xf32>, i32 -> vector<2x128xf32>
    %cst_330 = arith.constant 0.000000e+00 : f32
    %1022 = vector.broadcast %cst_330 : f32 to vector<2x128xf32>
    %1023 = arith.select %16, %1021, %1022 : vector<2x128xi1>, vector<2x128xf32>
    %c134 = arith.constant 134 : index
    %1024 = memref.load %arg2[%c134] : memref<144xf32, #tpu.memory_space<smem>>
    %1025 = vector.broadcast %1024 : f32 to vector<2x128xf32>
    %1026 = arith.mulf %1023, %1025 : vector<2x128xf32>
    %1027 = arith.addf %1020, %1026 : vector<2x128xf32>
    %c0_331 = arith.constant 0 : index
    %c15_332 = arith.constant 15 : index
    %c0_333 = arith.constant 0 : index
    %c0_334 = arith.constant 0 : index
    %1028 = vector.load %arg1[%c0_331, %c15_332, %c0_333, %c0_334] : memref<1x16x2x128xf32, #tpu.memory_space<vmem>>, vector<1x1x2x128xf32>
    %1029 = vector.shape_cast %1028 : vector<1x1x2x128xf32> to vector<1x2x128xf32>
    %1030 = vector.shape_cast %1029 : vector<1x2x128xf32> to vector<2x128xf32>
    %c16_i32_335 = arith.constant 16 : i32
    %1031 = tpu.dynamic_rotate %1030 by %c16_i32_335 dim 1 : vector<2x128xf32>, i32 -> vector<2x128xf32>
    %c1_i32_336 = arith.constant 1 : i32
    %1032 = tpu.dynamic_rotate %1031 by %c1_i32_336 dim 0 : vector<2x128xf32>, i32 -> vector<2x128xf32>
    %1033 = arith.select %20, %1031, %1032 : vector<2x128xi1>, vector<2x128xf32>
    %cst_337 = arith.constant 0.000000e+00 : f32
    %1034 = vector.broadcast %cst_337 : f32 to vector<2x128xf32>
    %1035 = arith.select %10, %1033, %1034 : vector<2x128xi1>, vector<2x128xf32>
    %c1_i32_338 = arith.constant 1 : i32
    %1036 = tpu.dynamic_rotate %1035 by %c1_i32_338 dim 1 : vector<2x128xf32>, i32 -> vector<2x128xf32>
    %cst_339 = arith.constant 0.000000e+00 : f32
    %1037 = vector.broadcast %cst_339 : f32 to vector<2x128xf32>
    %1038 = arith.select %14, %1036, %1037 : vector<2x128xi1>, vector<2x128xf32>
    %c135 = arith.constant 135 : index
    %1039 = memref.load %arg2[%c135] : memref<144xf32, #tpu.memory_space<smem>>
    %1040 = vector.broadcast %1039 : f32 to vector<2x128xf32>
    %1041 = arith.mulf %1038, %1040 : vector<2x128xf32>
    %1042 = arith.addf %1027, %1041 : vector<2x128xf32>
    %c136 = arith.constant 136 : index
    %1043 = memref.load %arg2[%c136] : memref<144xf32, #tpu.memory_space<smem>>
    %1044 = vector.broadcast %1043 : f32 to vector<2x128xf32>
    %1045 = arith.mulf %1035, %1044 : vector<2x128xf32>
    %1046 = arith.addf %1042, %1045 : vector<2x128xf32>
    %c127_i32_340 = arith.constant 127 : i32
    %1047 = tpu.dynamic_rotate %1035 by %c127_i32_340 dim 1 : vector<2x128xf32>, i32 -> vector<2x128xf32>
    %cst_341 = arith.constant 0.000000e+00 : f32
    %1048 = vector.broadcast %cst_341 : f32 to vector<2x128xf32>
    %1049 = arith.select %16, %1047, %1048 : vector<2x128xi1>, vector<2x128xf32>
    %c137 = arith.constant 137 : index
    %1050 = memref.load %arg2[%c137] : memref<144xf32, #tpu.memory_space<smem>>
    %1051 = vector.broadcast %1050 : f32 to vector<2x128xf32>
    %1052 = arith.mulf %1049, %1051 : vector<2x128xf32>
    %1053 = arith.addf %1046, %1052 : vector<2x128xf32>
    %c1_i32_342 = arith.constant 1 : i32
    %1054 = tpu.dynamic_rotate %1030 by %c1_i32_342 dim 1 : vector<2x128xf32>, i32 -> vector<2x128xf32>
    %cst_343 = arith.constant 0.000000e+00 : f32
    %1055 = vector.broadcast %cst_343 : f32 to vector<2x128xf32>
    %1056 = arith.select %14, %1054, %1055 : vector<2x128xi1>, vector<2x128xf32>
    %c138 = arith.constant 138 : index
    %1057 = memref.load %arg2[%c138] : memref<144xf32, #tpu.memory_space<smem>>
    %1058 = vector.broadcast %1057 : f32 to vector<2x128xf32>
    %1059 = arith.mulf %1056, %1058 : vector<2x128xf32>
    %1060 = arith.addf %1053, %1059 : vector<2x128xf32>
    %c139 = arith.constant 139 : index
    %1061 = memref.load %arg2[%c139] : memref<144xf32, #tpu.memory_space<smem>>
    %1062 = vector.broadcast %1061 : f32 to vector<2x128xf32>
    %1063 = arith.mulf %1030, %1062 : vector<2x128xf32>
    %1064 = arith.addf %1060, %1063 : vector<2x128xf32>
    %c127_i32_344 = arith.constant 127 : i32
    %1065 = tpu.dynamic_rotate %1030 by %c127_i32_344 dim 1 : vector<2x128xf32>, i32 -> vector<2x128xf32>
    %cst_345 = arith.constant 0.000000e+00 : f32
    %1066 = vector.broadcast %cst_345 : f32 to vector<2x128xf32>
    %1067 = arith.select %16, %1065, %1066 : vector<2x128xi1>, vector<2x128xf32>
    %c140 = arith.constant 140 : index
    %1068 = memref.load %arg2[%c140] : memref<144xf32, #tpu.memory_space<smem>>
    %1069 = vector.broadcast %1068 : f32 to vector<2x128xf32>
    %1070 = arith.mulf %1067, %1069 : vector<2x128xf32>
    %1071 = arith.addf %1064, %1070 : vector<2x128xf32>
    %c112_i32_346 = arith.constant 112 : i32
    %1072 = tpu.dynamic_rotate %1030 by %c112_i32_346 dim 1 : vector<2x128xf32>, i32 -> vector<2x128xf32>
    %c1_i32_347 = arith.constant 1 : i32
    %1073 = tpu.dynamic_rotate %1072 by %c1_i32_347 dim 0 : vector<2x128xf32>, i32 -> vector<2x128xf32>
    %1074 = arith.select %18, %1072, %1073 : vector<2x128xi1>, vector<2x128xf32>
    %cst_348 = arith.constant 0.000000e+00 : f32
    %1075 = vector.broadcast %cst_348 : f32 to vector<2x128xf32>
    %1076 = arith.select %12, %1074, %1075 : vector<2x128xi1>, vector<2x128xf32>
    %c1_i32_349 = arith.constant 1 : i32
    %1077 = tpu.dynamic_rotate %1076 by %c1_i32_349 dim 1 : vector<2x128xf32>, i32 -> vector<2x128xf32>
    %cst_350 = arith.constant 0.000000e+00 : f32
    %1078 = vector.broadcast %cst_350 : f32 to vector<2x128xf32>
    %1079 = arith.select %14, %1077, %1078 : vector<2x128xi1>, vector<2x128xf32>
    %c141 = arith.constant 141 : index
    %1080 = memref.load %arg2[%c141] : memref<144xf32, #tpu.memory_space<smem>>
    %1081 = vector.broadcast %1080 : f32 to vector<2x128xf32>
    %1082 = arith.mulf %1079, %1081 : vector<2x128xf32>
    %1083 = arith.addf %1071, %1082 : vector<2x128xf32>
    %c142 = arith.constant 142 : index
    %1084 = memref.load %arg2[%c142] : memref<144xf32, #tpu.memory_space<smem>>
    %1085 = vector.broadcast %1084 : f32 to vector<2x128xf32>
    %1086 = arith.mulf %1076, %1085 : vector<2x128xf32>
    %1087 = arith.addf %1083, %1086 : vector<2x128xf32>
    %c127_i32_351 = arith.constant 127 : i32
    %1088 = tpu.dynamic_rotate %1076 by %c127_i32_351 dim 1 : vector<2x128xf32>, i32 -> vector<2x128xf32>
    %cst_352 = arith.constant 0.000000e+00 : f32
    %1089 = vector.broadcast %cst_352 : f32 to vector<2x128xf32>
    %1090 = arith.select %16, %1088, %1089 : vector<2x128xi1>, vector<2x128xf32>
    %c143 = arith.constant 143 : index
    %1091 = memref.load %arg2[%c143] : memref<144xf32, #tpu.memory_space<smem>>
    %1092 = vector.broadcast %1091 : f32 to vector<2x128xf32>
    %1093 = arith.mulf %1090, %1092 : vector<2x128xf32>
    %1094 = arith.addf %1087, %1093 : vector<2x128xf32>
    %1095 = vector.shape_cast %1094 : vector<2x128xf32> to vector<1x2x128xf32>
    %c0_353 = arith.constant 0 : index
    %c0_354 = arith.constant 0 : index
    %c0_355 = arith.constant 0 : index
    %1096 = vector.load %arg4[%c0_353, %c0_354, %c0_355] : memref<1x2x128xf32, #tpu.memory_space<vmem>>, vector<1x2x128xf32>
    tpu.vector_store %arg4[%c0_353, %c0_354, %c0_355], %1095 {strides = array<i32>} : memref<1x2x128xf32, #tpu.memory_space<vmem>>, vector<1x2x128xf32>,
    return
  }
  func.func @transform_0(%arg0: i32) -> (i32, i32, i32, i32) {
    %c0_i32 = arith.constant 0 : i32
    %c0_i32_0 = arith.constant 0 : i32
    %c0_i32_1 = arith.constant 0 : i32
    %c0_i32_2 = arith.constant 0 : i32
    return %arg0, %c0_i32, %c0_i32_0, %c0_i32_1 : i32, i32, i32, i32
  }
  func.func @transform_1(%arg0: i32) -> i32 {
    %c0_i32 = arith.constant 0 : i32
    %c0_i32_0 = arith.constant 0 : i32
    return %c0_i32 : i32
  }
  func.func @transform_2(%arg0: i32) -> i32 {
    %c0_i32 = arith.constant 0 : i32
    %c0_i32_0 = arith.constant 0 : i32
    return %c0_i32 : i32
  }
  func.func @transform_3(%arg0: i32) -> (i32, i32, i32) {
    %c0_i32 = arith.constant 0 : i32
    %c0_i32_0 = arith.constant 0 : i32
    %c0_i32_1 = arith.constant 0 : i32
    return %arg0, %c0_i32, %c0_i32_0 : i32, i32, i32
  }
}

</mosaic_0001>

<bundles_post_ra>
// kernel: tpu_custom_call.1
= control target key start
LH: loop header
LB: loop body
LE: loop exit
PB: predicated region body
PF: predicated region fallthrough
CT: control target
= control target key end

     0   :  { %s3255_s0 = inlined_call_operand.hbm [shape: f32[2,16,2,128], index: 0, kind: input, shape index: {}]   ;;  %s3256_s1 = inlined_call_operand.vmem [shape: f32[144], index: 1, kind: input, shape index: {}]   ;;  %s3257_s2 = inlined_call_operand.<no memory space> [shape: f32[1], index: 2, kind: input, shape index: {}]   ;;  %s3258_s3 = inlined_call_operand.hbm [shape: f32[2,2,128], index: 3, kind: output, shape index: {}]  }
   0x1   :  { %8 = sst [smem:[#allocation2]] %s3257_s2 }
   0x2   :  { %9 = vsyncpa [#allocation4], 0 }
   0x3   :  { %11 = vsyncpa [#allocation4 + $0x1], 0 }
   0x4   :  { %12 = vsyncpa [#allocation6], 0 }
   0x5   :  { %13 = vsyncpa [#allocation5], 0 }
   0x6   :  { %15 = vsyncpa [#allocation5 + $0x1], 0  ;;  %s1954_s14 = smov 0   ;;  %s1956_s15 = smov 0  }
   0x7   :  { %s1958_s16 = smov 0   ;;  %s1960_s17 = smov 0  }
   0x8 LB: > { %s1975_s2 = sadd.s32 4294967295, %s1920_s17   ;;  %s1565_s18 = sadd.s32 4294967294, %s1920_s17   ;;  %s1920_s17 = sphi %s1960_s17, %s3288_s17   ;;  %s1916_s16 = sphi %s1958_s16, %s3287_s16   ;;  %s1912_s15 = sphi %s1956_s15, %s3286_s15   ;;  %s1908_s14 = sphi %s1954_s14, %s3285_s14  }
   0x9   : > { %s1979_s19 = sadd.s32 1, %s1920_s17   ;;  %s28_s20 = sadd.s32 1, %s1916_s16 }
   0xa   : > { %s25_s21 = ssub.s32 %s1920_s17, %s1979_s19  ;;  %p35_p0 = scmp.ne.s32.totalorder %s1916_s16, %s1912_s15 }
   0xb   : > { %p26_p1 = scmp.eq.s32.totalorder %s25_s21, 0  ;;  %p36_p2 = scmp.eq.s32.totalorder %s1920_s17, 0 }
   0xc   : > { %p41_p3 = scmp.ne.s32.totalorder %s1912_s15, %s1908_s14  ;;  %p3260_p4 = scmp.eq.s32.totalorder %s1975_s2, 0 }
   0xd   : > { %s1991_s22 = scalar_select %p26_p1, %s1916_s16, %s28_s20  }
   0xe   : > { %p1993_p5 = por %p36_p2, %p35_p0  ;;  %p1999_p6 = por %p3260_p4, %p41_p3 }
   0xf   : > { %p107_p7 = scmp.eq.s32.totalorder %s1975_s2, 1  ;;  %p113_p8 = scmp.eq.s32.totalorder %s1565_s18, 1 }
  0x10   : > { %s3264_s24 = scalar_select %p1999_p6, 1, 0 }
  0x11   : > { %p1566_p9 = scmp.ge.s32.totalorder %s1920_s17, 1  ;;  %p120_p10 = scmp.lt.s32.totalorder %s1920_s17, 3 }
  0x12   : > { %p2006_p11 = por %p107_p7, %p35_p0  ;;  %p2010_p12 = por %p113_p8, %p41_p3 }
  0x13   : > { %p2014_p13 = pnand %p1566_p9, %p120_p10  ;;  %s133_s30 = sshll.u32 %s3256_s1, 4  ;;  %s134_s30 = int_to_ptr.vmem [resolvable:$true] %s133_s30 }
  0x14   : > { %s3265_s25 = scalar_select %p2006_p11, 1, 0 }
  0x15   : > { %s3266_s26 = scalar_select %p2010_p12, 1, 0 }
  0x16   : > { %s3267_s27 = scalar_select %p2014_p13, 1, 0 }
  0x17   : > { %p1747_p1 = pneg %p2014_p13  ;;  %p1760_p2 = scmp.lt.s32.totalorder %s1920_s17, 2 }
  0x18   : > { %s147_s5 = sand.u32 1, %s1916_s16   ;;  %s1809_s8 = scalar_lea.vmem %s134_s30, 32 }
  0x19   : > { %p2027_p7 = pnand %p1747_p1, %p3260_p4  ;;  %p2034_p3 = pnand %p1760_p2, %p1993_p5 }
  0x1a   : > { %s1569_s7 = sshll.u32 %s147_s5, 5  ;;  %p1810_p8 = scmp.ne.s32.totalorder %s134_s30, %s1809_s8 }
  0x1b   : > { %p1811_p9 = pneg %p2027_p7  ;;  %p1817_p12 = scmp.lt.s32.totalorder %s134_s30, %s134_s30 }
  0x1c   : > { %p1818_p11 = scmp.lt.s32.totalorder %s1809_s8, %s1809_s8 }
  0x1d   : > { %p1812_p10 = pnand %p1811_p9, %p1810_p8 }
  0x1e   : > { %p1819_p1 = por %p1818_p11, %p1817_p12 }
  0x1f   : > { %p1813_p0 = pneg %p1812_p10 }
  0x21   : > { %p1820_p4 = pnand %p1819_p1, %p1813_p0 }
  0x23   : > { %1823 = shalt.err (!%p1820_p4)
}
  0x24   : > { %s1922_s9 = smov [#allocation7]   ;;  %s1738_s10 = sshll.u32 %s1920_s17, 9 }
  0x25   : > { %1750 = dma.vmem_to_smem (!%p2027_p7), %s134_s30, 32, %s1922_s9, [#allocation6]  }
  0x26   : > { %s151_s11 = scalar_lea.vmem [#allocation3], %s1569_s7  ;;  %s2046_s20 = scalar_lea.hbm %s3255_s0, %s1738_s10 }
  0x27   : > { %s158_s12 = sshll.u32 %s151_s11, 4  ;;  %s2050_s21 = scalar_lea.sflag [#allocation4], %s147_s5  ;;  %s2048_s12 = int_to_ptr.vmem [resolvable:$true] %s158_s12 }
  0x28   : > { %s1824_s23 = scalar_lea.hbm %s2046_s20, 512  ;;  %p1826_p5 = pneg %p2034_p3 }
  0x29   : > { %p1825_p4 = scmp.ne.s32.totalorder %s2046_s20, %s1824_s23  ;;  %s1829_s30 = scalar_lea.hbm %s3255_s0, 1024 }
  0x2a   : > { %p1830_p0 = scmp.lt.s32.totalorder %s2046_s20, %s3255_s0  ;;  %p1831_p2 = scmp.lt.s32.totalorder %s1829_s30, %s1824_s23 }
  0x2b   : > { %p1827_p11 = pnand %p1826_p5, %p1825_p4 }
  0x2c   : > { %p1832_p7 = por %p1831_p2, %p1830_p0 }
  0x2d   : > { %p1828_p12 = pneg %p1827_p11 }
  0x2f   : > { %p1833_p8 = pnand %p1832_p7, %p1828_p12 }
  0x31   : > { %1836 = shalt.err (!%p1833_p8)
}
  0x32   : > { %s1837_s5 = scalar_lea.vmem %s2048_s12, 512  ;;  %s1923_s8 = smov [#allocation3]  }
  0x33   : > { %p1838_p9 = scmp.ne.s32.totalorder %s2048_s12, %s1837_s5  ;;  %s1842_s9 = sshll.u32 %s1923_s8, 4  ;;  %s1843_s9 = int_to_ptr.vmem [resolvable:$false] %s1842_s9 }
  0x34   : > { %s1844_s10 = scalar_lea.vmem %s1843_s9, 1024  ;;  %p1845_p4 = scmp.lt.s32.totalorder %s2048_s12, %s1843_s9 }
  0x35   : > { %p1840_p10 = pnand %p1838_p9, %p1826_p5  ;;  %p1846_p11 = scmp.lt.s32.totalorder %s1844_s10, %s1837_s5 }
  0x37   : > { %p1841_p1 = pneg %p1840_p10  ;;  %p1847_p6 = por %p1846_p11, %p1845_p4 }
  0x39   : > { %p1848_p13 = pnand %p1847_p6, %p1841_p1 }
  0x3b   : > { %1851 = shalt.err (!%p1848_p13)
}
  0x3c   : > { %s1924_s11 = smov 32   ;;  %s1925_s13 = smov 2  }
  0x3d   : > { %1754 = dma.hbm_to_vmem [thread:$0]  (!%p2034_p3), %s2046_s20, 512, %s2048_s12, %s2050_s21, %s1924_s11, %s1924_s11, %s1925_s13  }
  0x3e   : > { %p3270_p5 = scmp.ne.s32.totalorder %s3267_s27, 0 }
  0x3f   : > { %s2074_s18 = sand.u32 (!%p3270_p5), 1, %s1912_s15   ;;  %p3271_p6 = scmp.ne.s32.totalorder (!%p3270_p5), %s3264_s24, 0 }
  0x40   : > { %170 = sbr.rel (%p3270_p5) target bundleno = 792 (0x318), region = 32  ;;  %s1573_s23 = sshll.u32 (!%p3270_p5), %s2074_s18, 5 }
  0x41   : > { %s173_s28 = scalar_lea.sflag (!%p3270_p5), [#allocation4], %s2074_s18  ;;  %s2078_s29 = scalar_lea.vmem (!%p3270_p5), [#allocation3], %s1573_s23 }
  0x45   : > { %1895 = dma.done.wait (%p3271_p6), %s173_s28, 512  }
  0x46   : > { %1897 = vsyncadd (%p3271_p6), %s173_s28, 4294966784  ;;  %p3272_p13 = scmp.eq.s32.totalorder %s1975_s2, 0 }
  0x48   : > { %1899 = dma.done.wait (%p3272_p13), [#allocation6], 32   ;;  %p3273_p3 = pmov %p3272_p13 }
  0x4a   : > { %1901 = vsyncadd (%p3273_p3), [#allocation6], 4294967264 }
  0x4b   : > { %185 = sfence }
  0x4c   : > { %v2089_v0 = vld [vmem:[%s2078_s29] sm:$0x3]  ;;  %v2092_v1 = vld [vmem:[%s2078_s29 + $0x2] sm:$0x3]  ;;  %s1926_s27 = smov 16   ;;  %s1927_s24 = smov 112   ;;  %v204_v4 = vlaneseq }
  0x4d   : > { %221 = vrot.lane.b32.xlu0 %v2089_v0, %s1926_s27  ;;  %300 = vrot.lane.b32.xlu1 %v2092_v1, %s1926_s27  ;;  %v2103_v2 = vld [vmem:[%s2078_s29 + $0x4] sm:$0x3]  ;;  %v2110_v3 = vld [vmem:[%s2078_s29 + $0x6] sm:$0x3]  ;;  %vm223_vm0 = vcmask 1047554   ;;  %s1928_s6 = smov 127  }
  0x4e   : > { %v207_v5 = vshrl.u32 %v204_v4, 7  ;;  %v2116_v6 = vand.u32 127, %v204_v4  ;;  %s1929_s12 = smov 1   ;;  %v2140_v30 = vld [vmem:[%s2078_s29 + $0x8] sm:$0x3]  ;;  %s236_s20 = sld [smem:[#allocation7]] }
  0x4f   : > { %v2180_v49 = vld [vmem:[%s2078_s29 + $0xa] sm:$0x3]  ;;  %s1576_s21 = sld [smem:[#allocation7 + $0x1]]  ;;  %p3282_p0 = scmp.ne.s32.totalorder %s3265_s25, 0 }
  0x50   : > { %v208_v7 = vmul.u32 128, %v207_v5  ;;  %vm217_vm1 = vcmp.ge.s32.totalorder %v2116_v6, 16  ;;  %vm216_vm3 = vcmp.lt.s32.totalorder %v2116_v6, 112  ;;  %s218_s30 = sld [smem:[#allocation2]] }
  0x51   : > { %269 = vrot.lane.b32.xlu0 %v2089_v0, %s1927_s24  ;;  %347 = vrot.lane.b32.xlu1 %v2092_v1, %s1927_s24  ;;  %s1577_s4 = sld [smem:[#allocation7 + $0x2]] }
  0x52   : > { %v209_v8 = vadd.s32 %v208_v7, %v2116_v6  ;;  %v2215_v7 = vld [vmem:[%s2078_s29 + $0xc] sm:$0x3]  ;;  %s1578_s7 = sld [smem:[#allocation7 + $0x3]] }
  0x53   : > { %s2270_s5 = sld [smem:[#allocation7 + $0x4]] }
  0x54   : > { %v210_v13 = vshra.s32 %v209_v8, 4  ;;  %s2276_s8 = sld [smem:[#allocation7 + $0x5]] }
  0x55   : > { %378 = vrot.lane.b32.xlu0 %v2103_v2, %s1926_s27  ;;  %425 = vrot.lane.b32.xlu1 %v2103_v2, %s1927_s24  ;;  %s2286_s9 = sld [smem:[#allocation7 + $0x6]] }
  0x56   : > { %vm2123_vm2 = vcmp.ge.s32.totalorder %v210_v13, 1  ;;  %vm2147_vm4 = vcmp.le.s32.totalorder %v210_v13, 14  ;;  %s2289_s10 = sld [smem:[#allocation7 + $0x7]] }
  0x57   : > { %s2296_s11 = sld [smem:[#allocation7 + $0x8]] }
  0x58   : > { %s2301_s13 = sld [smem:[#allocation7 + $0x9]] }
  0x59   : > { %456 = vrot.lane.b32.xlu0 %v2110_v3, %s1926_s27  ;;  %503 = vrot.lane.b32.xlu1 %v2110_v3, %s1927_s24  ;;  %s2303_s23 = sld [smem:[#allocation7 + $0xa]] }
  0x5a   : > { %s2309_s28 = sld [smem:[#allocation7 + $0xb]] }
  0xbf   : > { %v222_v9 = vpop.permute.xlu0 %221  ;;  %v301_v11 = vpop.permute.xlu1 %300 }
  0xc0   : > { %v224_v10 = vrot.slane %v222_v9, 6  ;;  %v302_v17 = vrot.slane %v301_v11, 6 }
  0xc2   : > { %v225_v12 = vsel %vm223_vm0, %v224_v10, %v222_v9  ;;  %v303_v23 = vsel %vm223_vm0, %v302_v17, %v301_v11 }
  0xc3   : > { %v226_v14 = vrot.slane %v225_v12, 6  ;;  %v270_v15 = vpop.permute.xlu0 %269  ;;  %v348_v27 = vpop.permute.xlu1 %347  ;;  %v304_v29 = vrot.slane %v303_v23, 6 }
  0xc4   : > { %v271_v16 = vrot.slane %v270_v15, 6  ;;  %v349_v31 = vrot.slane %v348_v27, 6 }
  0xc5   : > { %v227_v18 = vsel %vm223_vm0, %v226_v14, %v222_v9  ;;  %v305_v34 = vsel %vm223_vm0, %v304_v29, %v301_v11  ;;  %v241_v29 = vstv %s1576_s21  ;;  %s2328_s21 = sld [smem:[#allocation7 + $0xd]] }
  0xc6   : > { %v272_v19 = vsel %vm223_vm0, %v271_v16, %v270_v15  ;;  %v229_v21 = vrot.slane %v227_v18, 1  ;;  %v350_v35 = vsel %vm223_vm0, %v349_v31, %v348_v27  ;;  %v307_v38 = vrot.slane %v305_v34, 1  ;;  %v2249_v18 = vld [vmem:[%s2078_s29 + $0xe] sm:$0x3] }
  0xc7   : > { %v273_v22 = vrot.slane %v272_v19, 6  ;;  %v379_v37 = vpop.permute.xlu0 %378  ;;  %v351_v39 = vrot.slane %v350_v35, 6  ;;  %v426_v43 = vpop.permute.xlu1 %425  ;;  %v219_v31 = vstv %s218_s30  ;;  %v248_v35 = vstv %s1577_s4  ;;  %s2337_s30 = sld [smem:[#allocation7 + $0xe]] }
  0xc8   : > { %v231_v24 = vsel %vm217_vm1, %v222_v9, %v229_v21  ;;  %v380_v40 = vrot.slane %v379_v37, 6  ;;  %v309_v41 = vsel %vm217_vm1, %v301_v11, %v307_v38  ;;  %v427_v47 = vrot.slane %v426_v43, 6  ;;  %s2353_s4 = sld [smem:[#allocation7 + $0xf]] }
  0xc9   : > { %v2132_v25 = vsel %vm2123_vm2, %v231_v24, 0.0  ;;  %v274_v26 = vsel %vm223_vm0, %v273_v22, %v270_v15  ;;  %v352_v42 = vsel %vm223_vm0, %v351_v39, %v348_v27  ;;  %v2173_v45 = vsel %vm2123_vm2, %v309_v41, 0.0 }
  0xca   : > { %244 = vrot.lane.b32.xlu1 %v2132_v25, %s1928_s6  ;;  %233 = vrot.lane.b32.xlu0 %v2132_v25, %s1929_s12  ;;  %v276_v28 = vrot.slane %v274_v26, 1  ;;  %v381_v44 = vsel %vm223_vm0, %v380_v40, %v379_v37  ;;  %v354_v46 = vrot.slane %v352_v42, 1  ;;  %v428_v51 = vsel %vm223_vm0, %v427_v47, %v426_v43 }
  0xcb   : > { %v382_v48 = vrot.slane %v381_v44, 6  ;;  %v429_v54 = vrot.slane %v428_v51, 6  ;;  %v457_v55 = vpop.permute.xlu0 %456  ;;  %v504_v60 = vpop.permute.xlu1 %503  ;;  %v211_v22 = vand.u32 15, %v2116_v6  ;;  %v237_v24 = vstv %s236_s20  ;;  %s2311_s20 = sld [smem:[#allocation7 + $0xc]] }
  0xcc   : > { %v278_v33 = vsel %vm216_vm3, %v270_v15, %v276_v28  ;;  %v356_v50 = vsel %vm216_vm3, %v348_v27, %v354_v46  ;;  %v458_v57 = vrot.slane %v457_v55, 6  ;;  %v505_v4 = vrot.slane %v504_v60, 6 }
  0xcd   : > { %v2157_v36 = vsel %vm2147_vm4, %v278_v33, 0.0  ;;  %v383_v52 = vsel %vm223_vm0, %v382_v48, %v379_v37  ;;  %v2192_v53 = vsel %vm2147_vm4, %v356_v50, 0.0  ;;  %v430_v58 = vsel %vm223_vm0, %v429_v54, %v426_v43 }
  0xce   : > { %251 = vrot.lane.b32.xlu1 %v2089_v0, %s1929_s12  ;;  %534 = vrot.lane.b32.xlu0 %v2140_v30, %s1926_s27  ;;  %v385_v56 = vrot.slane %v383_v52, 1  ;;  %v459_v61 = vsel %vm223_vm0, %v458_v57, %v457_v55  ;;  %v432_v62 = vrot.slane %v430_v58, 1  ;;  %v506_v9 = vsel %vm223_vm0, %v505_v4, %v504_v60 }
  0xcf   : > { %v460_v5 = vrot.slane %v459_v61, 6  ;;  %v507_v12 = vrot.slane %v506_v9, 6  ;;  %vm2272_vm5 = vcmp.ge.s32.totalorder %v211_v22, 1  ;;  %vm2278_vm6 = vcmp.le.s32.totalorder %v211_v22, 14 }
  0xd0   : > { %v387_v59 = vsel %vm217_vm1, %v379_v37, %v385_v56  ;;  %v434_v8 = vsel %vm216_vm3, %v426_v43, %v432_v62  ;;  %v255_v38 = vstv %s1578_s7  ;;  %v242_v39 = vmul.f32 %v241_v29, %v2132_v25  ;;  %s2360_s7 = sld [smem:[#allocation7 + $0x10]] }
  0xd1   : > { %v2208_v63 = vsel %vm2123_vm2, %v387_v59, 0.0  ;;  %v2226_v10 = vsel %vm2147_vm4, %v434_v8, 0.0  ;;  %v461_v11 = vsel %vm223_vm0, %v460_v5, %v457_v55  ;;  %v508_v14 = vsel %vm223_vm0, %v507_v12, %v504_v60 }
  0xd2   : > { %280 = vrot.lane.b32.xlu1 %v2157_v36, %s1929_s12  ;;  %262 = vrot.lane.b32.xlu0 %v2089_v0, %s1928_s6  ;;  %v463_v13 = vrot.slane %v461_v11, 1  ;;  %v510_v16 = vrot.slane %v508_v14, 1  ;;  %v259_v46 = vstv %s2270_s5  ;;  %v266_v52 = vstv %s2276_s8  ;;  %s2371_s5 = sld [smem:[#allocation7 + $0x11]] }
  0xd3   : > { %v260_v56 = vmul.f32 %v259_v46, %v2089_v0  ;;  %v284_v62 = vstv %s2286_s9  ;;  %v288_v11 = vstv %s2289_s10  ;;  %v295_v22 = vstv %s2296_s11  ;;  %s2379_s8 = sld [smem:[#allocation7 + $0x12]] }
  0xd4   : > { %v465_v15 = vsel %vm217_vm1, %v457_v55, %v463_v13  ;;  %v512_v19 = vsel %vm216_vm3, %v504_v60, %v510_v16  ;;  %v333_v46 = vstv %s2311_s20  ;;  %s2381_s9 = sld [smem:[#allocation7 + $0x13]] }
  0xd5   : > { %v2242_v17 = vsel %vm2123_vm2, %v465_v15, 0.0  ;;  %v2259_v21 = vsel %vm2147_vm4, %v512_v19, 0.0  ;;  %s2392_s10 = sld [smem:[#allocation7 + $0x14]] }
  0xd6   : > { %581 = vrot.lane.b32.xlu1 %v2140_v30, %s1927_s24  ;;  %291 = vrot.lane.b32.xlu0 %v2157_v36, %s1928_s6  ;;  %s2400_s11 = sld [smem:[#allocation7 + $0x15]] }
  0xd7   : > { %s2442_s20 = sld [smem:[#allocation7 + $0x19]] }
  0xda   : > { %322 = vrot.lane.b32.xlu1 %v2173_v45, %s1928_s6  ;;  %311 = vrot.lane.b32.xlu0 %v2173_v45, %s1929_s12 }
  0xde   : > { %329 = vrot.lane.b32.xlu1 %v2092_v1, %s1929_s12  ;;  %612 = vrot.lane.b32.xlu0 %v2180_v49, %s1926_s27 }
  0xe2   : > { %358 = vrot.lane.b32.xlu1 %v2192_v53, %s1929_s12  ;;  %340 = vrot.lane.b32.xlu0 %v2092_v1, %s1928_s6 }
  0xe6   : > { %659 = vrot.lane.b32.xlu1 %v2180_v49, %s1927_s24  ;;  %369 = vrot.lane.b32.xlu0 %v2192_v53, %s1928_s6 }
  0xea   : > { %400 = vrot.lane.b32.xlu1 %v2208_v63, %s1928_s6  ;;  %389 = vrot.lane.b32.xlu0 %v2208_v63, %s1929_s12 }
  0xee   : > { %407 = vrot.lane.b32.xlu1 %v2103_v2, %s1929_s12  ;;  %690 = vrot.lane.b32.xlu0 %v2215_v7, %s1926_s27 }
  0xf2   : > { %436 = vrot.lane.b32.xlu1 %v2226_v10, %s1929_s12  ;;  %418 = vrot.lane.b32.xlu0 %v2103_v2, %s1928_s6 }
  0xf6   : > { %737 = vrot.lane.b32.xlu1 %v2215_v7, %s1927_s24  ;;  %447 = vrot.lane.b32.xlu0 %v2226_v10, %s1928_s6 }
  0xfa   : > { %478 = vrot.lane.b32.xlu1 %v2242_v17, %s1928_s6  ;;  %467 = vrot.lane.b32.xlu0 %v2242_v17, %s1929_s12 }
  0xfe   : > { %768 = vrot.lane.b32.xlu0 %v2249_v18, %s1926_s27  ;;  %485 = vrot.lane.b32.xlu1 %v2110_v3, %s1929_s12 }
 0x102   : > { %496 = vrot.lane.b32.xlu0 %v2110_v3, %s1928_s6  ;;  %514 = vrot.lane.b32.xlu1 %v2259_v21, %s1929_s12 }
 0x106   : > { %525 = vrot.lane.b32.xlu0 %v2259_v21, %s1928_s6  ;;  %815 = vrot.lane.b32.xlu1 %v2249_v18, %s1927_s24 }
 0x13c   : > { %v245_v27 = vpop.permute.xlu1 %244  ;;  %v234_v28 = vpop.permute.xlu0 %233 }
 0x13d   : > { %v235_v33 = vsel %vm2272_vm5, %v234_v28, 0.0  ;;  %v246_v37 = vsel %vm2278_vm6, %v245_v27, 0.0  ;;  %v289_v27 = vmul.f32 %v288_v11, %v2157_v36 }
 0x13e   : > { %v238_v34 = vmul.f32 %v237_v24, %v235_v33  ;;  %v249_v47 = vmul.f32 %v248_v35, %v246_v37  ;;  %v315_v35 = vstv %s2301_s13  ;;  %s2408_s13 = sld [smem:[#allocation7 + $0x16]] }
 0x140   : > { %v239_v40 = vadd.f32 %v238_v34, %v219_v31  ;;  %v252_v41 = vpop.permute.xlu1 %251  ;;  %v535_v42 = vpop.permute.xlu0 %534  ;;  %v2332_v34 = vld [vmem:[%s2078_s29 + $0x10] sm:$0x3] }
 0x141   : > { %v253_v43 = vsel %vm2272_vm5, %v252_v41, 0.0  ;;  %v536_v44 = vrot.slane %v535_v42, 6  ;;  %v319_v41 = vstv %s2303_s23  ;;  %s2419_s23 = sld [smem:[#allocation7 + $0x17]] }
 0x142   : > { %v243_v48 = vadd.f32 %v242_v39, %v239_v40  ;;  %v256_v50 = vmul.f32 %v255_v38, %v253_v43  ;;  %v326_v43 = vstv %s2309_s28  ;;  %s2439_s28 = sld [smem:[#allocation7 + $0x18]] }
 0x143   : > { %v537_v51 = vsel %vm223_vm0, %v536_v44, %v535_v42 }
 0x144   : > { %v250_v25 = vadd.f32 %v249_v47, %v243_v48  ;;  %v538_v54 = vrot.slane %v537_v51, 6  ;;  %v281_v55 = vpop.permute.xlu1 %280  ;;  %v263_v57 = vpop.permute.xlu0 %262 }
 0x145   : > { %v264_v58 = vsel %vm2278_vm6, %v263_v57, 0.0  ;;  %v282_v4 = vsel %vm2272_vm5, %v281_v55, 0.0 }
 0x146   : > { %v257_v59 = vadd.f32 %v256_v50, %v250_v25  ;;  %v267_v60 = vmul.f32 %v266_v52, %v264_v58  ;;  %v539_v61 = vsel %vm223_vm0, %v538_v54, %v535_v42  ;;  %v285_v14 = vmul.f32 %v284_v62, %v282_v4 }
 0x147   : > { %v541_v5 = vrot.slane %v539_v61, 1  ;;  %v320_v54 = vmul.f32 %v319_v41, %v2173_v45  ;;  %v337_v58 = vstv %s2328_s21  ;;  %v2403_v41 = vld [vmem:[%s2078_s29 + $0x12] sm:$0x3]  ;;  %s2453_s21 = sld [smem:[#allocation7 + $0x1a]] }
 0x148   : > { %v261_v0 = vadd.f32 %v260_v56, %v257_v59  ;;  %v582_v8 = vpop.permute.xlu1 %581  ;;  %v292_v9 = vpop.permute.xlu0 %291 }
 0x149   : > { %v583_v12 = vrot.slane %v582_v8, 6  ;;  %v543_v13 = vsel %vm217_vm1, %v535_v42, %v541_v5  ;;  %v293_v24 = vsel %vm2278_vm6, %v292_v9, 0.0  ;;  %v344_v5 = vstv %s2337_s30  ;;  %s2458_s30 = sld [smem:[#allocation7 + $0x1b]] }
 0x14a   : > { %v268_v15 = vadd.f32 %v267_v60, %v261_v0  ;;  %v2318_v16 = vsel %vm2123_vm2, %v543_v13, 0.0  ;;  %v296_v39 = vmul.f32 %v295_v22, %v293_v24  ;;  %v338_v9 = vmul.f32 %v2092_v1, %v337_v58 }
 0x14b   : > { %v584_v19 = vsel %vm223_vm0, %v583_v12, %v582_v8  ;;  %556 = vrot.lane.b32.xlu1 %v2318_v16, %s1928_s6  ;;  %545 = vrot.lane.b32.xlu0 %v2318_v16, %s1929_s12  ;;  %v362_v22 = vstv %s2353_s4  ;;  %s2464_s4 = sld [smem:[#allocation7 + $0x1c]] }
 0x14c   : > { %v286_v28 = vadd.f32 %v285_v14, %v268_v15  ;;  %v585_v29 = vrot.slane %v584_v19, 6  ;;  %v323_v31 = vpop.permute.xlu1 %322  ;;  %v312_v33 = vpop.permute.xlu0 %311 }
 0x14d   : > { %v313_v37 = vsel %vm2272_vm5, %v312_v33, 0.0  ;;  %v324_v50 = vsel %vm2278_vm6, %v323_v31, 0.0  ;;  %v366_v31 = vstv %s2360_s7  ;;  %s2474_s7 = sld [smem:[#allocation7 + $0x1d]] }
 0x14e   : > { %v290_v38 = vadd.f32 %v289_v27, %v286_v28  ;;  %v586_v40 = vsel %vm223_vm0, %v585_v29, %v582_v8  ;;  %v316_v44 = vmul.f32 %v315_v35, %v313_v37  ;;  %v327_v59 = vmul.f32 %v326_v43, %v324_v50 }
 0x14f   : > { %563 = vrot.lane.b32.xlu1 %v2140_v30, %s1929_s12  ;;  %846 = vrot.lane.b32.xlu0 %v2332_v34, %s1926_s27  ;;  %v588_v36 = vrot.slane %v586_v40, 1  ;;  %v367_v43 = vmul.f32 %v366_v31, %v2192_v53 }
 0x150   : > { %v297_v42 = vadd.f32 %v296_v39, %v290_v38  ;;  %v330_v47 = vpop.permute.xlu1 %329  ;;  %v613_v48 = vpop.permute.xlu0 %612 }
 0x151   : > { %v331_v51 = vsel %vm2272_vm5, %v330_v47, 0.0  ;;  %v614_v52 = vrot.slane %v613_v48, 6  ;;  %v590_v25 = vsel %vm216_vm3, %v582_v8, %v588_v36  ;;  %v373_v36 = vstv %s2371_s5  ;;  %s2480_s5 = sld [smem:[#allocation7 + $0x1e]] }
 0x152   : > { %v317_v55 = vadd.f32 %v316_v44, %v297_v42  ;;  %v2358_v56 = vsel %vm2147_vm4, %v590_v25, 0.0  ;;  %v334_v61 = vmul.f32 %v333_v46, %v331_v51  ;;  %v393_v47 = vstv %s2379_s8  ;;  %s2490_s8 = sld [smem:[#allocation7 + $0x1f]] }
 0x153   : > { %v615_v57 = vsel %vm223_vm0, %v614_v52, %v613_v48  ;;  %592 = vrot.lane.b32.xlu1 %v2358_v56, %s1929_s12  ;;  %574 = vrot.lane.b32.xlu0 %v2140_v30, %s1928_s6 }
 0x154   : > { %v321_v60 = vadd.f32 %v320_v54, %v317_v55  ;;  %v616_v45 = vrot.slane %v615_v57, 6  ;;  %v359_v62 = vpop.permute.xlu1 %358  ;;  %v341_v4 = vpop.permute.xlu0 %340  ;;  %v397_v54 = vstv %s2381_s9  ;;  %s2498_s9 = sld [smem:[#allocation7 + $0x20]] }
 0x155   : > { %v342_v0 = vsel %vm2278_vm6, %v341_v4, 0.0  ;;  %v360_v1 = vsel %vm2272_vm5, %v359_v62, 0.0  ;;  %v411_v62 = vstv %s2400_s11  ;;  %s2520_s11 = sld [smem:[#allocation7 + $0x22]] }
 0x156   : > { %v328_v8 = vadd.f32 %v327_v59, %v321_v60  ;;  %v617_v11 = vsel %vm223_vm0, %v616_v45, %v613_v48  ;;  %v345_v14 = vmul.f32 %v344_v5, %v342_v0  ;;  %v363_v35 = vmul.f32 %v362_v22, %v360_v1 }
 0x157   : > { %893 = vrot.lane.b32.xlu1 %v2332_v34, %s1927_s24  ;;  %603 = vrot.lane.b32.xlu0 %v2358_v56, %s1928_s6  ;;  %v619_v12 = vrot.slane %v617_v11, 1  ;;  %v404_v59 = vstv %s2392_s10  ;;  %v398_v0 = vmul.f32 %v397_v54, %v2208_v63  ;;  %v422_v1 = vstv %s2419_s23  ;;  %s2516_s10 = sld [smem:[#allocation7 + $0x21]] }
 0x158   : > { %v335_v13 = vadd.f32 %v334_v61, %v328_v8  ;;  %v660_v15 = vpop.permute.xlu1 %659  ;;  %v370_v19 = vpop.permute.xlu0 %369  ;;  %v451_v54 = vstv %s2453_s21  ;;  %s1615_s23 = sld [smem:[#allocation7 + $0x24]] }
 0x159   : > { %v661_v24 = vrot.slane %v660_v15, 6  ;;  %v621_v27 = vsel %vm217_vm1, %v613_v48, %v619_v12  ;;  %v371_v42 = vsel %vm2278_vm6, %v370_v19, 0.0  ;;  %s1618_s21 = sld [smem:[#allocation7 + $0x27]] }
 0x15a   : > { %v339_v28 = vadd.f32 %v338_v9, %v335_v13  ;;  %v2390_v29 = vsel %vm2123_vm2, %v621_v27, 0.0  ;;  %v374_v53 = vmul.f32 %v373_v36, %v371_v42  ;;  %v415_v13 = vstv %s2408_s13  ;;  %s1613_s13 = sld [smem:[#allocation7 + $0x23]] }
 0x15b   : > { %v662_v33 = vsel %vm223_vm0, %v661_v24, %v660_v15  ;;  %634 = vrot.lane.b32.xlu1 %v2390_v29, %s1928_s6  ;;  %623 = vrot.lane.b32.xlu0 %v2390_v29, %s1929_s12  ;;  %v440_v36 = vstv %s2439_s28  ;;  %s1616_s28 = sld [smem:[#allocation7 + $0x25]] }
 0x15c   : > { %v346_v37 = vadd.f32 %v345_v14, %v339_v28  ;;  %v663_v38 = vrot.slane %v662_v33, 6  ;;  %v401_v39 = vpop.permute.xlu1 %400  ;;  %v390_v40 = vpop.permute.xlu0 %389  ;;  %v416_v28 = vmul.f32 %v2103_v2, %v415_v13 }
 0x15d   : > { %v391_v48 = vsel %vm2272_vm5, %v390_v40, 0.0  ;;  %v402_v45 = vsel %vm2278_vm6, %v401_v39, 0.0 }
 0x15e   : > { %v364_v44 = vadd.f32 %v363_v35, %v346_v37  ;;  %v664_v46 = vsel %vm223_vm0, %v663_v38, %v660_v15  ;;  %v394_v60 = vmul.f32 %v393_v47, %v391_v48  ;;  %v405_v14 = vmul.f32 %v404_v59, %v402_v45  ;;  %v2477_v48 = vld [vmem:[%s2078_s29 + $0x14] sm:$0x3] }
 0x15f   : > { %641 = vrot.lane.b32.xlu1 %v2180_v49, %s1929_s12  ;;  %924 = vrot.lane.b32.xlu0 %v2403_v41, %s1926_s27  ;;  %v666_v50 = vrot.slane %v664_v46, 1  ;;  %v471_v45 = vstv %s2458_s30  ;;  %s2571_s30 = sld [smem:[#allocation7 + $0x28]] }
 0x160   : > { %v368_v51 = vadd.f32 %v367_v43, %v364_v44  ;;  %v408_v52 = vpop.permute.xlu1 %407  ;;  %v691_v25 = vpop.permute.xlu0 %690 }
 0x161   : > { %v692_v55 = vrot.slane %v691_v25, 6  ;;  %v668_v57 = vsel %vm216_vm3, %v660_v15, %v666_v50  ;;  %v409_v4 = vsel %vm2272_vm5, %v408_v52, 0.0  ;;  %v444_v50 = vstv %s2442_s20  ;;  %s1617_s20 = sld [smem:[#allocation7 + $0x26]] }
 0x162   : > { %v375_v58 = vadd.f32 %v374_v53, %v368_v51  ;;  %v2427_v61 = vsel %vm2147_vm4, %v668_v57, 0.0  ;;  %v412_v19 = vmul.f32 %v411_v62, %v409_v4  ;;  %v445_v57 = vmul.f32 %v444_v50, %v2226_v10 }
 0x163   : > { %v693_v5 = vsel %vm223_vm0, %v692_v55, %v691_v25  ;;  %670 = vrot.lane.b32.xlu1 %v2427_v61, %s1929_s12  ;;  %652 = vrot.lane.b32.xlu0 %v2180_v49, %s1928_s6 }
 0x164   : > { %v395_v8 = vadd.f32 %v394_v60, %v375_v58  ;;  %v694_v9 = vrot.slane %v693_v5, 6  ;;  %v437_v11 = vpop.permute.xlu1 %436  ;;  %v419_v12 = vpop.permute.xlu0 %418 }
 0x165   : > { %v420_v24 = vsel %vm2278_vm6, %v419_v12, 0.0  ;;  %v438_v2 = vsel %vm2272_vm5, %v437_v11, 0.0 }
 0x166   : > { %v399_v15 = vadd.f32 %v398_v0, %v395_v8  ;;  %v695_v22 = vsel %vm223_vm0, %v694_v9, %v691_v25  ;;  %v423_v39 = vmul.f32 %v422_v1, %v420_v24  ;;  %v441_v51 = vmul.f32 %v440_v36, %v438_v2 }
 0x167   : > { %971 = vrot.lane.b32.xlu1 %v2403_v41, %s1927_s24  ;;  %681 = vrot.lane.b32.xlu0 %v2427_v61, %s1928_s6  ;;  %v697_v63 = vrot.slane %v695_v22, 1  ;;  %v475_v9 = vstv %s2464_s4  ;;  %v489_v1 = vstv %s2480_s5  ;;  %s2573_s4 = sld [smem:[#allocation7 + $0x29]] }
 0x168   : > { %v406_v27 = vadd.f32 %v405_v14, %v399_v15  ;;  %v738_v31 = vpop.permute.xlu1 %737  ;;  %v448_v33 = vpop.permute.xlu0 %447  ;;  %v500_v36 = vstv %s2498_s9  ;;  %s2582_s5 = sld [smem:[#allocation7 + $0x2b]] }
 0x169   : > { %v739_v35 = vrot.slane %v738_v31, 6  ;;  %v699_v37 = vsel %vm217_vm1, %v691_v25, %v697_v63  ;;  %v449_v55 = vsel %vm2278_vm6, %v448_v33, 0.0  ;;  %v476_v63 = vmul.f32 %v475_v9, %v2242_v17  ;;  %s2594_s9 = sld [smem:[#allocation7 + $0x2d]] }
 0x16a   : > { %v413_v38 = vadd.f32 %v412_v19, %v406_v27  ;;  %v2462_v40 = vsel %vm2123_vm2, %v699_v37, 0.0  ;;  %v452_v8 = vmul.f32 %v451_v54, %v449_v55  ;;  %v482_v19 = vstv %s2474_s7  ;;  %s2579_s7 = sld [smem:[#allocation7 + $0x2a]] }
 0x16b   : > { %v740_v42 = vsel %vm223_vm0, %v739_v35, %v738_v31  ;;  %712 = vrot.lane.b32.xlu1 %v2462_v40, %s1928_s6  ;;  %701 = vrot.lane.b32.xlu0 %v2462_v40, %s1929_s12  ;;  %v493_v33 = vstv %s2490_s8  ;;  %v518_v54 = vstv %s2516_s10  ;;  %s2589_s8 = sld [smem:[#allocation7 + $0x2c]] }
 0x16c   : > { %v417_v43 = vadd.f32 %v416_v28, %v413_v38  ;;  %v741_v44 = vrot.slane %v740_v42, 6  ;;  %v479_v46 = vpop.permute.xlu1 %478  ;;  %v468_v47 = vpop.permute.xlu0 %467  ;;  %v529_v9 = vstv %s1613_s13  ;;  %s2596_s10 = sld [smem:[#allocation7 + $0x2e]] }
 0x16d   : > { %v469_v62 = vsel %vm2272_vm5, %v468_v47, 0.0  ;;  %v480_v22 = vsel %vm2278_vm6, %v479_v46, 0.0  ;;  %v494_v46 = vmul.f32 %v2110_v3, %v493_v33  ;;  %s2604_s13 = sld [smem:[#allocation7 + $0x30]] }
 0x16e   : > { %v424_v53 = vadd.f32 %v423_v39, %v417_v43  ;;  %v742_v52 = vsel %vm223_vm0, %v741_v44, %v738_v31  ;;  %v472_v13 = vmul.f32 %v471_v45, %v469_v62  ;;  %v483_v35 = vmul.f32 %v482_v19, %v480_v22 }
 0x16f   : > { %v744_v25 = vrot.slane %v742_v52, 1  ;;  %719 = vrot.lane.b32.xlu1 %v2215_v7, %s1929_s12  ;;  %1002 = vrot.lane.b32.xlu0 %v2477_v48, %s1926_s27 }
 0x170   : > { %v442_v58 = vadd.f32 %v441_v51, %v424_v53  ;;  %v769_v59 = vpop.permute.xlu0 %768  ;;  %v486_v60 = vpop.permute.xlu1 %485 }
 0x171   : > { %v770_v4 = vrot.slane %v769_v59, 6  ;;  %v746_v5 = vsel %vm216_vm3, %v738_v31, %v744_v25  ;;  %v487_v24 = vsel %vm2272_vm5, %v486_v60, 0.0  ;;  %v2543_v25 = vld [vmem:[%s2078_s29 + $0x16] sm:$0x3] }
 0x172   : > { %v446_v0 = vadd.f32 %v445_v57, %v442_v58  ;;  %v2502_v10 = vsel %vm2147_vm4, %v746_v5, 0.0  ;;  %v490_v38 = vmul.f32 %v489_v1, %v487_v24  ;;  %v522_v58 = vstv %s2520_s11  ;;  %s2602_s11 = sld [smem:[#allocation7 + $0x2f]] }
 0x173   : > { %v771_v11 = vsel %vm223_vm0, %v770_v4, %v769_v59  ;;  %748 = vrot.lane.b32.xlu1 %v2502_v10, %s1929_s12  ;;  %730 = vrot.lane.b32.xlu0 %v2215_v7, %s1928_s6  ;;  %v523_v4 = vmul.f32 %v522_v58, %v2259_v21  ;;  %v560_v24 = vstv %s1617_s20  ;;  %s2646_s20 = sld [smem:[#allocation7 + $0x33]] }
 0x174   : > { %v453_v12 = vadd.f32 %v452_v8, %v446_v0  ;;  %v772_v14 = vrot.slane %v771_v11, 6  ;;  %v515_v15 = vpop.permute.xlu1 %514  ;;  %v497_v39 = vpop.permute.xlu0 %496  ;;  %v549_v11 = vstv %s1615_s23  ;;  %s2621_s23 = sld [smem:[#allocation7 + $0x31]] }
 0x175   : > { %v498_v2 = vsel %vm2278_vm6, %v497_v39, 0.0  ;;  %v516_v3 = vsel %vm2272_vm5, %v515_v15, 0.0  ;;  %v553_v15 = vstv %s1616_s28  ;;  %v571_v39 = vstv %s2571_s30  ;;  %s2630_s28 = sld [smem:[#allocation7 + $0x32]] }
 0x176   : > { %v473_v27 = vadd.f32 %v472_v13, %v453_v12  ;;  %v773_v28 = vsel %vm223_vm0, %v772_v14, %v769_v59  ;;  %v501_v53 = vmul.f32 %v500_v36, %v498_v2  ;;  %v519_v45 = vmul.f32 %v518_v54, %v516_v3  ;;  %s2664_s30 = sld [smem:[#allocation7 + $0x35]] }
 0x177   : > { %v775_v31 = vrot.slane %v773_v28, 1  ;;  %1049 = vrot.lane.b32.xlu1 %v2477_v48, %s1927_s24  ;;  %759 = vrot.lane.b32.xlu0 %v2502_v10, %s1928_s6  ;;  %v554_v28 = vmul.f32 %v553_v15, %v2318_v16 }
 0x178   : > { %v477_v37 = vadd.f32 %v476_v63, %v473_v27  ;;  %v816_v17 = vpop.permute.xlu1 %815  ;;  %v526_v21 = vpop.permute.xlu0 %525  ;;  %v567_v27 = vstv %s1618_s21  ;;  %s2653_s21 = sld [smem:[#allocation7 + $0x34]] }
 0x179   : > { %v817_v42 = vrot.slane %v816_v17, 6  ;;  %v777_v43 = vsel %vm217_vm1, %v769_v59, %v775_v31 }
 0x17a   : > { %v484_v44 = vadd.f32 %v483_v35, %v477_v37  ;;  %v2535_v47 = vsel %vm2123_vm2, %v777_v43, 0.0  ;;  %v578_v43 = vstv %s2573_s4  ;;  %s2672_s4 = sld [smem:[#allocation7 + $0x36]] }
 0x17b   : > { %v818_v50 = vsel %vm223_vm0, %v817_v42, %v816_v17  ;;  %790 = vrot.lane.b32.xlu1 %v2535_v47, %s1928_s6  ;;  %779 = vrot.lane.b32.xlu0 %v2535_v47, %s1929_s12 }
 0x17c   : > { %v491_v51 = vadd.f32 %v490_v38, %v484_v44  ;;  %v819_v52 = vrot.slane %v818_v50, 6  ;;  %v572_v50 = vmul.f32 %v2140_v30, %v571_v39 }
 0x17e   : > { %v495_v55 = vadd.f32 %v494_v46, %v491_v51  ;;  %v820_v57 = vsel %vm223_vm0, %v819_v52, %v816_v17 }
 0x17f   : > { %v822_v59 = vrot.slane %v820_v57, 1  ;;  %1080 = vrot.lane.b32.xlu0 %v2543_v25, %s1926_s27  ;;  %797 = vrot.lane.b32.xlu1 %v2249_v18, %s1929_s12  ;;  %v596_v57 = vstv %s2579_s7  ;;  %s2674_s7 = sld [smem:[#allocation7 + $0x37]] }
 0x180   : > { %v502_v60 = vadd.f32 %v501_v53, %v495_v55 }
 0x181   : > { %v824_v62 = vsel %vm216_vm3, %v816_v17, %v822_v59 }
 0x182   : > { %v520_v5 = vadd.f32 %v519_v45, %v502_v60  ;;  %v2559_v0 = vsel %vm2147_vm4, %v824_v62, 0.0  ;;  %v600_v45 = vstv %s2582_s5  ;;  %s2685_s5 = sld [smem:[#allocation7 + $0x38]] }
 0x183   : > { %808 = vrot.lane.b32.xlu0 %v2249_v18, %s1928_s6  ;;  %826 = vrot.lane.b32.xlu1 %v2559_v0, %s1929_s12  ;;  %v527_v18 = vsel %vm2278_vm6, %v526_v21, 0.0 }
 0x184   : > { %v524_v8 = vadd.f32 %v523_v4, %v520_v5  ;;  %v530_v12 = vmul.f32 %v529_v9, %v527_v18  ;;  %v607_v18 = vstv %s2589_s8  ;;  %s2693_s8 = sld [smem:[#allocation7 + $0x39]] }
 0x186   : > { %v531_v22 = vadd.f32 %v530_v12, %v524_v8  ;;  %v601_v12 = vmul.f32 %v600_v45, %v2358_v56 }
 0x187   : > { %837 = vrot.lane.b32.xlu0 %v2559_v0, %s1928_s6  ;;  %1127 = vrot.lane.b32.xlu1 %v2543_v25, %s1927_s24 }
 0x1bd   : > { %v557_v13 = vpop.permute.xlu1 %556  ;;  %v546_v14 = vpop.permute.xlu0 %545 }
 0x1be   : > { %v547_v19 = vsel %vm2272_vm5, %v546_v14, 0.0  ;;  %v558_v63 = vsel %vm2278_vm6, %v557_v13, 0.0 }
 0x1bf   : > { %v550_v1 = vmul.f32 %v549_v11, %v547_v19  ;;  %v561_v17 = vmul.f32 %v560_v24, %v558_v63 }
 0x1c1   : > { %v551_v31 = vadd.f32 %v550_v1, %v531_v22  ;;  %v564_v33 = vpop.permute.xlu1 %563  ;;  %v847_v35 = vpop.permute.xlu0 %846  ;;  %v2625_v22 = vld [vmem:[%s2078_s29 + $0x18] sm:$0x3]  ;;  %v627_v1 = vstv %s2594_s9  ;;  %s2701_s9 = sld [smem:[#allocation7 + $0x3a]] }
 0x1c2   : > { %v565_v37 = vsel %vm2272_vm5, %v564_v33, 0.0  ;;  %v848_v38 = vrot.slane %v847_v35, 6 }
 0x1c3   : > { %v555_v36 = vadd.f32 %v554_v28, %v551_v31  ;;  %v568_v2 = vmul.f32 %v567_v27, %v565_v37  ;;  %v631_v31 = vstv %s2596_s10  ;;  %s2712_s10 = sld [smem:[#allocation7 + $0x3b]] }
 0x1c4   : > { %v849_v42 = vsel %vm223_vm0, %v848_v38, %v847_v35  ;;  %v645_v38 = vstv %s2604_s13  ;;  %s2735_s13 = sld [smem:[#allocation7 + $0x3d]] }
 0x1c5   : > { %v562_v16 = vadd.f32 %v561_v17, %v555_v36  ;;  %v850_v44 = vrot.slane %v849_v42, 6  ;;  %v593_v46 = vpop.permute.xlu1 %592  ;;  %v575_v51 = vpop.permute.xlu0 %574 }
 0x1c6   : > { %v576_v53 = vsel %vm2278_vm6, %v575_v51, 0.0  ;;  %v594_v58 = vsel %vm2272_vm5, %v593_v46, 0.0  ;;  %v649_v51 = vstv %s2621_s23  ;;  %s2746_s23 = sld [smem:[#allocation7 + $0x3e]] }
 0x1c7   : > { %v569_v52 = vadd.f32 %v568_v2, %v562_v16  ;;  %v851_v54 = vsel %vm223_vm0, %v850_v44, %v847_v35  ;;  %v579_v3 = vmul.f32 %v578_v43, %v576_v53  ;;  %v597_v5 = vmul.f32 %v596_v57, %v594_v58 }
 0x1c8   : > { %v853_v55 = vrot.slane %v851_v54, 1  ;;  %v632_v16 = vmul.f32 %v631_v31, %v2390_v29  ;;  %v656_v57 = vstv %s2630_s28  ;;  %s2751_s28 = sld [smem:[#allocation7 + $0x3f]] }
 0x1c9   : > { %v573_v30 = vadd.f32 %v572_v50, %v569_v52  ;;  %v894_v59 = vpop.permute.xlu1 %893  ;;  %v604_v60 = vpop.permute.xlu0 %603 }
 0x1ca   : > { %v895_v62 = vrot.slane %v894_v59, 6  ;;  %v855_v4 = vsel %vm217_vm1, %v847_v35, %v853_v55  ;;  %v605_v11 = vsel %vm2278_vm6, %v604_v60, 0.0  ;;  %v638_v35 = vstv %s2602_s11  ;;  %s2732_s11 = sld [smem:[#allocation7 + $0x3c]] }
 0x1cb   : > { %v580_v8 = vadd.f32 %v579_v3, %v573_v30  ;;  %v2611_v21 = vsel %vm2123_vm2, %v855_v4, 0.0  ;;  %v608_v28 = vmul.f32 %v607_v18, %v605_v11  ;;  %v650_v60 = vmul.f32 %v2180_v49, %v649_v51 }
 0x1cc   : > { %v896_v9 = vsel %vm223_vm0, %v895_v62, %v894_v59  ;;  %868 = vrot.lane.b32.xlu1 %v2611_v21, %s1928_s6  ;;  %857 = vrot.lane.b32.xlu0 %v2611_v21, %s1929_s12 }
 0x1cd   : > { %v598_v13 = vadd.f32 %v597_v5, %v580_v8  ;;  %v897_v14 = vrot.slane %v896_v9, 6  ;;  %v635_v15 = vpop.permute.xlu1 %634  ;;  %v624_v19 = vpop.permute.xlu0 %623  ;;  %v674_v8 = vstv %s2646_s20  ;;  %s2757_s20 = sld [smem:[#allocation7 + $0x40]] }
 0x1ce   : > { %v625_v24 = vsel %vm2272_vm5, %v624_v19, 0.0  ;;  %v636_v36 = vsel %vm2278_vm6, %v635_v15, 0.0 }
 0x1cf   : > { %v898_v63 = vsel %vm223_vm0, %v897_v14, %v894_v59  ;;  %v602_v27 = vadd.f32 %v601_v12, %v598_v13  ;;  %v628_v37 = vmul.f32 %v627_v1, %v625_v24  ;;  %v639_v53 = vmul.f32 %v638_v35, %v636_v36 }
 0x1d0   : > { %v900_v56 = vrot.slane %v898_v63, 1  ;;  %875 = vrot.lane.b32.xlu1 %v2332_v34, %s1929_s12  ;;  %1158 = vrot.lane.b32.xlu0 %v2625_v22, %s1926_s27  ;;  %v678_v13 = vstv %s2653_s21  ;;  %s2767_s21 = sld [smem:[#allocation7 + $0x41]] }
 0x1d1   : > { %v609_v33 = vadd.f32 %v608_v28, %v602_v27  ;;  %v642_v39 = vpop.permute.xlu1 %641  ;;  %v925_v17 = vpop.permute.xlu0 %924  ;;  %v2696_v27 = vld [vmem:[%s2078_s29 + $0x1a] sm:$0x3]  ;;  %v685_v28 = vstv %s2664_s30  ;;  %s2773_s30 = sld [smem:[#allocation7 + $0x42]] }
 0x1d2   : > { %v643_v2 = vsel %vm2272_vm5, %v642_v39, 0.0  ;;  %v926_v42 = vrot.slane %v925_v17, 6  ;;  %v902_v43 = vsel %vm216_vm3, %v894_v59, %v900_v56  ;;  %v679_v56 = vmul.f32 %v678_v13, %v2427_v61 }
 0x1d3   : > { %v629_v44 = vadd.f32 %v628_v37, %v609_v33  ;;  %v2651_v46 = vsel %vm2147_vm4, %v902_v43, 0.0  ;;  %v646_v54 = vmul.f32 %v645_v38, %v643_v2  ;;  %v705_v38 = vstv %s2672_s4  ;;  %s2783_s4 = sld [smem:[#allocation7 + $0x43]] }
 0x1d4   : > { %v927_v50 = vsel %vm223_vm0, %v926_v42, %v925_v17  ;;  %904 = vrot.lane.b32.xlu1 %v2651_v46, %s1929_s12  ;;  %886 = vrot.lane.b32.xlu0 %v2332_v34, %s1928_s6  ;;  %v709_v42 = vstv %s2674_s7  ;;  %s2791_s7 = sld [smem:[#allocation7 + $0x44]] }
 0x1d5   : > { %v633_v52 = vadd.f32 %v632_v16, %v629_v44  ;;  %v928_v29 = vrot.slane %v927_v50, 6  ;;  %v671_v3 = vpop.permute.xlu1 %670  ;;  %v653_v55 = vpop.permute.xlu0 %652  ;;  %v716_v50 = vstv %s2685_s5  ;;  %s2809_s5 = sld [smem:[#allocation7 + $0x45]] }
 0x1d6   : > { %v654_v58 = vsel %vm2278_vm6, %v653_v55, 0.0  ;;  %v672_v49 = vsel %vm2272_vm5, %v671_v3, 0.0  ;;  %v710_v55 = vmul.f32 %v709_v42, %v2462_v40 }
 0x1d7   : > { %v640_v30 = vadd.f32 %v639_v53, %v633_v52  ;;  %v929_v59 = vsel %vm223_vm0, %v928_v29, %v925_v17  ;;  %v657_v62 = vmul.f32 %v656_v57, %v654_v58  ;;  %v675_v15 = vmul.f32 %v674_v8, %v672_v49 }
 0x1d8   : > { %v931_v34 = vrot.slane %v929_v59, 1  ;;  %1205 = vrot.lane.b32.xlu1 %v2625_v22, %s1927_s24  ;;  %915 = vrot.lane.b32.xlu0 %v2651_v46, %s1928_s6  ;;  %v734_v8 = vstv %s2712_s10  ;;  %s1656_s10 = sld [smem:[#allocation7 + $0x49]] }
 0x1d9   : > { %v647_v45 = vadd.f32 %v646_v54, %v640_v30  ;;  %v972_v4 = vpop.permute.xlu1 %971  ;;  %v682_v5 = vpop.permute.xlu0 %681  ;;  %v723_v54 = vstv %s2693_s8  ;;  %s2813_s8 = sld [smem:[#allocation7 + $0x46]] }
 0x1da   : > { %v973_v9 = vrot.slane %v972_v4, 6  ;;  %v933_v18 = vsel %vm217_vm1, %v925_v17, %v931_v34  ;;  %v683_v31 = vsel %vm2278_vm6, %v682_v5, 0.0 }
 0x1db   : > { %v651_v11 = vadd.f32 %v650_v60, %v647_v45  ;;  %v2683_v12 = vsel %vm2123_vm2, %v933_v18, 0.0  ;;  %v686_v61 = vmul.f32 %v685_v28, %v683_v31  ;;  %v727_v60 = vstv %s2701_s9  ;;  %s1655_s9 = sld [smem:[#allocation7 + $0x48]] }
 0x1dc   : > { %v974_v14 = vsel %vm223_vm0, %v973_v9, %v972_v4  ;;  %946 = vrot.lane.b32.xlu1 %v2683_v12, %s1928_s6  ;;  %935 = vrot.lane.b32.xlu0 %v2683_v12, %s1929_s12  ;;  %v728_v49 = vmul.f32 %v2215_v7, %v727_v60  ;;  %v794_v60 = vstv %s2767_s21  ;;  %s2882_s21 = sld [smem:[#allocation7 + $0x50]] }
 0x1dd   : > { %v658_v19 = vadd.f32 %v657_v62, %v651_v11  ;;  %v975_v1 = vrot.slane %v974_v14, 6  ;;  %v713_v24 = vpop.permute.xlu1 %712  ;;  %v702_v63 = vpop.permute.xlu0 %701 }
 0x1de   : > { %v703_v39 = vsel %vm2272_vm5, %v702_v63, 0.0  ;;  %v714_v52 = vsel %vm2278_vm6, %v713_v24, 0.0 }
 0x1df   : > { %v676_v33 = vadd.f32 %v675_v15, %v658_v19  ;;  %v976_v35 = vsel %vm223_vm0, %v975_v1, %v972_v4  ;;  %v706_v51 = vmul.f32 %v705_v38, %v703_v39  ;;  %v717_v34 = vmul.f32 %v716_v50, %v714_v52 }
 0x1e0   : > { %v978_v37 = vrot.slane %v976_v35, 1  ;;  %953 = vrot.lane.b32.xlu1 %v2403_v41, %s1929_s12  ;;  %1236 = vrot.lane.b32.xlu0 %v2696_v27, %s1926_s27  ;;  %v752_v1 = vstv %s2732_s11  ;;  %v756_v35 = vstv %s2735_s13  ;;  %s1657_s11 = sld [smem:[#allocation7 + $0x4a]] }
 0x1e1   : > { %v680_v17 = vadd.f32 %v679_v56, %v676_v33  ;;  %v720_v36 = vpop.permute.xlu1 %719  ;;  %v1003_v2 = vpop.permute.xlu0 %1002  ;;  %v2770_v33 = vld [vmem:[%s2078_s29 + $0x1c] sm:$0x3]  ;;  %s1658_s13 = sld [smem:[#allocation7 + $0x4b]] }
 0x1e2   : > { %v1004_v43 = vrot.slane %v1003_v2, 6  ;;  %v980_v16 = vsel %vm216_vm3, %v972_v4, %v978_v37  ;;  %v721_v29 = vsel %vm2272_vm5, %v720_v36, 0.0 }
 0x1e3   : > { %v687_v44 = vadd.f32 %v686_v61, %v680_v17  ;;  %v2720_v53 = vsel %vm2147_vm4, %v980_v16, 0.0  ;;  %v724_v62 = vmul.f32 %v723_v54, %v721_v29  ;;  %v763_v61 = vstv %s2746_s23  ;;  %s2864_s23 = sld [smem:[#allocation7 + $0x4c]] }
 0x1e4   : > { %v1005_v3 = vsel %vm223_vm0, %v1004_v43, %v1003_v2  ;;  %982 = vrot.lane.b32.xlu1 %v2720_v53, %s1929_s12  ;;  %964 = vrot.lane.b32.xlu0 %v2403_v41, %s1928_s6 }
 0x1e5   : > { %v707_v57 = vadd.f32 %v706_v51, %v687_v44  ;;  %v1006_v58 = vrot.slane %v1005_v3, 6  ;;  %v749_v30 = vpop.permute.xlu1 %748  ;;  %v731_v59 = vpop.permute.xlu0 %730  ;;  %v783_v44 = vstv %s2751_s28  ;;  %v787_v3 = vstv %s2757_s20  ;;  %s2866_s28 = sld [smem:[#allocation7 + $0x4d]] }
 0x1e6   : > { %v732_v41 = vsel %vm2278_vm6, %v731_v59, 0.0  ;;  %v750_v7 = vsel %vm2272_vm5, %v749_v30, 0.0  ;;  %s2875_s20 = sld [smem:[#allocation7 + $0x4f]] }
 0x1e7   : > { %v711_v45 = vadd.f32 %v710_v55, %v707_v57  ;;  %v1007_v4 = vsel %vm223_vm0, %v1006_v58, %v1003_v2  ;;  %v735_v15 = vmul.f32 %v734_v8, %v732_v41  ;;  %v753_v37 = vmul.f32 %v752_v1, %v750_v7  ;;  %v1802_v7 = vld [vmem:[%s2078_s29 + $0xe] sm:$0x3] }
 0x1e8   : > { %v1009_v5 = vrot.slane %v1007_v4, 1  ;;  %1283 = vrot.lane.b32.xlu1 %v2696_v27, %s1927_s24  ;;  %993 = vrot.lane.b32.xlu0 %v2720_v53, %s1928_s6  ;;  %v788_v4 = vmul.f32 %v787_v3, %v2535_v47  ;;  %v805_v41 = vstv %s2783_s4  ;;  %s2889_s4 = sld [smem:[#allocation7 + $0x52]] }
 0x1e9   : > { %v718_v40 = vadd.f32 %v717_v34, %v711_v45  ;;  %v1050_v9 = vpop.permute.xlu1 %1049  ;;  %v760_v18 = vpop.permute.xlu0 %759  ;;  %v801_v45 = vstv %s2773_s30  ;;  %s2887_s30 = sld [smem:[#allocation7 + $0x51]] }
 0x1ea   : > { %v1051_v11 = vrot.slane %v1050_v9, 6  ;;  %v1011_v13 = vsel %vm217_vm1, %v1003_v2, %v1009_v5  ;;  %v761_v36 = vsel %vm2278_vm6, %v760_v18, 0.0  ;;  %v757_v2 = vmul.f32 %v756_v35, %v2502_v10 }
 0x1eb   : > { %v725_v14 = vadd.f32 %v724_v62, %v718_v40  ;;  %v2755_v19 = vsel %vm2123_vm2, %v1011_v13, 0.0  ;;  %v764_v29 = vmul.f32 %v763_v61, %v761_v36  ;;  %v834_v36 = vstv %s2813_s8  ;;  %s2914_s8 = sld [smem:[#allocation7 + $0x55]] }
 0x1ec   : > { %v1052_v24 = vsel %vm223_vm0, %v1051_v11, %v1050_v9  ;;  %1024 = vrot.lane.b32.xlu1 %v2755_v19, %s1928_s6  ;;  %1013 = vrot.lane.b32.xlu0 %v2755_v19, %s1929_s12  ;;  %v812_v11 = vstv %s2791_s7  ;;  %s2895_s7 = sld [smem:[#allocation7 + $0x53]] }
 0x1ed   : > { %v729_v63 = vadd.f32 %v728_v49, %v725_v14  ;;  %v1053_v28 = vrot.slane %v1052_v24, 6  ;;  %v791_v31 = vpop.permute.xlu1 %790  ;;  %v780_v56 = vpop.permute.xlu0 %779  ;;  %v806_v24 = vmul.f32 %v1802_v7, %v805_v41 }
 0x1ee   : > { %v781_v50 = vsel %vm2272_vm5, %v780_v56, 0.0  ;;  %v792_v34 = vsel %vm2278_vm6, %v791_v31, 0.0 }
 0x1ef   : > { %v736_v38 = vadd.f32 %v735_v15, %v729_v63  ;;  %v1054_v39 = vsel %vm223_vm0, %v1053_v28, %v1050_v9  ;;  %v784_v58 = vmul.f32 %v783_v44, %v781_v50  ;;  %v795_v40 = vmul.f32 %v794_v60, %v792_v34 }
 0x1f0   : > { %v1056_v17 = vrot.slane %v1054_v39, 1  ;;  %1031 = vrot.lane.b32.xlu1 %v2477_v48, %s1929_s12  ;;  %1314 = vrot.lane.b32.xlu0 %v2770_v33, %s1926_s27  ;;  %v835_v44 = vmul.f32 %v834_v36, %v2559_v0  ;;  %v872_v34 = vstv %s1657_s11  ;;  %s2954_s11 = sld [smem:[#allocation7 + $0x59]] }
 0x1f1   : > { %v754_v42 = vadd.f32 %v753_v37, %v736_v38  ;;  %v1081_v43 = vpop.permute.xlu0 %1080  ;;  %v798_v16 = vpop.permute.xlu1 %797  ;;  %v2836_v37 = vld [vmem:[%s2078_s29 + $0x1e] sm:$0x3]  ;;  %v830_v38 = vstv %s2809_s5  ;;  %s2897_s5 = sld [smem:[#allocation7 + $0x54]] }
 0x1f2   : > { %v1082_v51 = vrot.slane %v1081_v43, 6  ;;  %v1058_v52 = vsel %vm216_vm3, %v1050_v9, %v1056_v17  ;;  %v799_v62 = vsel %vm2272_vm5, %v798_v16, 0.0 }
 0x1f3   : > { %v758_v54 = vadd.f32 %v757_v2, %v754_v42  ;;  %v2795_v10 = vsel %vm2147_vm4, %v1058_v52, 0.0  ;;  %v802_v9 = vmul.f32 %v801_v45, %v799_v62  ;;  %v879_v62 = vstv %s1658_s13  ;;  %s2958_s13 = sld [smem:[#allocation7 + $0x5a]] }
 0x1f4   : > { %v1083_v55 = vsel %vm223_vm0, %v1082_v51, %v1081_v43  ;;  %1060 = vrot.lane.b32.xlu1 %v2795_v10, %s1929_s12  ;;  %1042 = vrot.lane.b32.xlu0 %v2477_v48, %s1928_s6 }
 0x1f5   : > { %v765_v57 = vadd.f32 %v764_v29, %v758_v54  ;;  %v1084_v30 = vrot.slane %v1083_v55, 6  ;;  %v827_v59 = vpop.permute.xlu1 %826  ;;  %v809_v18 = vpop.permute.xlu0 %808  ;;  %v861_v29 = vstv %s1655_s9  ;;  %s2936_s9 = sld [smem:[#allocation7 + $0x57]] }
 0x1f6   : > { %v810_v13 = vsel %vm2278_vm6, %v809_v18, 0.0  ;;  %v828_v39 = vsel %vm2272_vm5, %v827_v59, 0.0 }
 0x1f7   : > { %v785_v5 = vadd.f32 %v784_v58, %v765_v57  ;;  %v1085_v48 = vsel %vm223_vm0, %v1084_v30, %v1081_v43  ;;  %v813_v56 = vmul.f32 %v812_v11, %v810_v13  ;;  %v865_v58 = vstv %s1656_s10  ;;  %s2943_s10 = sld [smem:[#allocation7 + $0x58]] }
 0x1f8   : > { %v1087_v8 = vrot.slane %v1085_v48, 1  ;;  %1361 = vrot.lane.b32.xlu1 %v2770_v33, %s1927_s24  ;;  %1071 = vrot.lane.b32.xlu0 %v2795_v10, %s1928_s6  ;;  %v890_v13 = vstv %s2866_s28  ;;  %s2971_s28 = sld [smem:[#allocation7 + $0x5c]] }
 0x1f9   : > { %v789_v49 = vadd.f32 %v788_v4, %v785_v5  ;;  %v1128_v47 = vpop.permute.xlu1 %1127  ;;  %v838_v0 = vpop.permute.xlu0 %837  ;;  %v866_v4 = vmul.f32 %v865_v58, %v2611_v21 }
 0x1fa   : > { %v1129_v14 = vrot.slane %v1128_v47, 6  ;;  %v1089_v15 = vsel %vm217_vm1, %v1081_v43, %v1087_v8  ;;  %v831_v43 = vmul.f32 %v830_v38, %v828_v39 }
 0x1fb   : > { %v796_v1 = vadd.f32 %v795_v40, %v789_v49  ;;  %v2828_v63 = vsel %vm2123_vm2, %v1089_v15, 0.0  ;;  %v883_v49 = vstv %s2864_s23  ;;  %s2960_s23 = sld [smem:[#allocation7 + $0x5b]] }
 0x1fc   : > { %v1130_v28 = vsel %vm223_vm0, %v1129_v14, %v1128_v47  ;;  %1102 = vrot.lane.b32.xlu1 %v2828_v63, %s1928_s6  ;;  %1091 = vrot.lane.b32.xlu0 %v2828_v63, %s1929_s12 }
 0x1fd   : > { %v803_v31 = vadd.f32 %v802_v9, %v796_v1  ;;  %v1131_v35 = vrot.slane %v1130_v28, 6  ;;  %v1803_v1 = vld [vmem:[%s2078_s29 + $0x10] sm:$0x3] }
 0x1fe   : > { %v884_v7 = vmul.f32 %v1803_v1, %v883_v49 }
 0x1ff   : > { %v807_v17 = vadd.f32 %v806_v24, %v803_v31  ;;  %v1132_v61 = vsel %vm223_vm0, %v1131_v35, %v1128_v47 }
 0x200   : > { %v1134_v2 = vrot.slane %v1132_v61, 1  ;;  %1392 = vrot.lane.b32.xlu0 %v2836_v37, %s1926_s27  ;;  %1109 = vrot.lane.b32.xlu1 %v2543_v25, %s1929_s12  ;;  %s1653_s27 = sld [smem:[#allocation7 + $0x47]] }
 0x201   : > { %v814_v42 = vadd.f32 %v813_v56, %v807_v17 }
 0x202   : > { %v1136_v16 = vsel %vm216_vm3, %v1128_v47, %v1134_v2 }
 0x203   : > { %v832_v50 = vadd.f32 %v831_v43, %v814_v42  ;;  %v2852_v51 = vsel %vm2147_vm4, %v1136_v16, 0.0  ;;  %v912_v42 = vstv %s2875_s20  ;;  %s2984_s20 = sld [smem:[#allocation7 + $0x5e]] }
 0x204   : > { %1120 = vrot.lane.b32.xlu0 %v2543_v25, %s1928_s6  ;;  %1138 = vrot.lane.b32.xlu1 %v2852_v51, %s1929_s12  ;;  %v839_v25 = vsel %vm2278_vm6, %v838_v0, 0.0 }
 0x205   : > { %v836_v52 = vadd.f32 %v835_v44, %v832_v50 }
 0x206   : > { %v841_v54 = vstv %s1653_s27  ;;  %s2920_s27 = sld [smem:[#allocation7 + $0x56]] }
 0x207   : > { %v842_v3 = vmul.f32 %v841_v54, %v839_v25  ;;  %v919_v54 = vstv %s2882_s21  ;;  %s2995_s21 = sld [smem:[#allocation7 + $0x5f]] }
 0x208   : > { %1149 = vrot.lane.b32.xlu0 %v2852_v51, %s1928_s6  ;;  %1439 = vrot.lane.b32.xlu1 %v2836_v37, %s1927_s24  ;;  %s2872_s24 = sld [smem:[#allocation7 + $0x4e]] }
 0x209   : > { %v843_v59 = vadd.f32 %v842_v3, %v836_v52 }
 0x20e   : > { %v908_v39 = vstv %s2872_s24  ;;  %s2979_s24 = sld [smem:[#allocation7 + $0x5d]] }
 0x23e   : > { %v869_v55 = vpop.permute.xlu1 %868  ;;  %v858_v57 = vpop.permute.xlu0 %857 }
 0x23f   : > { %v859_v30 = vsel %vm2272_vm5, %v858_v57, 0.0  ;;  %v870_v45 = vsel %vm2278_vm6, %v869_v55, 0.0 }
 0x240   : > { %v862_v60 = vmul.f32 %v861_v29, %v859_v30  ;;  %v873_v9 = vmul.f32 %v872_v34, %v870_v45  ;;  %v913_v29 = vmul.f32 %v912_v42, %v2651_v46  ;;  %v939_v30 = vstv %s2887_s30  ;;  %s3015_s30 = sld [smem:[#allocation7 + $0x60]] }
 0x242   : > { %v863_v5 = vadd.f32 %v862_v60, %v843_v59  ;;  %v876_v48 = vpop.permute.xlu1 %875  ;;  %v1159_v8 = vpop.permute.xlu0 %1158 }
 0x243   : > { %v877_v41 = vsel %vm2272_vm5, %v876_v48, 0.0  ;;  %v1160_v40 = vrot.slane %v1159_v8, 6 }
 0x244   : > { %v867_v18 = vadd.f32 %v866_v4, %v863_v5  ;;  %v880_v47 = vmul.f32 %v879_v62, %v877_v41  ;;  %v943_v62 = vstv %s2889_s4  ;;  %v950_v5 = vstv %s2895_s7  ;;  %s3018_s4 = sld [smem:[#allocation7 + $0x61]] }
 0x245   : > { %v1161_v11 = vsel %vm223_vm0, %v1160_v40, %v1159_v8  ;;  %s3025_s7 = sld [smem:[#allocation7 + $0x62]] }
 0x246   : > { %v874_v21 = vadd.f32 %v873_v9, %v867_v18  ;;  %v1162_v14 = vrot.slane %v1161_v11, 6  ;;  %v905_v15 = vpop.permute.xlu1 %904  ;;  %v887_v24 = vpop.permute.xlu0 %886 }
 0x247   : > { %v888_v28 = vsel %vm2278_vm6, %v887_v24, 0.0  ;;  %v906_v17 = vsel %vm2272_vm5, %v905_v15, 0.0 }
 0x248   : > { %v881_v31 = vadd.f32 %v880_v47, %v874_v21  ;;  %v1163_v56 = vsel %vm223_vm0, %v1162_v14, %v1159_v8  ;;  %v891_v35 = vmul.f32 %v890_v13, %v888_v28  ;;  %v909_v44 = vmul.f32 %v908_v39, %v906_v17  ;;  %v1804_v39 = vld [vmem:[%s2078_s29 + $0x12] sm:$0x3] }
 0x249   : > { %v1165_v38 = vrot.slane %v1163_v56, 1  ;;  %v961_v14 = vstv %s2914_s8  ;;  %s3036_s8 = sld [smem:[#allocation7 + $0x64]] }
 0x24a   : > { %v885_v61 = vadd.f32 %v884_v7, %v881_v31  ;;  %v1206_v36 = vpop.permute.xlu1 %1205  ;;  %v916_v2 = vpop.permute.xlu0 %915  ;;  %v968_v31 = vstv %s2920_s27  ;;  %v962_v17 = vmul.f32 %v1804_v39, %v961_v14  ;;  %v1035_v14 = vstv %s2979_s24  ;;  %s3046_s27 = sld [smem:[#allocation7 + $0x65]] }
 0x24b   : > { %v1207_v43 = vrot.slane %v1206_v36, 6  ;;  %v1167_v16 = vsel %vm217_vm1, %v1159_v8, %v1165_v38  ;;  %v917_v25 = vsel %vm2278_vm6, %v916_v2, 0.0  ;;  %v957_v8 = vstv %s2897_s5  ;;  %s3030_s5 = sld [smem:[#allocation7 + $0x63]] }
 0x24c   : > { %v892_v50 = vadd.f32 %v891_v35, %v885_v61  ;;  %v2904_v52 = vsel %vm2123_vm2, %v1167_v16, 0.0  ;;  %v920_v45 = vmul.f32 %v919_v54, %v917_v25  ;;  %v986_v16 = vstv %s2936_s9  ;;  %s3049_s9 = sld [smem:[#allocation7 + $0x66]] }
 0x24d   : > { %v1208_v0 = vsel %vm223_vm0, %v1207_v43, %v1206_v36  ;;  %1180 = vrot.lane.b32.xlu1 %v2904_v52, %s1928_s6  ;;  %1169 = vrot.lane.b32.xlu0 %v2904_v52, %s1929_s12  ;;  %s1695_s24 = sld [smem:[#allocation7 + $0x6c]] }
 0x24e   : > { %v910_v3 = vadd.f32 %v909_v44, %v892_v50  ;;  %v1209_v55 = vrot.slane %v1208_v0, 6  ;;  %v947_v57 = vpop.permute.xlu1 %946  ;;  %v936_v58 = vpop.permute.xlu0 %935 }
 0x24f   : > { %v937_v59 = vsel %vm2272_vm5, %v936_v58, 0.0  ;;  %v948_v49 = vsel %vm2278_vm6, %v947_v57, 0.0 }
 0x250   : > { %v1210_v60 = vsel %vm223_vm0, %v1209_v55, %v1206_v36  ;;  %v914_v34 = vadd.f32 %v913_v29, %v910_v3  ;;  %v940_v48 = vmul.f32 %v939_v30, %v937_v59  ;;  %v951_v15 = vmul.f32 %v950_v5, %v948_v49 }
 0x251   : > { %v1212_v4 = vrot.slane %v1210_v60, 1  ;;  %1198 = vrot.lane.b32.xlu1 %v2625_v22, %s1928_s6  ;;  %1187 = vrot.lane.b32.xlu0 %v2625_v22, %s1929_s12  ;;  %v944_v22 = vmul.f32 %v943_v62, %v2683_v12  ;;  %v990_v29 = vstv %s2943_s10  ;;  %v997_v60 = vstv %s2954_s11  ;;  %s3059_s10 = sld [smem:[#allocation7 + $0x67]] }
 0x252   : > { %v921_v46 = vadd.f32 %v920_v45, %v914_v34  ;;  %v954_v41 = vpop.permute.xlu1 %953  ;;  %v1237_v40 = vpop.permute.xlu0 %1236  ;;  %v991_v45 = vmul.f32 %v990_v29, %v2720_v53  ;;  %v1017_v5 = vstv %s2958_s13  ;;  %v1021_v49 = vstv %s2960_s23  ;;  %s3067_s11 = sld [smem:[#allocation7 + $0x68]] }
 0x253   : > { %v955_v9 = vsel %vm2272_vm5, %v954_v41, 0.0  ;;  %v1238_v18 = vrot.slane %v1237_v40, 6  ;;  %v1214_v47 = vsel %vm216_vm3, %v1206_v36, %v1212_v4  ;;  %s3085_s13 = sld [smem:[#allocation7 + $0x69]]  ;;  %v1173_v32 = vstv %s1695_s24 }
 0x254   : > { %v941_v11 = vadd.f32 %v940_v48, %v921_v46  ;;  %v2941_v13 = vsel %vm2147_vm4, %v1214_v47, 0.0  ;;  %v958_v12 = vmul.f32 %v957_v8, %v955_v9  ;;  %s3089_s23 = sld [smem:[#allocation7 + $0x6a]] }
 0x255   : > { %v1239_v21 = vsel %vm223_vm0, %v1238_v18, %v1237_v40  ;;  %1227 = vrot.lane.b32.xlu1 %v2941_v13, %s1928_s6  ;;  %1216 = vrot.lane.b32.xlu0 %v2941_v13, %s1929_s12  ;;  %s1713_s24 = sld [smem:[#allocation7 + $0x7d]] }
 0x256   : > { %v945_v1 = vadd.f32 %v944_v22, %v941_v11  ;;  %v1240_v7 = vrot.slane %v1239_v21, 6  ;;  %v983_v24 = vpop.permute.xlu1 %982  ;;  %v965_v28 = vpop.permute.xlu0 %964  ;;  %v1028_v22 = vstv %s2971_s28  ;;  %s1693_s28 = sld [smem:[#allocation7 + $0x6b]] }
 0x257   : > { %v966_v56 = vsel %vm2278_vm6, %v965_v28, 0.0  ;;  %v984_v44 = vsel %vm2272_vm5, %v983_v24, 0.0 }
 0x258   : > { %v952_v35 = vadd.f32 %v951_v15, %v945_v1  ;;  %v1241_v38 = vsel %vm223_vm0, %v1240_v7, %v1237_v40  ;;  %v969_v2 = vmul.f32 %v968_v31, %v966_v56  ;;  %v987_v55 = vmul.f32 %v986_v16, %v984_v44 }
 0x259   : > { %v1243_v61 = vrot.slane %v1241_v38, 1  ;;  %v1039_v56 = vstv %s2984_s20  ;;  %s1696_s20 = sld [smem:[#allocation7 + $0x6d]] }
 0x25a   : > { %v959_v36 = vadd.f32 %v958_v12, %v952_v35  ;;  %v1284_v42 = vpop.permute.xlu1 %1283  ;;  %v994_v43 = vpop.permute.xlu0 %993  ;;  %v1022_v12 = vmul.f32 %v1021_v49, %v2755_v19 }
 0x25b   : > { %v1285_v50 = vrot.slane %v1284_v42, 6  ;;  %v1245_v0 = vsel %vm217_vm1, %v1237_v40, %v1243_v61  ;;  %v995_v34 = vsel %vm2278_vm6, %v994_v43, 0.0 }
 0x25c   : > { %v963_v54 = vadd.f32 %v962_v17, %v959_v36  ;;  %v2969_v25 = vsel %vm2123_vm2, %v1245_v0, 0.0  ;;  %v998_v53 = vmul.f32 %v997_v60, %v995_v34  ;;  %v1046_v36 = vstv %s2995_s21  ;;  %s1697_s21 = sld [smem:[#allocation7 + $0x6e]] }
 0x25d   : > { %v1286_v3 = vsel %vm223_vm0, %v1285_v50, %v1284_v42  ;;  %1258 = vrot.lane.b32.xlu1 %v2969_v25, %s1928_s6  ;;  %1247 = vrot.lane.b32.xlu0 %v2969_v25, %s1929_s12  ;;  %v1153_v6 = vstv %s1693_s28  ;;  %s1712_s28 = sld [smem:[#allocation7 + $0x7c]] }
 0x25e   : > { %v970_v57 = vadd.f32 %v969_v2, %v963_v54  ;;  %v1287_v58 = vrot.slane %v1286_v3, 6  ;;  %v1025_v30 = vpop.permute.xlu1 %1024  ;;  %v1014_v59 = vpop.permute.xlu0 %1013 }
 0x25f   : > { %v1015_v48 = vsel %vm2272_vm5, %v1014_v59, 0.0 }
 0x260   : > { %v988_v62 = vadd.f32 %v987_v55, %v970_v57  ;;  %v1288_v4 = vsel %vm223_vm0, %v1287_v58, %v1284_v42  ;;  %v1018_v11 = vmul.f32 %v1017_v5, %v1015_v48  ;;  %v1064_v55 = vstv %s3015_s30  ;;  %s1698_s30 = sld [smem:[#allocation7 + $0x6f]] }
 0x261   : > { %v1290_v46 = vrot.slane %v1288_v4, 1  ;;  %1276 = vrot.lane.b32.xlu1 %v2696_v27, %s1928_s6  ;;  %1265 = vrot.lane.b32.xlu0 %v2696_v27, %s1929_s12  ;;  %v1026_v27 = vsel %vm2278_vm6, %v1025_v30, 0.0  ;;  %v1075_v48 = vstv %s3025_s7  ;;  %s1700_s7 = sld [smem:[#allocation7 + $0x71]] }
 0x262   : > { %v992_v8 = vadd.f32 %v991_v45, %v988_v62  ;;  %v1032_v41 = vpop.permute.xlu1 %1031  ;;  %v1315_v40 = vpop.permute.xlu0 %1314  ;;  %v1029_v35 = vmul.f32 %v1028_v22, %v1026_v27  ;;  %v1068_v45 = vstv %s3018_s4  ;;  %s1699_s4 = sld [smem:[#allocation7 + $0x70]] }
 0x263   : > { %v1316_v9 = vrot.slane %v1315_v40, 6  ;;  %v1292_v18 = vsel %vm216_vm3, %v1284_v42, %v1290_v46  ;;  %v1033_v15 = vsel %vm2272_vm5, %v1032_v41, 0.0  ;;  %v1805_v42 = vld [vmem:[%s2078_s29 + $0x14] sm:$0x3] }
 0x264   : > { %v999_v47 = vadd.f32 %v998_v53, %v992_v8  ;;  %v3003_v21 = vsel %vm2147_vm4, %v1292_v18, 0.0  ;;  %v1036_v39 = vmul.f32 %v1035_v14, %v1033_v15  ;;  %v1040_v43 = vmul.f32 %v1805_v42, %v1039_v56 }
 0x265   : > { %v1317_v1 = vsel %vm223_vm0, %v1316_v9, %v1315_v40  ;;  %1305 = vrot.lane.b32.xlu1 %v3003_v21, %s1928_s6  ;;  %1294 = vrot.lane.b32.xlu0 %v3003_v21, %s1929_s12  ;;  %v1069_v53 = vmul.f32 %v1068_v45, %v2795_v10  ;;  %v1095_v9 = vstv %s3030_s5  ;;  %v1099_v14 = vstv %s3036_s8  ;;  %s1703_s5 = sld [smem:[#allocation7 + $0x74]] }
 0x266   : > { %v1019_v7 = vadd.f32 %v1018_v11, %v999_v47  ;;  %v1318_v24 = vrot.slane %v1317_v1, 6  ;;  %v1061_v28 = vpop.permute.xlu1 %1060  ;;  %v1043_v31 = vpop.permute.xlu0 %1042  ;;  %v1113_v56 = vstv %s3049_s9  ;;  %s1705_s8 = sld [smem:[#allocation7 + $0x75]] }
 0x267   : > { %v1044_v2 = vsel %vm2278_vm6, %v1043_v31, 0.0  ;;  %v1062_v57 = vsel %vm2272_vm5, %v1061_v28, 0.0  ;;  %v1106_v28 = vstv %s3046_s27  ;;  %s3139_s27 = sld [smem:[#allocation7 + $0x76]] }
 0x268   : > { %v1023_v38 = vadd.f32 %v1022_v12, %v1019_v7  ;;  %v1319_v17 = vsel %vm223_vm0, %v1318_v24, %v1315_v40  ;;  %v1047_v29 = vmul.f32 %v1046_v36, %v1044_v2  ;;  %v1065_v62 = vmul.f32 %v1064_v55, %v1062_v57  ;;  %s3143_s9 = sld [smem:[#allocation7 + $0x77]] }
 0x269   : > { %v1321_v61 = vrot.slane %v1319_v17, 1  ;;  %v1117_v36 = vstv %s3059_s10  ;;  %s3145_s10 = sld [smem:[#allocation7 + $0x78]] }
 0x26a   : > { %v1030_v19 = vadd.f32 %v1029_v35, %v1023_v38  ;;  %v1362_v16 = vpop.permute.xlu1 %1361  ;;  %v1072_v44 = vpop.permute.xlu0 %1071  ;;  %v1100_v38 = vmul.f32 %v1099_v14, %v2828_v63 }
 0x26b   : > { %v1363_v50 = vrot.slane %v1362_v16, 6  ;;  %v1323_v0 = vsel %vm217_vm1, %v1315_v40, %v1321_v61  ;;  %v1073_v8 = vsel %vm2278_vm6, %v1072_v44, 0.0  ;;  %v1124_v44 = vstv %s3067_s11  ;;  %s3149_s11 = sld [smem:[#allocation7 + $0x79]] }
 0x26c   : > { %v1037_v54 = vadd.f32 %v1036_v39, %v1030_v19  ;;  %v3034_v3 = vsel %vm2123_vm2, %v1323_v0, 0.0  ;;  %v1076_v27 = vmul.f32 %v1075_v48, %v1073_v8 }
 0x26d   : > { %v1364_v58 = vsel %vm223_vm0, %v1363_v50, %v1362_v16  ;;  %1336 = vrot.lane.b32.xlu1 %v3034_v3, %s1928_s6  ;;  %1325 = vrot.lane.b32.xlu0 %v3034_v3, %s1929_s12 }
 0x26e   : > { %v1041_v30 = vadd.f32 %v1040_v43, %v1037_v54  ;;  %v1365_v59 = vrot.slane %v1364_v58, 6  ;;  %v1103_v60 = vpop.permute.xlu1 %1102  ;;  %v1092_v34 = vpop.permute.xlu0 %1091 }
 0x26f   : > { %v1093_v18 = vsel %vm2272_vm5, %v1092_v34, 0.0  ;;  %v1104_v31 = vsel %vm2278_vm6, %v1103_v60, 0.0  ;;  %v1142_v34 = vstv %s3085_s13  ;;  %s1710_s13 = sld [smem:[#allocation7 + $0x7a]] }
 0x270   : > { %v1048_v4 = vadd.f32 %v1047_v29, %v1041_v30  ;;  %v1366_v46 = vsel %vm223_vm0, %v1365_v59, %v1362_v16  ;;  %v1096_v12 = vmul.f32 %v1095_v9, %v1093_v18  ;;  %v1107_v2 = vmul.f32 %v1106_v28, %v1104_v31  ;;  %v1806_v29 = vld [vmem:[%s2078_s29 + $0x16] sm:$0x3] }
 0x271   : > { %v1368_v5 = vrot.slane %v1366_v46, 1  ;;  %1354 = vrot.lane.b32.xlu1 %v2770_v33, %s1928_s6  ;;  %1343 = vrot.lane.b32.xlu0 %v2770_v33, %s1929_s12  ;;  %v1118_v55 = vmul.f32 %v1806_v29, %v1117_v36  ;;  %v1202_v36 = vstv %s1700_s7  ;;  %s1720_s7 = sld [smem:[#allocation7 + $0x83]] }
 0x272   : > { %v1066_v41 = vadd.f32 %v1065_v62, %v1048_v4  ;;  %v1393_v40 = vpop.permute.xlu0 %1392  ;;  %v1110_v49 = vpop.permute.xlu1 %1109  ;;  %v1146_v4 = vstv %s3089_s23  ;;  %s1711_s23 = sld [smem:[#allocation7 + $0x7b]] }
 0x273   : > { %v1394_v47 = vrot.slane %v1393_v40, 6  ;;  %v1370_v22 = vsel %vm216_vm3, %v1362_v16, %v1368_v5  ;;  %v1111_v35 = vsel %vm2272_vm5, %v1110_v49, 0.0 }
 0x274   : > { %v1070_v11 = vadd.f32 %v1069_v53, %v1066_v41  ;;  %v3071_v10 = vsel %vm2147_vm4, %v1370_v22, 0.0  ;;  %v1114_v42 = vmul.f32 %v1113_v56, %v1111_v35  ;;  %v1147_v53 = vmul.f32 %v1146_v4, %v2852_v51 }
 0x275   : > { %v1395_v15 = vsel %vm223_vm0, %v1394_v47, %v1393_v40  ;;  %1383 = vrot.lane.b32.xlu1 %v3071_v10, %s1928_s6  ;;  %1372 = vrot.lane.b32.xlu0 %v3071_v10, %s1929_s12  ;;  %v1195_v56 = vstv %s1699_s4  ;;  %s3172_s4 = sld [smem:[#allocation7 + $0x81]] }
 0x276   : > { %v1077_v1 = vadd.f32 %v1076_v27, %v1070_v11  ;;  %v1396_v7 = vrot.slane %v1395_v15, 6  ;;  %v1139_v24 = vpop.permute.xlu1 %1138  ;;  %v1121_v43 = vpop.permute.xlu0 %1120  ;;  %v1177_v11 = vstv %s1696_s20  ;;  %s1715_s20 = sld [smem:[#allocation7 + $0x7e]] }
 0x277   : > { %v1122_v50 = vsel %vm2278_vm6, %v1121_v43, 0.0  ;;  %v1140_v45 = vsel %vm2272_vm5, %v1139_v24, 0.0  ;;  %v1178_v24 = vmul.f32 %v1177_v11, %v2904_v52 }
 0x278   : > { %v1097_v39 = vadd.f32 %v1096_v12, %v1077_v1  ;;  %v1397_v17 = vsel %vm223_vm0, %v1396_v7, %v1393_v40  ;;  %v1125_v59 = vmul.f32 %v1124_v44, %v1122_v50  ;;  %v1143_v48 = vmul.f32 %v1142_v34, %v1140_v45 }
 0x279   : > { %v1399_v61 = vrot.slane %v1397_v17, 1  ;;  %v1184_v1 = vstv %s1697_s21  ;;  %v1191_v7 = vstv %s1698_s30  ;;  %s3166_s21 = sld [smem:[#allocation7 + $0x7f]] }
 0x27a   : > { %v1101_v19 = vadd.f32 %v1100_v38, %v1097_v39  ;;  %v1440_v16 = vpop.permute.xlu1 %1439  ;;  %v1150_v9 = vpop.permute.xlu0 %1149  ;;  %s3170_s30 = sld [smem:[#allocation7 + $0x80]] }
 0x27b   : > { %v1441_v0 = vrot.slane %v1440_v16, 6  ;;  %v1401_v63 = vsel %vm217_vm1, %v1393_v40, %v1399_v61  ;;  %v1151_v51 = vsel %vm2278_vm6, %v1150_v9, 0.0  ;;  %v1269_v9 = vstv %s3145_s10  ;;  %s3196_s10 = sld [smem:[#allocation7 + $0x8a]] }
 0x27c   : > { %v1108_v54 = vadd.f32 %v1107_v2, %v1101_v19  ;;  %v3100_v57 = vsel %vm2123_vm2, %v1401_v63, 0.0  ;;  %v1154_v18 = vmul.f32 %v1153_v6, %v1151_v51  ;;  %v1807_v19 = vld [vmem:[%s2078_s29 + $0x18] sm:$0x3] }
 0x27d   : > { %v1442_v58 = vsel %vm223_vm0, %v1441_v0, %v1440_v16  ;;  %1414 = vrot.lane.b32.xlu1 %v3100_v57, %s1928_s6  ;;  %1403 = vrot.lane.b32.xlu0 %v3100_v57, %s1929_s12 }
 0x27e   : > { %v1115_v30 = vadd.f32 %v1114_v42, %v1108_v54  ;;  %v1443_v60 = vrot.slane %v1442_v58, 6  ;;  %v1196_v42 = vmul.f32 %v1807_v19, %v1195_v56 }
 0x280   : > { %v1119_v62 = vadd.f32 %v1118_v55, %v1115_v30  ;;  %v1444_v20 = vsel %vm223_vm0, %v1443_v60, %v1440_v16  ;;  %v1231_v30 = vstv %s1703_s5  ;;  %s1723_s5 = sld [smem:[#allocation7 + $0x86]] }
 0x281   : > { %v1446_v46 = vrot.slane %v1444_v20, 1  ;;  %1432 = vrot.lane.b32.xlu1 %v2836_v37, %s1928_s6  ;;  %1421 = vrot.lane.b32.xlu0 %v2836_v37, %s1929_s12 }
 0x282   : > { %v1126_v5 = vadd.f32 %v1125_v59, %v1119_v62  ;;  %v1251_v62 = vstv %s1705_s8  ;;  %s1725_s8 = sld [smem:[#allocation7 + $0x87]] }
 0x283   : > { %v1448_v8 = vsel %vm216_vm3, %v1440_v16, %v1446_v46 }
 0x284   : > { %v1144_v41 = vadd.f32 %v1143_v48, %v1126_v5  ;;  %v3121_v40 = vsel %vm2147_vm4, %v1448_v8, 0.0  ;;  %v1255_v48 = vstv %s3139_s27  ;;  %s3190_s27 = sld [smem:[#allocation7 + $0x88]] }
 0x285   : > { %1461 = vrot.lane.b32.xlu1 %v3121_v40, %s1928_s6  ;;  %1450 = vrot.lane.b32.xlu0 %v3121_v40, %s1929_s12  ;;  %s1701_s6 = sld [smem:[#allocation7 + $0x72]]  ;;  %v1256_v51 = vmul.f32 %v1255_v48, %v2969_v25  ;;  %v1298_v25 = vstv %s1711_s23 }
 0x286   : > { %v1148_v49 = vadd.f32 %v1147_v53, %v1144_v41  ;;  %s1702_s12 = sld [smem:[#allocation7 + $0x73]] }
 0x287   : > { %s1731_s23 = sld [smem:[#allocation7 + $0x8d]] }
 0x288   : > { %v1155_v14 = vadd.f32 %v1154_v18, %v1148_v49  ;;  %v1262_v49 = vstv %s3143_s9  ;;  %v1273_v18 = vstv %s3149_s11  ;;  %s3194_s9 = sld [smem:[#allocation7 + $0x89]] }
 0x289   : > { %s1729_s11 = sld [smem:[#allocation7 + $0x8b]] }
 0x28b   : > { %v1220_v50 = vstv %s1701_s6  ;;  %s1721_s6 = sld [smem:[#allocation7 + $0x84]] }
 0x28c   : > { %v1224_v29 = vstv %s1702_s12  ;;  %s1722_s12 = sld [smem:[#allocation7 + $0x85]] }
 0x28d   : > { %v1225_v60 = vmul.f32 %v1224_v29, %v2941_v13 }
 0x2bf   : > { %v1181_v47 = vpop.permute.xlu1 %1180  ;;  %v1170_v22 = vpop.permute.xlu0 %1169 }
 0x2c0   : > { %v1171_v27 = vsel %vm2272_vm5, %v1170_v22, 0.0  ;;  %v1182_v12 = vsel %vm2278_vm6, %v1181_v47, 0.0 }
 0x2c1   : > { %v1174_v15 = vmul.f32 %v1173_v32, %v1171_v27  ;;  %v1185_v38 = vmul.f32 %v1184_v1, %v1182_v12  ;;  %v1808_v1 = vld [vmem:[%s2078_s29 + $0x1a] sm:$0x3]  ;;  %s1719_s29 = sld [smem:[#allocation7 + $0x82]] }
 0x2c2   : > { %v1274_v12 = vmul.f32 %v1808_v1, %v1273_v18 }
 0x2c3   : > { %v1175_v28 = vadd.f32 %v1174_v15, %v1155_v14  ;;  %v1188_v31 = vpop.permute.xlu0 %1187  ;;  %v1199_v17 = vpop.permute.xlu1 %1198  ;;  %v1280_v14 = vstv %s1710_s13  ;;  %s1730_s13 = sld [smem:[#allocation7 + $0x8c]] }
 0x2c4   : > { %v1189_v35 = vsel %vm2272_vm5, %v1188_v31, 0.0  ;;  %v1200_v2 = vsel %vm2278_vm6, %v1199_v17, 0.0 }
 0x2c5   : > { %v1179_v39 = vadd.f32 %v1178_v24, %v1175_v28  ;;  %v1192_v61 = vmul.f32 %v1191_v7, %v1189_v35  ;;  %v1203_v16 = vmul.f32 %v1202_v36, %v1200_v2  ;;  %v1309_v2 = vstv %s1713_s24  ;;  %s1733_s24 = sld [smem:[#allocation7 + $0x8f]] }
 0x2c7   : > { %v1186_v43 = vadd.f32 %v1185_v38, %v1179_v39  ;;  %v1217_v52 = vpop.permute.xlu0 %1216  ;;  %v1228_v54 = vpop.permute.xlu1 %1227  ;;  %v1302_v39 = vstv %s1712_s28  ;;  %s1732_s28 = sld [smem:[#allocation7 + $0x8e]] }
 0x2c8   : > { %v1218_v0 = vsel %vm2272_vm5, %v1217_v52, 0.0  ;;  %v1229_v59 = vsel %vm2278_vm6, %v1228_v54, 0.0  ;;  %v1329_v52 = vstv %s1715_s20  ;;  %s1575_s20 = sshll.u32 %s2074_s18, 1 }
 0x2c9   : > { %v1193_v44 = vadd.f32 %v1192_v61, %v1186_v43  ;;  %v1221_v58 = vmul.f32 %v1220_v50, %v1218_v0  ;;  %v1232_v4 = vmul.f32 %v1231_v30, %v1229_v59  ;;  %v1347_v59 = vstv %s3172_s4 }
 0x2cb   : > { %v1197_v63 = vadd.f32 %v1196_v42, %v1193_v44  ;;  %v1303_v42 = vmul.f32 %v1302_v39, %v3003_v21  ;;  %v1425_v39 = vstv %s3196_s10 }
 0x2cd   : > { %v1204_v55 = vadd.f32 %v1203_v16, %v1197_v63  ;;  %v1333_v63 = vstv %s3166_s21  ;;  %s1735_s21 = sshll.u32 %s1975_s2, 5 }
 0x2cf   : > { %v1222_v34 = vadd.f32 %v1221_v58, %v1204_v55  ;;  %v1248_v45 = vpop.permute.xlu0 %1247  ;;  %v1259_v5 = vpop.permute.xlu1 %1258  ;;  %v1340_v58 = vstv %s3170_s30  ;;  %s203_s30 = scalar_lea.vmem [#allocation8], %s1575_s20 }
 0x2d0   : > { %v1249_v20 = vsel %vm2272_vm5, %v1248_v45, 0.0  ;;  %v1260_v13 = vsel %vm2278_vm6, %v1259_v5, 0.0  ;;  %v1351_v45 = vstv %s1719_s29  ;;  %v1358_v5 = vstv %s1720_s7  ;;  %s1483_s4 = sshll.u32 %s203_s30, 4  ;;  %s1484_s4 = int_to_ptr.vmem [resolvable:$true] %s1483_s4 }
 0x2d1   : > { %v1226_v46 = vadd.f32 %v1225_v60, %v1222_v34  ;;  %v1252_v53 = vmul.f32 %v1251_v62, %v1249_v20  ;;  %v1263_v47 = vmul.f32 %v1262_v49, %v1260_v13  ;;  %v1334_v60 = vmul.f32 %v1333_v63, %v3034_v3 }
 0x2d2   : > { %v1376_v3 = vstv %s1721_s6  ;;  %s1481_s6 = scalar_lea.hbm %s3258_s3, %s1735_s21 }
 0x2d3   : > { %v1233_v8 = vadd.f32 %v1232_v4, %v1226_v46  ;;  %v1266_v41 = vpop.permute.xlu0 %1265  ;;  %v1277_v11 = vpop.permute.xlu1 %1276 }
 0x2d4   : > { %v1267_v6 = vsel %vm2272_vm5, %v1266_v41, 0.0  ;;  %v1278_v15 = vsel %vm2278_vm6, %v1277_v11, 0.0 }
 0x2d5   : > { %v1253_v32 = vadd.f32 %v1252_v53, %v1233_v8  ;;  %v1270_v27 = vmul.f32 %v1269_v9, %v1267_v6  ;;  %v1281_v28 = vmul.f32 %v1280_v14, %v1278_v15  ;;  %v1352_v8 = vmul.f32 %v2770_v33, %v1351_v45 }
 0x2d6   : > { %v1407_v15 = vstv %s1725_s8  ;;  %s1930_s8 = smov [#allocation8]  }
 0x2d7   : > { %v1257_v22 = vadd.f32 %v1256_v51, %v1253_v32  ;;  %v1295_v24 = vpop.permute.xlu0 %1294  ;;  %v1306_v38 = vpop.permute.xlu1 %1305  ;;  %v1380_v32 = vstv %s1722_s12  ;;  %s1470_s12 = scalar_lea.sflag [#allocation5], %s2074_s18 }
 0x2d8   : > { %v1296_v56 = vsel %vm2272_vm5, %v1295_v24, 0.0  ;;  %v1307_v19 = vsel %vm2278_vm6, %v1306_v38, 0.0 }
 0x2d9   : > { %v1264_v7 = vadd.f32 %v1263_v47, %v1257_v22  ;;  %v1299_v61 = vmul.f32 %v1298_v25, %v1296_v56  ;;  %v1310_v44 = vmul.f32 %v1309_v2, %v1307_v19  ;;  %v1387_v22 = vstv %s1723_s5  ;;  %s1852_s5 = scalar_lea.vmem %s1484_s4, 32 }
 0x2da   : > { %p1853_p12 = scmp.ne.s32.totalorder %s1484_s4, %s1852_s5 }
 0x2db   : > { %v1271_v31 = vadd.f32 %v1270_v27, %v1264_v7  ;;  %v1381_v27 = vmul.f32 %v1380_v32, %v3071_v10 }
 0x2dc   : > { %p1854_p2 = pnand %p1853_p12, %p3282_p0 }
 0x2dd   : > { %v1275_v35 = vadd.f32 %v1274_v12, %v1271_v31 }
 0x2de   : > { %p1855_p7 = pneg %p1854_p2 }
 0x2df   : > { %v1282_v17 = vadd.f32 %v1281_v28, %v1275_v35  ;;  %v1326_v36 = vpop.permute.xlu0 %1325  ;;  %v1337_v0 = vpop.permute.xlu1 %1336  ;;  %v1411_v28 = vstv %s3190_s27  ;;  %v1418_v35 = vstv %s3194_s9  ;;  %s1856_s27 = sshll.u32 %s1930_s8, 4  ;;  %s1857_s27 = int_to_ptr.vmem [resolvable:$false] %s1856_s27 }
 0x2e0   : > { %v1327_v16 = vsel %vm2272_vm5, %v1326_v36, 0.0  ;;  %v1338_v30 = vsel %vm2278_vm6, %v1337_v0, 0.0  ;;  %v1429_v36 = vstv %s1729_s11  ;;  %s1858_s2 = scalar_lea.vmem %s1857_s27, 64  ;;  %p1859_p8 = scmp.lt.s32.totalorder %s1484_s4, %s1857_s27 }
 0x2e1   : > { %v1300_v43 = vadd.f32 %v1299_v61, %v1282_v17  ;;  %v1330_v29 = vmul.f32 %v1329_v52, %v1327_v16  ;;  %v1341_v62 = vmul.f32 %v1340_v58, %v1338_v30  ;;  %v1412_v17 = vmul.f32 %v1411_v28, %v3100_v57  ;;  %p1860_p9 = scmp.lt.s32.totalorder %s1858_s2, %s1852_s5 }
 0x2e2   : > { %v1436_v52 = vstv %s1730_s13  ;;  %v1458_v30 = vstv %s1732_s28 }
 0x2e3   : > { %v1304_v50 = vadd.f32 %v1303_v42, %v1300_v43  ;;  %v1344_v55 = vpop.permute.xlu0 %1343  ;;  %v1355_v4 = vpop.permute.xlu1 %1354  ;;  %p1861_p10 = por %p1860_p9, %p1859_p8 }
 0x2e4   : > { %v1345_v21 = vsel %vm2272_vm5, %v1344_v55, 0.0  ;;  %v1356_v48 = vsel %vm2278_vm6, %v1355_v4, 0.0 }
 0x2e5   : > { %v1311_v54 = vadd.f32 %v1310_v44, %v1304_v50  ;;  %v1348_v46 = vmul.f32 %v1347_v59, %v1345_v21  ;;  %v1359_v49 = vmul.f32 %v1358_v5, %v1356_v48  ;;  %v1430_v44 = vmul.f32 %v2836_v37, %v1429_v36  ;;  %p1862_p1 = pnand %p1861_p10, %p1855_p7 }
 0x2e7   : > { %v1331_v34 = vadd.f32 %v1330_v29, %v1311_v54  ;;  %v1373_v41 = vpop.permute.xlu0 %1372  ;;  %v1384_v51 = vpop.permute.xlu1 %1383  ;;  %v1454_v54 = vstv %s1731_s23 }
 0x2e8   : > { %v1374_v9 = vsel %vm2272_vm5, %v1373_v41, 0.0  ;;  %v1385_v11 = vsel %vm2278_vm6, %v1384_v51, 0.0 }
 0x2e9   : > { %v1335_v20 = vadd.f32 %v1334_v60, %v1331_v34  ;;  %v1377_v18 = vmul.f32 %v1376_v3, %v1374_v9  ;;  %v1388_v12 = vmul.f32 %v1387_v22, %v1385_v11  ;;  %v1465_v60 = vstv %s1733_s24 }
 0x2ea   : > { %v1459_v34 = vmul.f32 %v1458_v30, %v3121_v40 }
 0x2eb   : > { %v1342_v53 = vadd.f32 %v1341_v62, %v1335_v20 }
 0x2ed   : > { %v1349_v13 = vadd.f32 %v1348_v46, %v1342_v53 }
 0x2ef   : > { %v1353_v6 = vadd.f32 %v1352_v8, %v1349_v13  ;;  %v1404_v47 = vpop.permute.xlu0 %1403  ;;  %v1415_v24 = vpop.permute.xlu1 %1414 }
 0x2f0   : > { %v1405_v1 = vsel %vm2272_vm5, %v1404_v47, 0.0  ;;  %v1416_v38 = vsel %vm2278_vm6, %v1415_v24, 0.0 }
 0x2f1   : > { %v1360_v33 = vadd.f32 %v1359_v49, %v1353_v6  ;;  %v1408_v25 = vmul.f32 %v1407_v15, %v1405_v1  ;;  %v1419_v2 = vmul.f32 %v1418_v35, %v1416_v38 }
 0x2f3   : > { %v1378_v14 = vadd.f32 %v1377_v18, %v1360_v33  ;;  %v1422_v56 = vpop.permute.xlu0 %1421  ;;  %v1433_v42 = vpop.permute.xlu1 %1432 }
 0x2f4   : > { %v1423_v10 = vsel %vm2272_vm5, %v1422_v56, 0.0  ;;  %v1434_v16 = vsel %vm2278_vm6, %v1433_v42, 0.0 }
 0x2f5   : > { %v1382_v7 = vadd.f32 %v1381_v27, %v1378_v14  ;;  %v1426_v43 = vmul.f32 %v1425_v39, %v1423_v10  ;;  %v1437_v63 = vmul.f32 %v1436_v52, %v1434_v16 }
 0x2f7   : > { %v1389_v31 = vadd.f32 %v1388_v12, %v1382_v7  ;;  %v1451_v0 = vpop.permute.xlu0 %1450  ;;  %v1462_v58 = vpop.permute.xlu1 %1461 }
 0x2f8   : > { %v1452_v29 = vsel %vm2272_vm5, %v1451_v0, 0.0  ;;  %v1463_v37 = vsel %vm2278_vm6, %v1462_v58, 0.0 }
 0x2f9   : > { %v1409_v61 = vadd.f32 %v1408_v25, %v1389_v31  ;;  %v1455_v21 = vmul.f32 %v1454_v54, %v1452_v29  ;;  %v1466_v23 = vmul.f32 %v1465_v60, %v1463_v37 }
 0x2fb   : > { %v1413_v19 = vadd.f32 %v1412_v17, %v1409_v61 }
 0x2fd   : > { %v1420_v50 = vadd.f32 %v1419_v2, %v1413_v19 }
 0x2ff   : > { %v1427_v57 = vadd.f32 %v1426_v43, %v1420_v50 }
 0x301   : > { %v1431_v55 = vadd.f32 %v1430_v44, %v1427_v57 }
 0x303   : > { %v1438_v59 = vadd.f32 %v1437_v63, %v1431_v55 }
 0x305   : > { %v1456_v45 = vadd.f32 %v1455_v21, %v1438_v59 }
 0x307   : > { %v1460_v62 = vadd.f32 %v1459_v34, %v1456_v45 }
 0x309   : > { %v1467_v20 = vadd.f32 %v1466_v23, %v1460_v62 }
 0x30b   : > { %1468 = vst [vmem:[%s203_s30] sm:$0x3] %v1467_v20 }
 0x30c   : > { %1865 = shalt.err (!%p1862_p1)
}
 0x30d   : > { %s1866_s9 = scalar_lea.hbm %s1481_s6, 32  ;;  %s1870_s11 = scalar_lea.hbm %s3258_s3, 64 }
 0x30e   : > { %p1867_p4 = scmp.ne.s32.totalorder %s1481_s6, %s1866_s9  ;;  %p1871_p6 = scmp.lt.s32.totalorder %s1481_s6, %s3258_s3 }
 0x30f   : > { %p1872_p13 = scmp.lt.s32.totalorder %s1870_s11, %s1866_s9 }
 0x310   : > { %p1868_p11 = pnand %p1867_p4, %p3282_p0 }
 0x311   : > { %p1873_p3 = por %p1872_p13, %p1871_p6 }
 0x312   : > { %p1869_p5 = pneg %p1868_p11 }
 0x314   : > { %p1874_p12 = pnand %p1873_p3, %p1869_p5 }
 0x316   : > { %1877 = shalt.err (!%p1874_p12)
}
 0x317   : > { %1745 = dma.vmem_to_hbm [thread:$0]  (%p3282_p0), %s1484_s4, 32, %s1481_s6, %s1470_s12  }
 0x318 PF: > { %s1495_s28 = sand.u32 1, %s1908_s14   ;;  %p3283_p2 = scmp.ne.s32.totalorder %s3266_s26, 0 }
 0x319   : > { %p3284_p7 = scmp.ge.s32.totalorder %s1920_s17, 2  ;;  %s1496_s24 = scalar_lea.sflag [#allocation5], %s1495_s28 }
 0x31b   : > { %p1756_p8 = pnand %p3284_p7, %p3283_p2 }
 0x31d   : > { %p1757_p9 = pneg %p1756_p8 }
 0x31f   : > { %1903 = dma.done.wait (%p1757_p9), %s1496_s24, 32  }
 0x320   : > { %1905 = vsyncadd (%p1757_p9), %s1496_s24, 4294967264  ;;  %p18_p10 = scmp.ge.s32.totalorder %s1979_s19, 4   ;;  %s3285_s14 = smov %s1912_s15 }
 0x321   : > { %s3286_s15 = smov %s1916_s16  ;;  %s3287_s16 = smov %s1991_s22 }
 0x322   : > { %s3288_s17 = smov %s1979_s19  ;;  %20 = sbr.rel (!%p18_p10) target bundleno = 8 (0x8), region = 97 }
 0x327   :  { %1501 = vsyncpa [#allocation4], 1 }
 0x328   :  { %1503 = vsyncpa [#allocation4 + $0x1], 1 }
 0x329   :  { %1504 = vsyncpa [#allocation5], 1 }
 0x32a   :  { %1506 = vsyncpa [#allocation5 + $0x1], 1 }
 0x32b   :  { %1507 = vsyncpa [#allocation6], 1 }
 0x32c   :  { %1509 = vsyncpa [#allocation6 + $0x1], 1 }

</bundles_post_ra>
